<compile_context>
chip_gen: v5e
topology: v5e:2x2
jax: 0.10.0
libtpu: 0.0.40
codegen_flags: <defaults>
</compile_context>

<pallas_src>
import functools
import math

import numpy as np
import jax
import jax.numpy as jnp
from jax import lax
from jax.experimental import pallas as pl
from jax.experimental.pallas import tpu as pltpu

_GELU_C = math.sqrt(2.0 / math.pi)


# ----------------------------------------------------------------------------
# Shared math helpers (usable both inside the kernel and in the JAX reference)
# ----------------------------------------------------------------------------
def _layer_norm(x, gamma, beta, eps=1e-5):
    mu = jnp.mean(x, axis=-1, keepdims=True)
    var = jnp.mean((x - mu) ** 2, axis=-1, keepdims=True)
    return (x - mu) * lax.rsqrt(var + eps) * gamma + beta


def _gelu_tanh(x):
    return 0.5 * x * (1.0 + jnp.tanh(_GELU_C * (x + 0.044715 * x * x * x)))


# ----------------------------------------------------------------------------
# Fused Pallas kernel: the whole encoder stack in ONE invocation.
# ----------------------------------------------------------------------------
def _encoder_stack_kernel(x_ref, e_ref, et_ref, msel3_ref, col3_ref, gb_ref,
                          wbig_ref, vbig_ref, o_ref, *, scale, H, dh, num_layers):
    f32 = jnp.float32
    bf16 = jnp.bfloat16
    D = H * dh
    F = 2 * D
    sec = col3_ref.shape[1] // 3          # 128-aligned q|k|v section stride

    E = e_ref[...]                        # [N, T]    bf16 0/1: row-replicate
    Et = et_ref[...]                      # [T, N]    bf16 0/1: row-collapse
    Msel3 = msel3_ref[...]                # [N, 3D]   bf16 0/1: head-block select
    Col3 = col3_ref[...]                  # [3D, 3*sec] bf16 0/1: block collapse
    Msel = Msel3[:, 0:D]                  # [N, D]
    Col = Col3[0:D, 0:dh]                 # [D, dh]
    gbias = gb_ref[...]                   # [N, N]    f32: block-diag head mask

    x = x_ref[...]                        # [T, D] f32 activation (lives in vregs)

    for l in range(num_layers):           # unrolled: num_layers is static & small
        wqkv = wbig_ref[l, :, 0:3 * D]                      # [D, 3D]  bf16
        wo = wbig_ref[l, :, 3 * D:4 * D]                    # [D, D]   bf16
        w1 = wbig_ref[l, :, 4 * D:4 * D + F]                # [D, F]   bf16
        w2t = wbig_ref[l, :, 4 * D + F:4 * D + 2 * F]       # [D, F]   bf16 (=w2^T)
        bqkv = vbig_ref[l, 0:1, 0:3 * D]                    # [1, 3D]  f32
        bf1 = vbig_ref[l, 1:2, 0:F]                         # [1, F]
        bo = vbig_ref[l, 2:3, 0:D]
        g1 = vbig_ref[l, 3:4, 0:D]
        be1 = vbig_ref[l, 4:5, 0:D]
        bf2 = vbig_ref[l, 5:6, 0:D]
        g2 = vbig_ref[l, 6:7, 0:D]
        be2 = vbig_ref[l, 7:8, 0:D]

        # --- q/k/v projection at [T, 3D], THEN replicate rows into the quirky
        #     torch `.view(H, -1, dh)` flat-row order (row n <- time n//H). ----
        qkv = jnp.dot(x.astype(bf16), wqkv,
                      preferred_element_type=f32) + bqkv                      # [T, 3D]
        qkv2 = jnp.dot(E, qkv.astype(bf16), preferred_element_type=f32)       # [N, 3D]

        # --- fused masked collapse: ONE matmul yields q|k|v (128-aligned) -----
        qc = jnp.dot(qkv2.astype(bf16) * Msel3, Col3,
                     preferred_element_type=f32)                              # [N, 3*sec]
        q2 = qc[:, 0:dh]
        k2 = qc[:, sec:sec + dh]
        v2 = qc[:, 2 * sec:2 * sec + dh]

        # --- all heads at once: block-diagonal masked attention (group=n//T) --
        s = lax.dot_general(q2.astype(bf16), k2.astype(bf16),
                            (((1,), (1,)), ((), ())),
                            preferred_element_type=f32) * scale + gbias       # [N, N]
        s = s - jnp.max(s, axis=-1, keepdims=True)
        p = jnp.exp(s)
        p = p * pl.reciprocal(jnp.sum(p, axis=-1, keepdims=True), approx=True)
        c = jnp.dot(p.astype(bf16), v2.astype(bf16),
                    preferred_element_type=f32)                               # [N, dh]

        # --- merge back to [T, D] (inverse of the quirky view) ----------------
        cexp = lax.dot_general(c.astype(bf16), Col, (((1,), (1,)), ((), ())),
                               preferred_element_type=f32)                    # [N, D]
        ctx = jnp.dot(Et, cexp.astype(bf16) * Msel,
                      preferred_element_type=f32)                             # [T, D]

        attn = jnp.dot(ctx.astype(bf16), wo, preferred_element_type=f32) + bo
        y1 = _layer_norm(x + attn, g1, be1)

        # Position-wise FFN: Conv1d(kernel=1) == [T, D] @ [D, F] matmul.
        h = jnp.dot(y1.astype(bf16), w1, preferred_element_type=f32) + bf1
        h = _gelu_tanh(h)
        ffn = lax.dot_general(h.astype(bf16), w2t, (((1,), (1,)), ((), ())),
                              preferred_element_type=f32) + bf2               # [T, D]
        x = _layer_norm(y1 + ffn, g2, be2)

    o_ref[...] = x


def transformer_encoder_pallas(x, wbig, vbig, *, T, H, dh):
    """Run the full stacked encoder (all layers) in a single pallas_call."""
    D = H * dh
    F = 2 * D
    N = T * H
    L = int(wbig.shape[0])
    scale = float((dh // H) ** (-0.5))    # faithful torch integer-div quirk
    sec = ((dh + 127) // 128) * 128       # 128-aligned q|k|v output sections

    # Host-built constant 0/1 matrices (bf16-exact) implementing the flat
    # re-indexing of torch's `.view(H, -1, dh)` as MXU matmuls.
    n = np.arange(N)
    E = (n[:, None] // H == np.arange(T)[None, :]).astype(np.float32)              # [N, T]
    Msel = ((np.arange(D)[None, :] // dh) == (n[:, None] % H)).astype(np.float32)  # [N, D]
    Msel3 = np.tile(Msel, (1, 3))                                                  # [N, 3D]
    Col = ((np.arange(D)[:, None] % dh) == np.arange(dh)[None, :]).astype(np.float32)  # [D, dh]
    Col3 = np.zeros((3 * D, 3 * sec), np.float32)
    for s_ in range(3):
        Col3[s_ * D:(s_ + 1) * D, s_ * sec:s_ * sec + dh] = Col
    gbias = np.where((n[:, None] // T) == (n[None, :] // T),
                     0.0, -1e30).astype(np.float32)                                # [N, N]

    consts = (jnp.asarray(E, jnp.bfloat16),
              jnp.asarray(np.ascontiguousarray(E.T), jnp.bfloat16),
              jnp.asarray(Msel3, jnp.bfloat16),
              jnp.asarray(Col3, jnp.bfloat16),
              jnp.asarray(gbias, jnp.float32))

    def z2(i):
        return (0, 0)

    def z3(i):
        return (0, 0, 0)

    # Advisory cost estimate.
    mm = (T * D * 3 * D + N * T * 3 * D + N * 3 * D * 3 * sec + 2 * N * N * dh
          + N * dh * D + T * N * D + T * D * D + 2 * T * D * F)
    flops = 2 * L * mm
    transc = L * (N * N + T * F + 2 * T + N)
    wbytes = int(wbig.size) * 2 + int(vbig.size) * 4
    cbytes = 2 * (E.size + E.size + Msel3.size + Col3.size) + 4 * gbias.size
    bytes_accessed = wbytes + cbytes + 2 * 4 * T * D

    # VMEM guard (v7x: 64 MiB physical / 32 MiB scoped default): size explicitly
    # with headroom; trivial here but keeps deep stacks from silently OOM-ing.
    vmem_limit = int(min(56 * 2**20, max(8 * 2**20, 4 * (wbytes + cbytes) + (2 << 20))))

    kern = functools.partial(_encoder_stack_kernel, scale=scale, H=H, dh=dh,
                             num_layers=L)

    return pl.pallas_call(
        kern,
        out_shape=jax.ShapeDtypeStruct((T, D), jnp.float32),
        grid_spec=pltpu.PrefetchScalarGridSpec(
            num_scalar_prefetch=0,
            grid=(1,),
            in_specs=[
                pl.BlockSpec((T, D), z2),                  # x (initial activation)
                pl.BlockSpec((N, T), z2),                  # E
                pl.BlockSpec((T, N), z2),                  # E^T
                pl.BlockSpec((N, 3 * D), z2),              # Msel3
                pl.BlockSpec((3 * D, 3 * sec), z2),        # Col3
                pl.BlockSpec((N, N), z2),                  # group-mask bias
                pl.BlockSpec((L, D, 3 * D + D + 2 * F), z3),  # packed bf16 weights
                pl.BlockSpec((L, 8, 3 * D), z3),              # packed f32 vectors
            ],
            out_specs=pl.BlockSpec((T, D), z2),
        ),
        compiler_params=pltpu.CompilerParams(
            dimension_semantics=("arbitrary",),
            vmem_limit_bytes=vmem_limit),
        cost_estimate=pl.CostEstimate(flops=int(flops), transcendentals=int(transc),
                                      bytes_accessed=int(bytes_accessed)),
    )(x, *consts, wbig, vbig)


# ----------------------------------------------------------------------------
# Glue: positional encoding, rel_embed concat, head tiling (folded into one jit)
# ----------------------------------------------------------------------------
def make_pos_table(d_model, max_seq_len):
    pe = np.array([[pos / np.power(10000, 2.0 * (j // 2) / d_model)
                    for j in range(d_model)] for pos in range(max_seq_len)])
    pe[:, 0::2] = np.sin(pe[:, 0::2])
    pe[:, 1::2] = np.cos(pe[:, 1::2])
    pe = np.concatenate([np.zeros((1, d_model)), pe], axis=0)
    return jnp.asarray(pe, dtype=jnp.float32)


def _pack_layer_params(layers):
    """Pack per-layer params into 2 slabs: wbig [L,D,3D+D+2F] bf16, vbig [L,8,3D] f32."""
    wrows, vrows = [], []
    for lp in layers:
        D = lp["wqt"].shape[0]
        W3 = 3 * D
        w = jnp.concatenate([lp["wqt"], lp["wkt"], lp["wvt"], lp["wot"],
                             lp["w1t"], lp["w2t"].T], axis=1)        # [D, 3D+D+F+F]
        wrows.append(w)

        def pad(v):
            return jnp.pad(v, ((0, 0), (0, W3 - v.shape[1])))

        v = jnp.concatenate([
            jnp.concatenate([lp["bq"], lp["bk"], lp["bv"]], axis=1),  # row 0: bqkv
            pad(lp["bf1"]), pad(lp["bo"]), pad(lp["g1"]), pad(lp["be1"]),
            pad(lp["bf2"]), pad(lp["g2"]), pad(lp["be2"])], axis=0)   # [8, 3D]
        vrows.append(v)
    return jnp.stack(wrows, axis=0), jnp.stack(vrows, axis=0)


def init_params(key, emb_dim, num_layers, num_heads):
    D = emb_dim * num_heads
    F = 2 * D
    keys = iter(jax.random.split(key, 1 + 16 * num_layers))

    def w(k, fan_in, shape):   # big matrices stored in bf16 (MXU operands)
        return (jax.random.normal(k, shape, jnp.float32) / np.sqrt(fan_in)
                ).astype(jnp.bfloat16)

    def vec(k, ncol, base=0.0):
        return base + 0.1 * jax.random.normal(k, (1, ncol), jnp.float32)

    params = {
        "num_heads": num_heads,
        "emb_dim": emb_dim,
        "rel_embed": jax.random.uniform(next(keys), (1, emb_dim), dtype=jnp.float32),
        "pos_table": make_pos_table(emb_dim, max_seq_len=3),
        "layers": [],
    }
    for _ in range(num_layers):
        lp = {
            "wqt": w(next(keys), D, (D, D)), "bq": vec(next(keys), D),
            "wkt": w(next(keys), D, (D, D)), "bk": vec(next(keys), D),
            "wvt": w(next(keys), D, (D, D)), "bv": vec(next(keys), D),
            "wot": w(next(keys), D, (D, D)), "bo": vec(next(keys), D),
            "g1": vec(next(keys), D, base=1.0), "be1": vec(next(keys), D),
            "w1t": w(next(keys), D, (D, F)), "bf1": vec(next(keys), F),
            "w2t": w(next(keys), F, (F, D)), "bf2": vec(next(keys), D),
            "g2": vec(next(keys), D, base=1.0), "be2": vec(next(keys), D),
        }
        params["layers"].append(lp)
    params["wbig"], params["vbig"] = _pack_layer_params(params["layers"])
    return params


@functools.partial(jax.jit, static_argnames=("T", "H", "dh"))
def _encode_fused(seq, pos_table, wbig, vbig, *, T, H, dh):
    input_pos = jnp.asarray([1] + [2] * (T - 1), dtype=jnp.int32)
    x = jnp.tile(seq + pos_table[input_pos], (1, H))            # repeat_dim -> [T, D]
    return transformer_encoder_pallas(x, wbig, vbig, T=T, H=H, dh=dh)


def relation_representation(params, support, query=None):
    # TODO(synk): the module is strictly batch-1; a leading "parallel" grid axis
    # over many (support, query) pairs would amortize launch cost and light up
    # v7x's second TensorCore, but it would change the module's call signature.
    H = params["num_heads"]
    dh = params["emb_dim"]
    if query is None:
        seq = jnp.concatenate([params["rel_embed"], support], axis=0)
    else:
        seq = jnp.concatenate([support, query], axis=0)
    T = int(seq.shape[0])
    out = _encode_fused(seq, params["pos_table"], params["wbig"], params["vbig"],
                        T=T, H=H, dh=dh)
    return out[0:1, :] if query is None else out[1:, :]


# ----------------------------------------------------------------------------
# Pure-JAX reference (replicates the torch .view() head-split quirk exactly)
# ----------------------------------------------------------------------------
def encoder_layer_ref(x, lp, *, T, H, dh):
    D = H * dh
    scale = (dh // H) ** (-0.5)
    q = x @ lp["wqt"].astype(jnp.float32) + lp["bq"]
    k = x @ lp["wkt"].astype(jnp.float32) + lp["bk"]
    v = x @ lp["wvt"].astype(jnp.float32) + lp["bv"]
    qh = q.reshape(H, T, dh)
    kh = k.reshape(H, T, dh)
    vh = v.reshape(H, T, dh)
    s = jnp.einsum("hqd,hkd->hqk", qh, kh) * scale
    p = jax.nn.softmax(s, axis=-1)
    ctx = jnp.einsum("hqk,hkd->hqd", p, vh).reshape(T, D)
    attn_out = ctx @ lp["wot"].astype(jnp.float32) + lp["bo"]
    y1 = _layer_norm(x + attn_out, lp["g1"], lp["be1"])
    h = y1 @ lp["w1t"].astype(jnp.float32) + lp["bf1"]
    h = _gelu_tanh(h)
    return _layer_norm(y1 + h @ lp["w2t"].astype(jnp.float32) + lp["bf2"],
                       lp["g2"], lp["be2"])


def relation_representation_ref(params, support, query=None):
    H = params["num_heads"]
    dh = params["emb_dim"]
    if query is None:
        seq = jnp.concatenate([params["rel_embed"], support], axis=0)
    else:
        seq = jnp.concatenate([support, query], axis=0)
    T = int(seq.shape[0])
    pos = params["pos_table"][np.array([1] + [2] * (T - 1))]
    out = jnp.tile(seq + pos, (1, H))
    for lp in params["layers"]:
        out = encoder_layer_ref(out, lp, T=T, H=H, dh=dh)
    return out[0:1, :] if query is None else out[1:, :]


if __name__ == "__main__":
    emb_dim, num_heads, num_layers = 32, 4, 2
    key = jax.random.PRNGKey(0)
    kp, ks, kq = jax.random.split(key, 3)
    params = init_params(kp, emb_dim, num_layers, num_heads)

    support = jax.random.normal(ks, (3, emb_dim), dtype=jnp.float32)
    query = jax.random.normal(kq, (2, emb_dim), dtype=jnp.float32)

    # Tolerance covers bf16 MXU operands in the kernel (the reference runs the
    # same bf16-stored weights in f32 math).
    TOL = 3e-2

    # Path 1: query=None -> [1, emb_dim*num_heads]
    out1 = jax.block_until_ready(relation_representation(params, support))
    ref1 = relation_representation_ref(params, support)
    np.testing.assert_allclose(np.asarray(out1), np.asarray(ref1), rtol=TOL, atol=TOL)

    # Path 2: with query -> [num_query, emb_dim*num_heads]
    out2 = jax.block_until_ready(relation_representation(params, support, query))
    ref2 = relation_representation_ref(params, support, query)
    np.testing.assert_allclose(np.asarray(out2), np.asarray(ref2), rtol=TOL, atol=TOL)

    print("KERNEL_OK")
</pallas_src>

<mosaic_0001>
module attributes {stable_mosaic.version = 11 : i64} {
  func.func @_encoder_stack_kernel(%arg0: i32, %arg1: memref<4x128xf32, #tpu.memory_space<vmem>>, %arg2: memref<16x4xbf16, #tpu.memory_space<vmem>>, %arg3: memref<4x16xbf16, #tpu.memory_space<vmem>>, %arg4: memref<16x384xbf16, #tpu.memory_space<vmem>>, %arg5: memref<384x384xbf16, #tpu.memory_space<vmem>>, %arg6: memref<16x16xf32, #tpu.memory_space<vmem>>, %arg7: memref<2x128x1024xbf16, #tpu.memory_space<vmem>>, %arg8: memref<2x8x384xf32, #tpu.memory_space<vmem>>, %arg9: memref<4x128xf32, #tpu.memory_space<vmem>>) attributes {dimension_semantics = [#tpu.dimension_semantics<arbitrary>], iteration_bounds = array<i64: 1>, scalar_prefetch = 0 : i64, scratch_operands = 0 : i64, tpu.core_type = #tpu.core_type<tc>, window_params = [{pipeline_mode = #tpu.pipeline_mode<synchronous>, transform_indices = @transform_0, window_bounds = array<i64: 4, 128>}, {pipeline_mode = #tpu.pipeline_mode<synchronous>, transform_indices = @transform_1, window_bounds = array<i64: 16, 4>}, {pipeline_mode = #tpu.pipeline_mode<synchronous>, transform_indices = @transform_2, window_bounds = array<i64: 4, 16>}, {pipeline_mode = #tpu.pipeline_mode<synchronous>, transform_indices = @transform_3, window_bounds = array<i64: 16, 384>}, {pipeline_mode = #tpu.pipeline_mode<synchronous>, transform_indices = @transform_4, window_bounds = array<i64: 384, 384>}, {pipeline_mode = #tpu.pipeline_mode<synchronous>, transform_indices = @transform_5, window_bounds = array<i64: 16, 16>}, {pipeline_mode = #tpu.pipeline_mode<synchronous>, transform_indices = @transform_6, window_bounds = array<i64: 2, 128, 1024>}, {pipeline_mode = #tpu.pipeline_mode<synchronous>, transform_indices = @transform_7, window_bounds = array<i64: 2, 8, 384>}, {pipeline_mode = #tpu.pipeline_mode<synchronous>, transform_indices = @transform_8, window_bounds = array<i64: 4, 128>}]} {
    %c0 = arith.constant 0 : index
    %c0_0 = arith.constant 0 : index
    %0 = vector.load %arg2[%c0, %c0_0] : memref<16x4xbf16, #tpu.memory_space<vmem>>, vector<16x4xbf16>
    %c0_1 = arith.constant 0 : index
    %c0_2 = arith.constant 0 : index
    %1 = vector.load %arg3[%c0_1, %c0_2] : memref<4x16xbf16, #tpu.memory_space<vmem>>, vector<4x16xbf16>
    %c0_3 = arith.constant 0 : index
    %c0_4 = arith.constant 0 : index
    %2 = vector.load %arg4[%c0_3, %c0_4] : memref<16x384xbf16, #tpu.memory_space<vmem>>, vector<16x384xbf16>
    %c0_5 = arith.constant 0 : index
    %c0_6 = arith.constant 0 : index
    %3 = vector.load %arg5[%c0_5, %c0_6] : memref<384x384xbf16, #tpu.memory_space<vmem>>, vector<384x384xbf16>
    %4 = vector.extract_strided_slice %2 {offsets = [0, 0], sizes = [16, 128], strides = [1, 1]} : vector<16x384xbf16> to vector<16x128xbf16>
    %5 = vector.extract_strided_slice %3 {offsets = [0, 0], sizes = [128, 32], strides = [1, 1]} : vector<384x384xbf16> to vector<128x32xbf16>
    %c0_7 = arith.constant 0 : index
    %c0_8 = arith.constant 0 : index
    %6 = vector.load %arg6[%c0_7, %c0_8] : memref<16x16xf32, #tpu.memory_space<vmem>>, vector<16x16xf32>
    %c0_9 = arith.constant 0 : index
    %c0_10 = arith.constant 0 : index
    %7 = vector.load %arg1[%c0_9, %c0_10] : memref<4x128xf32, #tpu.memory_space<vmem>>, vector<4x128xf32>
    %c0_11 = arith.constant 0 : index
    %c0_12 = arith.constant 0 : index
    %c0_13 = arith.constant 0 : index
    %8 = vector.load %arg7[%c0_11, %c0_12, %c0_13] : memref<2x128x1024xbf16, #tpu.memory_space<vmem>>, vector<1x128x384xbf16>
    %9 = vector.shape_cast %8 : vector<1x128x384xbf16> to vector<128x384xbf16>
    %c0_14 = arith.constant 0 : index
    %c0_15 = arith.constant 0 : index
    %c384 = arith.constant 384 : index
    %10 = vector.load %arg7[%c0_14, %c0_15, %c384] : memref<2x128x1024xbf16, #tpu.memory_space<vmem>>, vector<1x128x128xbf16>
    %11 = vector.shape_cast %10 : vector<1x128x128xbf16> to vector<128x128xbf16>
    %c0_16 = arith.constant 0 : index
    %c0_17 = arith.constant 0 : index
    %c512 = arith.constant 512 : index
    %12 = vector.load %arg7[%c0_16, %c0_17, %c512] : memref<2x128x1024xbf16, #tpu.memory_space<vmem>>, vector<1x128x256xbf16>
    %13 = vector.shape_cast %12 : vector<1x128x256xbf16> to vector<128x256xbf16>
    %c0_18 = arith.constant 0 : index
    %c0_19 = arith.constant 0 : index
    %c768 = arith.constant 768 : index
    %14 = vector.load %arg7[%c0_18, %c0_19, %c768] : memref<2x128x1024xbf16, #tpu.memory_space<vmem>>, vector<1x128x256xbf16>
    %15 = vector.shape_cast %14 : vector<1x128x256xbf16> to vector<128x256xbf16>
    %c0_20 = arith.constant 0 : index
    %c0_21 = arith.constant 0 : index
    %c0_22 = arith.constant 0 : index
    %16 = vector.load %arg8[%c0_20, %c0_21, %c0_22] : memref<2x8x384xf32, #tpu.memory_space<vmem>>, vector<1x1x384xf32>
    %17 = vector.shape_cast %16 : vector<1x1x384xf32> to vector<1x384xf32>
    %c0_23 = arith.constant 0 : index
    %c1 = arith.constant 1 : index
    %c0_24 = arith.constant 0 : index
    %18 = vector.load %arg8[%c0_23, %c1, %c0_24] : memref<2x8x384xf32, #tpu.memory_space<vmem>>, vector<1x1x256xf32>
    %19 = vector.shape_cast %18 : vector<1x1x256xf32> to vector<1x256xf32>
    %c0_25 = arith.constant 0 : index
    %c2 = arith.constant 2 : index
    %c0_26 = arith.constant 0 : index
    %20 = vector.load %arg8[%c0_25, %c2, %c0_26] : memref<2x8x384xf32, #tpu.memory_space<vmem>>, vector<1x1x128xf32>
    %21 = vector.shape_cast %20 : vector<1x1x128xf32> to vector<1x128xf32>
    %c0_27 = arith.constant 0 : index
    %c3 = arith.constant 3 : index
    %c0_28 = arith.constant 0 : index
    %22 = vector.load %arg8[%c0_27, %c3, %c0_28] : memref<2x8x384xf32, #tpu.memory_space<vmem>>, vector<1x1x128xf32>
    %23 = vector.shape_cast %22 : vector<1x1x128xf32> to vector<1x128xf32>
    %c0_29 = arith.constant 0 : index
    %c4 = arith.constant 4 : index
    %c0_30 = arith.constant 0 : index
    %24 = vector.load %arg8[%c0_29, %c4, %c0_30] : memref<2x8x384xf32, #tpu.memory_space<vmem>>, vector<1x1x128xf32>
    %25 = vector.shape_cast %24 : vector<1x1x128xf32> to vector<1x128xf32>
    %c0_31 = arith.constant 0 : index
    %c5 = arith.constant 5 : index
    %c0_32 = arith.constant 0 : index
    %26 = vector.load %arg8[%c0_31, %c5, %c0_32] : memref<2x8x384xf32, #tpu.memory_space<vmem>>, vector<1x1x128xf32>
    %27 = vector.shape_cast %26 : vector<1x1x128xf32> to vector<1x128xf32>
    %c0_33 = arith.constant 0 : index
    %c6 = arith.constant 6 : index
    %c0_34 = arith.constant 0 : index
    %28 = vector.load %arg8[%c0_33, %c6, %c0_34] : memref<2x8x384xf32, #tpu.memory_space<vmem>>, vector<1x1x128xf32>
    %29 = vector.shape_cast %28 : vector<1x1x128xf32> to vector<1x128xf32>
    %c0_35 = arith.constant 0 : index
    %c7 = arith.constant 7 : index
    %c0_36 = arith.constant 0 : index
    %30 = vector.load %arg8[%c0_35, %c7, %c0_36] : memref<2x8x384xf32, #tpu.memory_space<vmem>>, vector<1x1x128xf32>
    %31 = vector.shape_cast %30 : vector<1x1x128xf32> to vector<1x128xf32>
    %32 = arith.truncf %7 : vector<4x128xf32> to vector<4x128xbf16>
    %cst = arith.constant dense<0.000000e+00> : vector<4x384xf32>
    %33 = tpu.matmul %32, %9, %cst {dimension_numbers = #tpu.dot_dimension_numbers<[1], [0], [0], [1], [0, 0, 1, 1], [], []>} : vector<4x128xbf16>, vector<128x384xbf16>, vector<4x384xf32> -> vector<4x384xf32>
    %34 = vector.broadcast %17 : vector<1x384xf32> to vector<4x384xf32>
    %35 = arith.addf %33, %34 : vector<4x384xf32>
    %36 = arith.truncf %35 : vector<4x384xf32> to vector<4x384xbf16>
    %cst_37 = arith.constant dense<0.000000e+00> : vector<16x384xf32>
    %37 = tpu.matmul %0, %36, %cst_37 {dimension_numbers = #tpu.dot_dimension_numbers<[1], [0], [0], [1], [0, 0, 1, 1], [], []>} : vector<16x4xbf16>, vector<4x384xbf16>, vector<16x384xf32> -> vector<16x384xf32>
    %38 = arith.truncf %37 : vector<16x384xf32> to vector<16x384xbf16>
    %39 = arith.mulf %38, %2 : vector<16x384xbf16>
    %cst_38 = arith.constant dense<0.000000e+00> : vector<16x384xf32>
    %40 = tpu.matmul %39, %3, %cst_38 {dimension_numbers = #tpu.dot_dimension_numbers<[1], [0], [0], [1], [0, 0, 1, 1], [], []>} : vector<16x384xbf16>, vector<384x384xbf16>, vector<16x384xf32> -> vector<16x384xf32>
    %41 = vector.extract_strided_slice %40 {offsets = [0, 0], sizes = [16, 32], strides = [1, 1]} : vector<16x384xf32> to vector<16x32xf32>
    %42 = vector.extract_strided_slice %40 {offsets = [0, 128], sizes = [16, 32], strides = [1, 1]} : vector<16x384xf32> to vector<16x32xf32>
    %43 = vector.extract_strided_slice %40 {offsets = [0, 256], sizes = [16, 32], strides = [1, 1]} : vector<16x384xf32> to vector<16x32xf32>
    %44 = arith.truncf %41 : vector<16x32xf32> to vector<16x32xbf16>
    %45 = arith.truncf %42 : vector<16x32xf32> to vector<16x32xbf16>
    %cst_39 = arith.constant dense<0.000000e+00> : vector<16x16xf32>
    %46 = tpu.matmul %44, %45, %cst_39 {dimension_numbers = #tpu.dot_dimension_numbers<[1], [1], [0], [0], [0, 0, 1, 0], [], []>} : vector<16x32xbf16>, vector<16x32xbf16>, vector<16x16xf32> -> vector<16x16xf32>
    %cst_40 = arith.constant 0.353553385 : f32
    %47 = vector.broadcast %cst_40 : f32 to vector<16x16xf32>
    %48 = arith.mulf %46, %47 : vector<16x16xf32>
    %49 = arith.addf %48, %6 : vector<16x16xf32>
    %cst_41 = arith.constant dense<0xFF800000> : vector<16xf32>
    %50 = vector.multi_reduction <maximumf>, %49, %cst_41 [1] : vector<16x16xf32> to vector<16xf32>
    %51 = vector.shape_cast %50 : vector<16xf32> to vector<16x1xf32>
    %52 = vector.broadcast %51 : vector<16x1xf32> to vector<16x16xf32>
    %53 = arith.subf %49, %52 : vector<16x16xf32>
    %54 = math.exp %53 : vector<16x16xf32>
    %cst_42 = arith.constant dense<0.000000e+00> : vector<16xf32>
    %55 = vector.multi_reduction <add>, %54, %cst_42 [1] : vector<16x16xf32> to vector<16xf32>
    %56 = vector.shape_cast %55 : vector<16xf32> to vector<16x1xf32>
    %57 = tpu.reciprocal %56 {approx = true} : vector<16x1xf32> -> vector<16x1xf32>
    %58 = vector.broadcast %57 : vector<16x1xf32> to vector<16x16xf32>
    %59 = arith.mulf %54, %58 : vector<16x16xf32>
    %60 = arith.truncf %59 : vector<16x16xf32> to vector<16x16xbf16>
    %61 = arith.truncf %43 : vector<16x32xf32> to vector<16x32xbf16>
    %cst_43 = arith.constant dense<0.000000e+00> : vector<16x32xf32>
    %62 = tpu.matmul %60, %61, %cst_43 {dimension_numbers = #tpu.dot_dimension_numbers<[1], [0], [0], [1], [0, 0, 1, 1], [], []>} : vector<16x16xbf16>, vector<16x32xbf16>, vector<16x32xf32> -> vector<16x32xf32>
    %63 = arith.truncf %62 : vector<16x32xf32> to vector<16x32xbf16>
    %cst_44 = arith.constant dense<0.000000e+00> : vector<16x128xf32>
    %64 = tpu.matmul %63, %5, %cst_44 {dimension_numbers = #tpu.dot_dimension_numbers<[1], [1], [0], [0], [0, 0, 1, 0], [], []>} : vector<16x32xbf16>, vector<128x32xbf16>, vector<16x128xf32> -> vector<16x128xf32>
    %65 = arith.truncf %64 : vector<16x128xf32> to vector<16x128xbf16>
    %66 = arith.mulf %65, %4 : vector<16x128xbf16>
    %cst_45 = arith.constant dense<0.000000e+00> : vector<4x128xf32>
    %67 = tpu.matmul %1, %66, %cst_45 {dimension_numbers = #tpu.dot_dimension_numbers<[1], [0], [0], [1], [0, 0, 1, 1], [], []>} : vector<4x16xbf16>, vector<16x128xbf16>, vector<4x128xf32> -> vector<4x128xf32>
    %68 = arith.truncf %67 : vector<4x128xf32> to vector<4x128xbf16>
    %cst_46 = arith.constant dense<0.000000e+00> : vector<4x128xf32>
    %69 = tpu.matmul %68, %11, %cst_46 {dimension_numbers = #tpu.dot_dimension_numbers<[1], [0], [0], [1], [0, 0, 1, 1], [], []>} : vector<4x128xbf16>, vector<128x128xbf16>, vector<4x128xf32> -> vector<4x128xf32>
    %70 = vector.broadcast %21 : vector<1x128xf32> to vector<4x128xf32>
    %71 = arith.addf %69, %70 : vector<4x128xf32>
    %72 = arith.addf %7, %71 : vector<4x128xf32>
    %cst_47 = arith.constant dense<0.000000e+00> : vector<4xf32>
    %73 = vector.multi_reduction <add>, %72, %cst_47 [1] : vector<4x128xf32> to vector<4xf32>
    %74 = vector.shape_cast %73 : vector<4xf32> to vector<4x1xf32>
    %cst_48 = arith.constant 1.280000e+02 : f32
    %75 = vector.broadcast %cst_48 : f32 to vector<4x1xf32>
    %76 = arith.divf %74, %75 : vector<4x1xf32>
    %77 = vector.broadcast %76 : vector<4x1xf32> to vector<4x128xf32>
    %78 = arith.subf %72, %77 : vector<4x128xf32>
    %79 = arith.mulf %78, %78 : vector<4x128xf32>
    %cst_49 = arith.constant dense<0.000000e+00> : vector<4xf32>
    %80 = vector.multi_reduction <add>, %79, %cst_49 [1] : vector<4x128xf32> to vector<4xf32>
    %81 = vector.shape_cast %80 : vector<4xf32> to vector<4x1xf32>
    %cst_50 = arith.constant 1.280000e+02 : f32
    %82 = vector.broadcast %cst_50 : f32 to vector<4x1xf32>
    %83 = arith.divf %81, %82 : vector<4x1xf32>
    %84 = vector.broadcast %76 : vector<4x1xf32> to vector<4x128xf32>
    %85 = arith.subf %72, %84 : vector<4x128xf32>
    %cst_51 = arith.constant 9.99999974E-6 : f32
    %86 = vector.broadcast %cst_51 : f32 to vector<4x1xf32>
    %87 = arith.addf %83, %86 : vector<4x1xf32>
    %88 = math.rsqrt %87 : vector<4x1xf32>
    %89 = vector.broadcast %88 : vector<4x1xf32> to vector<4x128xf32>
    %90 = arith.mulf %85, %89 : vector<4x128xf32>
    %91 = vector.broadcast %23 : vector<1x128xf32> to vector<4x128xf32>
    %92 = arith.mulf %90, %91 : vector<4x128xf32>
    %93 = vector.broadcast %25 : vector<1x128xf32> to vector<4x128xf32>
    %94 = arith.addf %92, %93 : vector<4x128xf32>
    %95 = arith.truncf %94 : vector<4x128xf32> to vector<4x128xbf16>
    %cst_52 = arith.constant dense<0.000000e+00> : vector<4x256xf32>
    %96 = tpu.matmul %95, %13, %cst_52 {dimension_numbers = #tpu.dot_dimension_numbers<[1], [0], [0], [1], [0, 0, 1, 1], [], []>} : vector<4x128xbf16>, vector<128x256xbf16>, vector<4x256xf32> -> vector<4x256xf32>
    %97 = vector.broadcast %19 : vector<1x256xf32> to vector<4x256xf32>
    %98 = arith.addf %96, %97 : vector<4x256xf32>
    %cst_53 = arith.constant 5.000000e-01 : f32
    %99 = vector.broadcast %cst_53 : f32 to vector<4x256xf32>
    %100 = arith.mulf %99, %98 : vector<4x256xf32>
    %cst_54 = arith.constant 4.471500e-02 : f32
    %101 = vector.broadcast %cst_54 : f32 to vector<4x256xf32>
    %102 = arith.mulf %101, %98 : vector<4x256xf32>
    %103 = arith.mulf %102, %98 : vector<4x256xf32>
    %104 = arith.mulf %103, %98 : vector<4x256xf32>
    %105 = arith.addf %98, %104 : vector<4x256xf32>
    %cst_55 = arith.constant 0.797884583 : f32
    %106 = vector.broadcast %cst_55 : f32 to vector<4x256xf32>
    %107 = arith.mulf %106, %105 : vector<4x256xf32>
    %108 = math.tanh %107 : vector<4x256xf32>
    %cst_56 = arith.constant 1.000000e+00 : f32
    %109 = vector.broadcast %cst_56 : f32 to vector<4x256xf32>
    %110 = arith.addf %109, %108 : vector<4x256xf32>
    %111 = arith.mulf %100, %110 : vector<4x256xf32>
    %112 = arith.truncf %111 : vector<4x256xf32> to vector<4x256xbf16>
    %cst_57 = arith.constant dense<0.000000e+00> : vector<4x128xf32>
    %113 = tpu.matmul %112, %15, %cst_57 {dimension_numbers = #tpu.dot_dimension_numbers<[1], [1], [0], [0], [0, 0, 1, 0], [], []>} : vector<4x256xbf16>, vector<128x256xbf16>, vector<4x128xf32> -> vector<4x128xf32>
    %114 = vector.broadcast %27 : vector<1x128xf32> to vector<4x128xf32>
    %115 = arith.addf %113, %114 : vector<4x128xf32>
    %116 = arith.addf %94, %115 : vector<4x128xf32>
    %cst_58 = arith.constant dense<0.000000e+00> : vector<4xf32>
    %117 = vector.multi_reduction <add>, %116, %cst_58 [1] : vector<4x128xf32> to vector<4xf32>
    %118 = vector.shape_cast %117 : vector<4xf32> to vector<4x1xf32>
    %cst_59 = arith.constant 1.280000e+02 : f32
    %119 = vector.broadcast %cst_59 : f32 to vector<4x1xf32>
    %120 = arith.divf %118, %119 : vector<4x1xf32>
    %121 = vector.broadcast %120 : vector<4x1xf32> to vector<4x128xf32>
    %122 = arith.subf %116, %121 : vector<4x128xf32>
    %123 = arith.mulf %122, %122 : vector<4x128xf32>
    %cst_60 = arith.constant dense<0.000000e+00> : vector<4xf32>
    %124 = vector.multi_reduction <add>, %123, %cst_60 [1] : vector<4x128xf32> to vector<4xf32>
    %125 = vector.shape_cast %124 : vector<4xf32> to vector<4x1xf32>
    %cst_61 = arith.constant 1.280000e+02 : f32
    %126 = vector.broadcast %cst_61 : f32 to vector<4x1xf32>
    %127 = arith.divf %125, %126 : vector<4x1xf32>
    %128 = vector.broadcast %120 : vector<4x1xf32> to vector<4x128xf32>
    %129 = arith.subf %116, %128 : vector<4x128xf32>
    %cst_62 = arith.constant 9.99999974E-6 : f32
    %130 = vector.broadcast %cst_62 : f32 to vector<4x1xf32>
    %131 = arith.addf %127, %130 : vector<4x1xf32>
    %132 = math.rsqrt %131 : vector<4x1xf32>
    %133 = vector.broadcast %132 : vector<4x1xf32> to vector<4x128xf32>
    %134 = arith.mulf %129, %133 : vector<4x128xf32>
    %135 = vector.broadcast %29 : vector<1x128xf32> to vector<4x128xf32>
    %136 = arith.mulf %134, %135 : vector<4x128xf32>
    %137 = vector.broadcast %31 : vector<1x128xf32> to vector<4x128xf32>
    %138 = arith.addf %136, %137 : vector<4x128xf32>
    %c1_63 = arith.constant 1 : index
    %c0_64 = arith.constant 0 : index
    %c0_65 = arith.constant 0 : index
    %139 = vector.load %arg7[%c1_63, %c0_64, %c0_65] : memref<2x128x1024xbf16, #tpu.memory_space<vmem>>, vector<1x128x384xbf16>
    %140 = vector.shape_cast %139 : vector<1x128x384xbf16> to vector<128x384xbf16>
    %c1_66 = arith.constant 1 : index
    %c0_67 = arith.constant 0 : index
    %c384_68 = arith.constant 384 : index
    %141 = vector.load %arg7[%c1_66, %c0_67, %c384_68] : memref<2x128x1024xbf16, #tpu.memory_space<vmem>>, vector<1x128x128xbf16>
    %142 = vector.shape_cast %141 : vector<1x128x128xbf16> to vector<128x128xbf16>
    %c1_69 = arith.constant 1 : index
    %c0_70 = arith.constant 0 : index
    %c512_71 = arith.constant 512 : index
    %143 = vector.load %arg7[%c1_69, %c0_70, %c512_71] : memref<2x128x1024xbf16, #tpu.memory_space<vmem>>, vector<1x128x256xbf16>
    %144 = vector.shape_cast %143 : vector<1x128x256xbf16> to vector<128x256xbf16>
    %c1_72 = arith.constant 1 : index
    %c0_73 = arith.constant 0 : index
    %c768_74 = arith.constant 768 : index
    %145 = vector.load %arg7[%c1_72, %c0_73, %c768_74] : memref<2x128x1024xbf16, #tpu.memory_space<vmem>>, vector<1x128x256xbf16>
    %146 = vector.shape_cast %145 : vector<1x128x256xbf16> to vector<128x256xbf16>
    %c1_75 = arith.constant 1 : index
    %c0_76 = arith.constant 0 : index
    %c0_77 = arith.constant 0 : index
    %147 = vector.load %arg8[%c1_75, %c0_76, %c0_77] : memref<2x8x384xf32, #tpu.memory_space<vmem>>, vector<1x1x384xf32>
    %148 = vector.shape_cast %147 : vector<1x1x384xf32> to vector<1x384xf32>
    %c1_78 = arith.constant 1 : index
    %c1_79 = arith.constant 1 : index
    %c0_80 = arith.constant 0 : index
    %149 = vector.load %arg8[%c1_78, %c1_79, %c0_80] : memref<2x8x384xf32, #tpu.memory_space<vmem>>, vector<1x1x256xf32>
    %150 = vector.shape_cast %149 : vector<1x1x256xf32> to vector<1x256xf32>
    %c1_81 = arith.constant 1 : index
    %c2_82 = arith.constant 2 : index
    %c0_83 = arith.constant 0 : index
    %151 = vector.load %arg8[%c1_81, %c2_82, %c0_83] : memref<2x8x384xf32, #tpu.memory_space<vmem>>, vector<1x1x128xf32>
    %152 = vector.shape_cast %151 : vector<1x1x128xf32> to vector<1x128xf32>
    %c1_84 = arith.constant 1 : index
    %c3_85 = arith.constant 3 : index
    %c0_86 = arith.constant 0 : index
    %153 = vector.load %arg8[%c1_84, %c3_85, %c0_86] : memref<2x8x384xf32, #tpu.memory_space<vmem>>, vector<1x1x128xf32>
    %154 = vector.shape_cast %153 : vector<1x1x128xf32> to vector<1x128xf32>
    %c1_87 = arith.constant 1 : index
    %c4_88 = arith.constant 4 : index
    %c0_89 = arith.constant 0 : index
    %155 = vector.load %arg8[%c1_87, %c4_88, %c0_89] : memref<2x8x384xf32, #tpu.memory_space<vmem>>, vector<1x1x128xf32>
    %156 = vector.shape_cast %155 : vector<1x1x128xf32> to vector<1x128xf32>
    %c1_90 = arith.constant 1 : index
    %c5_91 = arith.constant 5 : index
    %c0_92 = arith.constant 0 : index
    %157 = vector.load %arg8[%c1_90, %c5_91, %c0_92] : memref<2x8x384xf32, #tpu.memory_space<vmem>>, vector<1x1x128xf32>
    %158 = vector.shape_cast %157 : vector<1x1x128xf32> to vector<1x128xf32>
    %c1_93 = arith.constant 1 : index
    %c6_94 = arith.constant 6 : index
    %c0_95 = arith.constant 0 : index
    %159 = vector.load %arg8[%c1_93, %c6_94, %c0_95] : memref<2x8x384xf32, #tpu.memory_space<vmem>>, vector<1x1x128xf32>
    %160 = vector.shape_cast %159 : vector<1x1x128xf32> to vector<1x128xf32>
    %c1_96 = arith.constant 1 : index
    %c7_97 = arith.constant 7 : index
    %c0_98 = arith.constant 0 : index
    %161 = vector.load %arg8[%c1_96, %c7_97, %c0_98] : memref<2x8x384xf32, #tpu.memory_space<vmem>>, vector<1x1x128xf32>
    %162 = vector.shape_cast %161 : vector<1x1x128xf32> to vector<1x128xf32>
    %163 = arith.truncf %138 : vector<4x128xf32> to vector<4x128xbf16>
    %cst_99 = arith.constant dense<0.000000e+00> : vector<4x384xf32>
    %164 = tpu.matmul %163, %140, %cst_99 {dimension_numbers = #tpu.dot_dimension_numbers<[1], [0], [0], [1], [0, 0, 1, 1], [], []>} : vector<4x128xbf16>, vector<128x384xbf16>, vector<4x384xf32> -> vector<4x384xf32>
    %165 = vector.broadcast %148 : vector<1x384xf32> to vector<4x384xf32>
    %166 = arith.addf %164, %165 : vector<4x384xf32>
    %167 = arith.truncf %166 : vector<4x384xf32> to vector<4x384xbf16>
    %cst_100 = arith.constant dense<0.000000e+00> : vector<16x384xf32>
    %168 = tpu.matmul %0, %167, %cst_100 {dimension_numbers = #tpu.dot_dimension_numbers<[1], [0], [0], [1], [0, 0, 1, 1], [], []>} : vector<16x4xbf16>, vector<4x384xbf16>, vector<16x384xf32> -> vector<16x384xf32>
    %169 = arith.truncf %168 : vector<16x384xf32> to vector<16x384xbf16>
    %170 = arith.mulf %169, %2 : vector<16x384xbf16>
    %cst_101 = arith.constant dense<0.000000e+00> : vector<16x384xf32>
    %171 = tpu.matmul %170, %3, %cst_101 {dimension_numbers = #tpu.dot_dimension_numbers<[1], [0], [0], [1], [0, 0, 1, 1], [], []>} : vector<16x384xbf16>, vector<384x384xbf16>, vector<16x384xf32> -> vector<16x384xf32>
    %172 = vector.extract_strided_slice %171 {offsets = [0, 0], sizes = [16, 32], strides = [1, 1]} : vector<16x384xf32> to vector<16x32xf32>
    %173 = vector.extract_strided_slice %171 {offsets = [0, 128], sizes = [16, 32], strides = [1, 1]} : vector<16x384xf32> to vector<16x32xf32>
    %174 = vector.extract_strided_slice %171 {offsets = [0, 256], sizes = [16, 32], strides = [1, 1]} : vector<16x384xf32> to vector<16x32xf32>
    %175 = arith.truncf %172 : vector<16x32xf32> to vector<16x32xbf16>
    %176 = arith.truncf %173 : vector<16x32xf32> to vector<16x32xbf16>
    %cst_102 = arith.constant dense<0.000000e+00> : vector<16x16xf32>
    %177 = tpu.matmul %175, %176, %cst_102 {dimension_numbers = #tpu.dot_dimension_numbers<[1], [1], [0], [0], [0, 0, 1, 0], [], []>} : vector<16x32xbf16>, vector<16x32xbf16>, vector<16x16xf32> -> vector<16x16xf32>
    %cst_103 = arith.constant 0.353553385 : f32
    %178 = vector.broadcast %cst_103 : f32 to vector<16x16xf32>
    %179 = arith.mulf %177, %178 : vector<16x16xf32>
    %180 = arith.addf %179, %6 : vector<16x16xf32>
    %cst_104 = arith.constant dense<0xFF800000> : vector<16xf32>
    %181 = vector.multi_reduction <maximumf>, %180, %cst_104 [1] : vector<16x16xf32> to vector<16xf32>
    %182 = vector.shape_cast %181 : vector<16xf32> to vector<16x1xf32>
    %183 = vector.broadcast %182 : vector<16x1xf32> to vector<16x16xf32>
    %184 = arith.subf %180, %183 : vector<16x16xf32>
    %185 = math.exp %184 : vector<16x16xf32>
    %cst_105 = arith.constant dense<0.000000e+00> : vector<16xf32>
    %186 = vector.multi_reduction <add>, %185, %cst_105 [1] : vector<16x16xf32> to vector<16xf32>
    %187 = vector.shape_cast %186 : vector<16xf32> to vector<16x1xf32>
    %188 = tpu.reciprocal %187 {approx = true} : vector<16x1xf32> -> vector<16x1xf32>
    %189 = vector.broadcast %188 : vector<16x1xf32> to vector<16x16xf32>
    %190 = arith.mulf %185, %189 : vector<16x16xf32>
    %191 = arith.truncf %190 : vector<16x16xf32> to vector<16x16xbf16>
    %192 = arith.truncf %174 : vector<16x32xf32> to vector<16x32xbf16>
    %cst_106 = arith.constant dense<0.000000e+00> : vector<16x32xf32>
    %193 = tpu.matmul %191, %192, %cst_106 {dimension_numbers = #tpu.dot_dimension_numbers<[1], [0], [0], [1], [0, 0, 1, 1], [], []>} : vector<16x16xbf16>, vector<16x32xbf16>, vector<16x32xf32> -> vector<16x32xf32>
    %194 = arith.truncf %193 : vector<16x32xf32> to vector<16x32xbf16>
    %cst_107 = arith.constant dense<0.000000e+00> : vector<16x128xf32>
    %195 = tpu.matmul %194, %5, %cst_107 {dimension_numbers = #tpu.dot_dimension_numbers<[1], [1], [0], [0], [0, 0, 1, 0], [], []>} : vector<16x32xbf16>, vector<128x32xbf16>, vector<16x128xf32> -> vector<16x128xf32>
    %196 = arith.truncf %195 : vector<16x128xf32> to vector<16x128xbf16>
    %197 = arith.mulf %196, %4 : vector<16x128xbf16>
    %cst_108 = arith.constant dense<0.000000e+00> : vector<4x128xf32>
    %198 = tpu.matmul %1, %197, %cst_108 {dimension_numbers = #tpu.dot_dimension_numbers<[1], [0], [0], [1], [0, 0, 1, 1], [], []>} : vector<4x16xbf16>, vector<16x128xbf16>, vector<4x128xf32> -> vector<4x128xf32>
    %199 = arith.truncf %198 : vector<4x128xf32> to vector<4x128xbf16>
    %cst_109 = arith.constant dense<0.000000e+00> : vector<4x128xf32>
    %200 = tpu.matmul %199, %142, %cst_109 {dimension_numbers = #tpu.dot_dimension_numbers<[1], [0], [0], [1], [0, 0, 1, 1], [], []>} : vector<4x128xbf16>, vector<128x128xbf16>, vector<4x128xf32> -> vector<4x128xf32>
    %201 = vector.broadcast %152 : vector<1x128xf32> to vector<4x128xf32>
    %202 = arith.addf %200, %201 : vector<4x128xf32>
    %203 = arith.addf %138, %202 : vector<4x128xf32>
    %cst_110 = arith.constant dense<0.000000e+00> : vector<4xf32>
    %204 = vector.multi_reduction <add>, %203, %cst_110 [1] : vector<4x128xf32> to vector<4xf32>
    %205 = vector.shape_cast %204 : vector<4xf32> to vector<4x1xf32>
    %cst_111 = arith.constant 1.280000e+02 : f32
    %206 = vector.broadcast %cst_111 : f32 to vector<4x1xf32>
    %207 = arith.divf %205, %206 : vector<4x1xf32>
    %208 = vector.broadcast %207 : vector<4x1xf32> to vector<4x128xf32>
    %209 = arith.subf %203, %208 : vector<4x128xf32>
    %210 = arith.mulf %209, %209 : vector<4x128xf32>
    %cst_112 = arith.constant dense<0.000000e+00> : vector<4xf32>
    %211 = vector.multi_reduction <add>, %210, %cst_112 [1] : vector<4x128xf32> to vector<4xf32>
    %212 = vector.shape_cast %211 : vector<4xf32> to vector<4x1xf32>
    %cst_113 = arith.constant 1.280000e+02 : f32
    %213 = vector.broadcast %cst_113 : f32 to vector<4x1xf32>
    %214 = arith.divf %212, %213 : vector<4x1xf32>
    %215 = vector.broadcast %207 : vector<4x1xf32> to vector<4x128xf32>
    %216 = arith.subf %203, %215 : vector<4x128xf32>
    %cst_114 = arith.constant 9.99999974E-6 : f32
    %217 = vector.broadcast %cst_114 : f32 to vector<4x1xf32>
    %218 = arith.addf %214, %217 : vector<4x1xf32>
    %219 = math.rsqrt %218 : vector<4x1xf32>
    %220 = vector.broadcast %219 : vector<4x1xf32> to vector<4x128xf32>
    %221 = arith.mulf %216, %220 : vector<4x128xf32>
    %222 = vector.broadcast %154 : vector<1x128xf32> to vector<4x128xf32>
    %223 = arith.mulf %221, %222 : vector<4x128xf32>
    %224 = vector.broadcast %156 : vector<1x128xf32> to vector<4x128xf32>
    %225 = arith.addf %223, %224 : vector<4x128xf32>
    %226 = arith.truncf %225 : vector<4x128xf32> to vector<4x128xbf16>
    %cst_115 = arith.constant dense<0.000000e+00> : vector<4x256xf32>
    %227 = tpu.matmul %226, %144, %cst_115 {dimension_numbers = #tpu.dot_dimension_numbers<[1], [0], [0], [1], [0, 0, 1, 1], [], []>} : vector<4x128xbf16>, vector<128x256xbf16>, vector<4x256xf32> -> vector<4x256xf32>
    %228 = vector.broadcast %150 : vector<1x256xf32> to vector<4x256xf32>
    %229 = arith.addf %227, %228 : vector<4x256xf32>
    %cst_116 = arith.constant 5.000000e-01 : f32
    %230 = vector.broadcast %cst_116 : f32 to vector<4x256xf32>
    %231 = arith.mulf %230, %229 : vector<4x256xf32>
    %cst_117 = arith.constant 4.471500e-02 : f32
    %232 = vector.broadcast %cst_117 : f32 to vector<4x256xf32>
    %233 = arith.mulf %232, %229 : vector<4x256xf32>
    %234 = arith.mulf %233, %229 : vector<4x256xf32>
    %235 = arith.mulf %234, %229 : vector<4x256xf32>
    %236 = arith.addf %229, %235 : vector<4x256xf32>
    %cst_118 = arith.constant 0.797884583 : f32
    %237 = vector.broadcast %cst_118 : f32 to vector<4x256xf32>
    %238 = arith.mulf %237, %236 : vector<4x256xf32>
    %239 = math.tanh %238 : vector<4x256xf32>
    %cst_119 = arith.constant 1.000000e+00 : f32
    %240 = vector.broadcast %cst_119 : f32 to vector<4x256xf32>
    %241 = arith.addf %240, %239 : vector<4x256xf32>
    %242 = arith.mulf %231, %241 : vector<4x256xf32>
    %243 = arith.truncf %242 : vector<4x256xf32> to vector<4x256xbf16>
    %cst_120 = arith.constant dense<0.000000e+00> : vector<4x128xf32>
    %244 = tpu.matmul %243, %146, %cst_120 {dimension_numbers = #tpu.dot_dimension_numbers<[1], [1], [0], [0], [0, 0, 1, 0], [], []>} : vector<4x256xbf16>, vector<128x256xbf16>, vector<4x128xf32> -> vector<4x128xf32>
    %245 = vector.broadcast %158 : vector<1x128xf32> to vector<4x128xf32>
    %246 = arith.addf %244, %245 : vector<4x128xf32>
    %247 = arith.addf %225, %246 : vector<4x128xf32>
    %cst_121 = arith.constant dense<0.000000e+00> : vector<4xf32>
    %248 = vector.multi_reduction <add>, %247, %cst_121 [1] : vector<4x128xf32> to vector<4xf32>
    %249 = vector.shape_cast %248 : vector<4xf32> to vector<4x1xf32>
    %cst_122 = arith.constant 1.280000e+02 : f32
    %250 = vector.broadcast %cst_122 : f32 to vector<4x1xf32>
    %251 = arith.divf %249, %250 : vector<4x1xf32>
    %252 = vector.broadcast %251 : vector<4x1xf32> to vector<4x128xf32>
    %253 = arith.subf %247, %252 : vector<4x128xf32>
    %254 = arith.mulf %253, %253 : vector<4x128xf32>
    %cst_123 = arith.constant dense<0.000000e+00> : vector<4xf32>
    %255 = vector.multi_reduction <add>, %254, %cst_123 [1] : vector<4x128xf32> to vector<4xf32>
    %256 = vector.shape_cast %255 : vector<4xf32> to vector<4x1xf32>
    %cst_124 = arith.constant 1.280000e+02 : f32
    %257 = vector.broadcast %cst_124 : f32 to vector<4x1xf32>
    %258 = arith.divf %256, %257 : vector<4x1xf32>
    %259 = vector.broadcast %251 : vector<4x1xf32> to vector<4x128xf32>
    %260 = arith.subf %247, %259 : vector<4x128xf32>
    %cst_125 = arith.constant 9.99999974E-6 : f32
    %261 = vector.broadcast %cst_125 : f32 to vector<4x1xf32>
    %262 = arith.addf %258, %261 : vector<4x1xf32>
    %263 = math.rsqrt %262 : vector<4x1xf32>
    %264 = vector.broadcast %263 : vector<4x1xf32> to vector<4x128xf32>
    %265 = arith.mulf %260, %264 : vector<4x128xf32>
    %266 = vector.broadcast %160 : vector<1x128xf32> to vector<4x128xf32>
    %267 = arith.mulf %265, %266 : vector<4x128xf32>
    %268 = vector.broadcast %162 : vector<1x128xf32> to vector<4x128xf32>
    %269 = arith.addf %267, %268 : vector<4x128xf32>
    %c0_126 = arith.constant 0 : index
    %c0_127 = arith.constant 0 : index
    %270 = vector.load %arg9[%c0_126, %c0_127] : memref<4x128xf32, #tpu.memory_space<vmem>>, vector<4x128xf32>
    tpu.vector_store %arg9[%c0_126, %c0_127], %269 {strides = array<i32>} : memref<4x128xf32, #tpu.memory_space<vmem>>, vector<4x128xf32>,
    return
  }
  func.func @transform_0(%arg0: i32) -> (i32, i32) {
    %c0_i32 = arith.constant 0 : i32
    %c0_i32_0 = arith.constant 0 : i32
    %c0_i32_1 = arith.constant 0 : i32
    return %c0_i32, %c0_i32_0 : i32, i32
  }
  func.func @transform_1(%arg0: i32) -> (i32, i32) {
    %c0_i32 = arith.constant 0 : i32
    %c0_i32_0 = arith.constant 0 : i32
    %c0_i32_1 = arith.constant 0 : i32
    return %c0_i32, %c0_i32_0 : i32, i32
  }
  func.func @transform_2(%arg0: i32) -> (i32, i32) {
    %c0_i32 = arith.constant 0 : i32
    %c0_i32_0 = arith.constant 0 : i32
    %c0_i32_1 = arith.constant 0 : i32
    return %c0_i32, %c0_i32_0 : i32, i32
  }
  func.func @transform_3(%arg0: i32) -> (i32, i32) {
    %c0_i32 = arith.constant 0 : i32
    %c0_i32_0 = arith.constant 0 : i32
    %c0_i32_1 = arith.constant 0 : i32
    return %c0_i32, %c0_i32_0 : i32, i32
  }
  func.func @transform_4(%arg0: i32) -> (i32, i32) {
    %c0_i32 = arith.constant 0 : i32
    %c0_i32_0 = arith.constant 0 : i32
    %c0_i32_1 = arith.constant 0 : i32
    return %c0_i32, %c0_i32_0 : i32, i32
  }
  func.func @transform_5(%arg0: i32) -> (i32, i32) {
    %c0_i32 = arith.constant 0 : i32
    %c0_i32_0 = arith.constant 0 : i32
    %c0_i32_1 = arith.constant 0 : i32
    return %c0_i32, %c0_i32_0 : i32, i32
  }
  func.func @transform_6(%arg0: i32) -> (i32, i32, i32) {
    %c0_i32 = arith.constant 0 : i32
    %c0_i32_0 = arith.constant 0 : i32
    %c0_i32_1 = arith.constant 0 : i32
    %c0_i32_2 = arith.constant 0 : i32
    return %c0_i32, %c0_i32_0, %c0_i32_1 : i32, i32, i32
  }
  func.func @transform_7(%arg0: i32) -> (i32, i32, i32) {
    %c0_i32 = arith.constant 0 : i32
    %c0_i32_0 = arith.constant 0 : i32
    %c0_i32_1 = arith.constant 0 : i32
    %c0_i32_2 = arith.constant 0 : i32
    return %c0_i32, %c0_i32_0, %c0_i32_1 : i32, i32, i32
  }
  func.func @transform_8(%arg0: i32) -> (i32, i32) {
    %c0_i32 = arith.constant 0 : i32
    %c0_i32_0 = arith.constant 0 : i32
    %c0_i32_1 = arith.constant 0 : i32
    return %c0_i32, %c0_i32_0 : i32, i32
  }
}

</mosaic_0001>

<bundles_post_ra>
// kernel: tile.9
= control target key start
LH: loop header
LB: loop body
LE: loop exit
PB: predicated region body
PF: predicated region fallthrough
CT: control target
= control target key end

     0   :  { %s52_s14 = smov 32   ;;  %s53_s15 = smov 64   ;;  %vm19_vm0 = vcmask 261120   ;;  %vm25_vm1 = vcmask 1048320   ;;  %vm31_vm2 = vcmask 785920   ;;  %vm37_vm3 = vcmask 523520   ;;  %s79_s0 = inlined_call_operand.vmem [shape: f32[4,4,32], index: 0, kind: input, shape index: {}]   ;;  %s80_s1 = inlined_call_operand.vmem [shape: f32[4,128], index: 1, kind: output, shape index: {}]  }
   0x1   :  { %v45_v0 = vld [vmem:[%s79_s0 + $0xc] sm:$0xf]  ;;  %v46_v1 = vld [vmem:[%s79_s0 + $0x8] sm:$0xf]  ;;  %v47_v2 = vld [vmem:[%s79_s0 + $0x4] sm:$0xf] }
   0x2   :  { %7 = vst [vmem:[#allocation1 + $0x18] sm:$0xf] %v45_v0  ;;  %v16_v3 = vld [vmem:[%s79_s0] sm:$0xf]  ;;  %s51_s0 = smov 96  }
   0x3   :  { %11 = vst [vmem:[#allocation1 + $0x10] sm:$0xf] %v46_v1 }
   0x4   :  { %15 = vst [vmem:[#allocation1 + $0x8] sm:$0xf] %v47_v2 }
   0x5   :  { %17 = vst [vmem:[#allocation1] sm:$0xf] %v16_v3 }
   0xc   :  { %v22_v4 = vld [vmem:[#allocation1 + $0x3] ss:$8 sm:$0xf]   ;;  %v34_v5 = vld [vmem:[#allocation1 + $0x1] ss:$8 sm:$0xf]  }
   0xd   :  { %23 = vrot.lane.b32.xlu0 %v22_v4, %s51_s0  ;;  %35 = vrot.lane.b32.xlu1 %v34_v5, %s52_s14  ;;  %v28_v6 = vld [vmem:[#allocation1 + $0x2] ss:$8 sm:$0xf]   ;;  %v18_v7 = vld [vmem:[#allocation1] ss:$8 sm:$0xf]  }
   0xe   :  { %20 = vst.msk [vmem:[#allocation0] sm:$0xf] %vm19_vm0, %v18_v7  }
  0x15   :  { %29 = vrot.lane.b32.xlu0 %v28_v6, %s53_s15 }
  0x7f   :  { %v24_v8 = vpop.permute.xlu0 %23   ;;  %v36_v9 = vpop.permute.xlu1 %35  }
  0x80   :  { %26 = vst.msk [vmem:[#allocation0] sm:$0xf] %vm25_vm1, %v24_v8  }
  0x87   :  { %v30_v10 = vpop.permute.xlu0 %29  }
  0x88   :  { %32 = vst.msk [vmem:[#allocation0] sm:$0xf] %vm31_vm2, %v30_v10  }
  0x89   :  { %38 = vst.msk [vmem:[#allocation0] sm:$0xf] %vm37_vm3, %v36_v9  }
  0x90   :  { %v41_v11 = vld [vmem:[#allocation0] sm:$0xf] }
  0x91   :  { %44 = vst [vmem:[%s80_s1] sm:$0xf] %v41_v11 }

// kernel: _encode_fused.1
= control target key start
LH: loop header
LB: loop body
LE: loop exit
PB: predicated region body
PF: predicated region fallthrough
CT: control target
= control target key end

     0   :  { %13 = vsyncpa [#allocation3], 0  ;;  %s4228_s0 = inlined_call_operand.vmem [shape: f32[4,128], index: 0, kind: input, shape index: {}]   ;;  %s4229_s1 = inlined_call_operand.vmem [shape: bf16[16,4], index: 1, kind: input, shape index: {}]   ;;  %s4230_s2 = inlined_call_operand.vmem [shape: bf16[4,16], index: 2, kind: input, shape index: {}]   ;;  %s4231_s3 = inlined_call_operand.vmem [shape: bf16[16,384], index: 3, kind: input, shape index: {}]   ;;  %s4232_s4 = inlined_call_operand.hbm [shape: bf16[384,384], index: 4, kind: input, shape index: {}]   ;;  %s4233_s5 = inlined_call_operand.vmem [shape: f32[16,16], index: 5, kind: input, shape index: {}]   ;;  %s4234_s6 = inlined_call_operand.hbm [shape: bf16[2,128,1024], index: 6, kind: input, shape index: {}]   ;;  %s4235_s7 = inlined_call_operand.vmem [shape: f32[2,8,384], index: 7, kind: input, shape index: {}]   ;;  %s4236_s8 = inlined_call_operand.hbm [shape: f32[4,128], index: 8, kind: output, shape index: {}]  }
   0x1   :  { %14 = vsyncpa [#allocation6], 0 }
   0x2   :  { %15 = vsyncpa [#allocation4], 0  ;;  %s28_s29 = sshll.u32 %s4232_s4, 4  ;;  %s3617_s30 = smov [#allocation2]   ;;  %s29_s29 = int_to_ptr.hbm [resolvable:$true] %s28_s29 }
   0x3   :  { %s30_s9 = sshll.u32 %s3617_s30, 4  ;;  %s43_s12 = sshll.u32 %s4234_s6, 4  ;;  %s31_s9 = int_to_ptr.vmem [resolvable:$true] %s30_s9  ;;  %s44_s12 = int_to_ptr.hbm [resolvable:$true] %s43_s12 }
   0x4   :  { %s3618_s13 = smov 192   ;;  %s3619_s14 = smov 12  }
   0x5   :  { %36 = dma.hbm_to_vmem [thread:$0]  %s29_s29, 9216, %s31_s9, [#allocation3], %s3618_s13, %s3618_s13, %s3619_s14  }
   0x6   :  { %s3620_s15 = smov [#allocation5]   ;;  %s3621_s17 = smov 512  }
   0x7   :  { %s45_s16 = sshll.u32 %s3620_s15, 4  ;;  %s3622_s18 = smov 32   ;;  %s46_s16 = int_to_ptr.vmem [resolvable:$true] %s45_s16 }
   0x8   :  { %51 = dma.hbm_to_vmem [thread:$0]  %s44_s12, 16384, %s46_s16, [#allocation6], %s3621_s17, %s3621_s17, %s3622_s18  }
   0x9   :  { %3611 = dma.done.wait [#allocation3], 9216  }
   0xa   :  { %3612 = vsyncadd [#allocation3], 4294958080 }
   0xb   :  { %3613 = dma.done.wait [#allocation6], 16384  }
   0xc   :  { %3614 = vsyncadd [#allocation6], 4294950912  ;;  %v2551_v0 = vld [vmem:[#allocation5 + $0x1c0] sm:$0xf]  ;;  %v2559_v8 = vld [vmem:[#allocation5 + $0x1c8] sm:$0xf] }
   0xd   :  { %v3386_v1 = vld [vmem:[#allocation5 + $0x1dc] sm:$0xf0]  ;;  %v3387_v11 = vld [vmem:[#allocation5 + $0x1e4] sm:$0xf0]  ;;  %v3385_v40 = vld [vmem:[#allocation5 + $0x1c4] sm:$0xf] }
   0xe   :  { %v2539_v2 = vld [vmem:[#allocation5 + $0x180] sm:$0xf]  ;;  %v2552_v3 = vor.u32 %v3386_v1, %v2551_v0  ;;  %v2560_v13 = vor.u32 %v3387_v11, %v2559_v8  ;;  %v2547_v14 = vld [vmem:[#allocation5 + $0x188] sm:$0xf]  ;;  %v2553_v41 = vld [vmem:[#allocation5 + $0x1e0] sm:$0xf0] }
   0xf   :  { %v3383_v4 = vld [vmem:[#allocation5 + $0x19c] sm:$0xf0]  ;;  %v3384_v15 = vld [vmem:[#allocation5 + $0x1a4] sm:$0xf0]  ;;  %v2556_v47 = vor.u32 %v3385_v40, %v2553_v41  ;;  %v3382_v48 = vld [vmem:[#allocation5 + $0x184] sm:$0xf] }
  0x10   :  { %394 = vmatpush.bf16.msra.mxu1 %v2552_v3  ;;  %v2540_v5 = vor.u32 %v3383_v4, %v2539_v2  ;;  %v2527_v6 = vld [vmem:[#allocation5 + $0x140] sm:$0xf]  ;;  %420 = vmatpush.bf16.msra.mxu2 %v2560_v13  ;;  %v2548_v16 = vor.u32 %v3384_v15, %v2547_v14  ;;  %v2535_v18 = vld [vmem:[#allocation5 + $0x148] sm:$0xf]  ;;  %v2541_v49 = vld [vmem:[#allocation5 + $0x1a0] sm:$0xf0] }
  0x11   :  { %v3380_v7 = vld [vmem:[#allocation5 + $0x15c] sm:$0xf0]  ;;  %v3381_v19 = vld [vmem:[#allocation5 + $0x164] sm:$0xf0]  ;;  %v2544_v54 = vor.u32 %v3382_v48, %v2541_v49  ;;  %v3379_v55 = vld [vmem:[#allocation5 + $0x144] sm:$0xf] }
  0x12   :  { %v2528_v9 = vor.u32 %v3380_v7, %v2527_v6  ;;  %v2515_v10 = vld [vmem:[#allocation5 + $0x100] sm:$0xf]  ;;  %v2536_v22 = vor.u32 %v3381_v19, %v2535_v18  ;;  %v2523_v24 = vld [vmem:[#allocation5 + $0x108] sm:$0xf]  ;;  %v2529_v56 = vld [vmem:[#allocation5 + $0x160] sm:$0xf0] }
  0x13   :  { %v3377_v12 = vld [vmem:[#allocation5 + $0x11c] sm:$0xf0]  ;;  %v3378_v25 = vld [vmem:[#allocation5 + $0x124] sm:$0xf0]  ;;  %v2532_v58 = vor.u32 %v3379_v55, %v2529_v56  ;;  %v3376_v59 = vld [vmem:[#allocation5 + $0x104] sm:$0xf] }
  0x14   :  { %395 = vmatpush.bf16.msra.mxu1 %v2540_v5  ;;  %v2516_v17 = vor.u32 %v3377_v12, %v2515_v10  ;;  %v2503_v20 = vld [vmem:[#allocation5 + $0xc0] sm:$0xf]  ;;  %421 = vmatpush.bf16.msra.mxu2 %v2548_v16  ;;  %v2524_v28 = vor.u32 %v3378_v25, %v2523_v24  ;;  %v2511_v30 = vld [vmem:[#allocation5 + $0xc8] sm:$0xf]  ;;  %v2517_v60 = vld [vmem:[#allocation5 + $0x120] sm:$0xf0] }
  0x15   :  { %v3374_v21 = vld [vmem:[#allocation5 + $0xdc] sm:$0xf0]  ;;  %v3375_v31 = vld [vmem:[#allocation5 + $0xe4] sm:$0xf0]  ;;  %v2520_v61 = vor.u32 %v3376_v59, %v2517_v60  ;;  %v3373_v62 = vld [vmem:[#allocation5 + $0xc4] sm:$0xf] }
  0x16   :  { %v2504_v23 = vor.u32 %v3374_v21, %v2503_v20  ;;  %v2491_v26 = vld [vmem:[#allocation5 + $0x80] sm:$0xf]  ;;  %v2512_v34 = vor.u32 %v3375_v31, %v2511_v30  ;;  %v2499_v36 = vld [vmem:[#allocation5 + $0x88] sm:$0xf]  ;;  %v2505_v63 = vld [vmem:[#allocation5 + $0xe0] sm:$0xf0] }
  0x17   :  { %v3371_v27 = vld [vmem:[#allocation5 + $0x9c] sm:$0xf0]  ;;  %v3372_v37 = vld [vmem:[#allocation5 + $0xa4] sm:$0xf0]  ;;  %v2508_v0 = vor.u32 %v3373_v62, %v2505_v63  ;;  %v3370_v1 = vld [vmem:[#allocation5 + $0x84] sm:$0xf] }
  0x18   :  { %396 = vmatpush.bf16.msra.mxu1 %v2528_v9  ;;  %422 = vmatpush.bf16.msra.mxu2 %v2536_v22  ;;  %v2492_v29 = vor.u32 %v3371_v27, %v2491_v26  ;;  %v2479_v32 = vld [vmem:[#allocation5 + $0x40] sm:$0xf]  ;;  %v2500_v42 = vor.u32 %v3372_v37, %v2499_v36  ;;  %v2487_v45 = vld [vmem:[#allocation5 + $0x48] sm:$0xf]  ;;  %v2493_v2 = vld [vmem:[#allocation5 + $0xa0] sm:$0xf0] }
  0x19   :  { %v3368_v33 = vld [vmem:[#allocation5 + $0x5c] sm:$0xf0]  ;;  %v3369_v46 = vld [vmem:[#allocation5 + $0x64] sm:$0xf0]  ;;  %v2496_v3 = vor.u32 %v3370_v1, %v2493_v2  ;;  %v3367_v4 = vld [vmem:[#allocation5 + $0x44] sm:$0xf] }
  0x1a   :  { %v2480_v35 = vor.u32 %v3368_v33, %v2479_v32  ;;  %v2467_v38 = vld [vmem:[#allocation5] sm:$0xf]  ;;  %v2488_v51 = vor.u32 %v3369_v46, %v2487_v45  ;;  %v2475_v52 = vld [vmem:[#allocation5 + $0x8] sm:$0xf]  ;;  %v2481_v5 = vld [vmem:[#allocation5 + $0x60] sm:$0xf0] }
  0x1b   :  { %v3365_v39 = vld [vmem:[#allocation5 + $0x1c] sm:$0xf0]  ;;  %v3366_v53 = vld [vmem:[#allocation5 + $0x24] sm:$0xf0]  ;;  %v2484_v6 = vor.u32 %v3367_v4, %v2481_v5  ;;  %v3364_v7 = vld [vmem:[#allocation5 + $0x4] sm:$0xf] }
  0x1c   :  { %397 = vmatpush.bf16.msra.mxu1 %v2516_v17  ;;  %423 = vmatpush.bf16.msra.mxu2 %v2524_v28  ;;  %v2468_v43 = vor.u32 %v3365_v39, %v2467_v38  ;;  %v168_v44 = vld [vmem:[%s4228_s0] sm:$0xf]  ;;  %v2476_v57 = vor.u32 %v3366_v53, %v2475_v52  ;;  %v2469_v8 = vld [vmem:[#allocation5 + $0x20] sm:$0xf0]  ;;  %vm445_vm0 = vcmask 1041408   ;;  %vm441_vm1 = vcmask 31744  }
  0x1d   :  { %v258_v50 = vpack.c.bf16 %v168_v44, %v168_v44  ;;  %v2472_v9 = vor.u32 %v3364_v7, %v2469_v8  ;;  %v249_v10 = vld [vmem:[%s4235_s7] ss:$8 sm:$0x7]  ;;  %v3314_v22 = vld [vmem:[#allocation2 + $0xb0] sm:$0xf0]  ;;  %vm1034_vm2 = vcmask 261120  }
  0x1e   :  { %v260_v11 = vperm.slane %v249_v10, 0  ;;  %v3291_v16 = vld [vmem:[%s4229_s1] sm:$0xff]  ;;  %v262_v19 = vperm.slane %v249_v10, 2  ;;  %v2654_v21 = vld [vmem:[#allocation2 + $0xa8] sm:$0xf]  ;;  %v261_v30 = vperm.slane %v249_v10, 1 }
  0x1f   :  { %v3687_v24 = vor.u32 %v3314_v22, %v2654_v21  ;;  %v3311_v25 = vld [vmem:[#allocation2 + $0x98] sm:$0xf0]  ;;  %v2750_v26 = vld [vmem:[#allocation2 + $0x168] sm:$0xf]  ;;  %v2630_v31 = vld [vmem:[#allocation2 + $0x78] sm:$0xf] }
  0x20   :  { %398 = vmatpush.bf16.msra.mxu1 %v2504_v23  ;;  %424 = vmatpush.bf16.msra.mxu2 %v2512_v34  ;;  %v2642_v23 = vld [vmem:[#allocation2 + $0x90] sm:$0xf]  ;;  %v3308_v32 = vld [vmem:[#allocation2 + $0x80] sm:$0xf0]  ;;  %v2618_v38 = vld [vmem:[#allocation2 + $0x60] sm:$0xf] }
  0x21   :  { %906 = vmatpush.bf16.msra.mxu0 %v3687_v24  ;;  %v3690_v28 = vor.u32 %v3311_v25, %v2642_v23  ;;  %v3696_v36 = vor.u32 %v3308_v32, %v2630_v31  ;;  %v3305_v39 = vld [vmem:[#allocation2 + $0x68] sm:$0xf0]  ;;  %v2606_v48 = vld [vmem:[#allocation2 + $0x48] sm:$0xf]  ;;  %v3302_v49 = vld [vmem:[#allocation2 + $0x50] sm:$0xf0] }
  0x22   :  { %v3313_v41 = vld [vmem:[#allocation2 + $0xac] sm:$0xf]  ;;  %v3700_v44 = vor.u32 %v3305_v39, %v2618_v38  ;;  %v3335_v52 = vld [vmem:[#allocation2 + $0x158] sm:$0xf0]  ;;  %v3310_v53 = vld [vmem:[#allocation2 + $0x94] sm:$0xf] }
  0x23   :  { %v2726_v59 = vld [vmem:[#allocation2 + $0x138] sm:$0xf]  ;;  %v3307_v62 = vld [vmem:[#allocation2 + $0x7c] sm:$0xf]  ;;  %v2632_v63 = vld [vmem:[#allocation2 + $0x84] sm:$0xf0] }
  0x24   :  { %399 = vmatpush.bf16.msra.mxu1 %v2492_v29  ;;  %425 = vmatpush.bf16.msra.mxu2 %v2500_v42  ;;  %v3338_v29 = vld [vmem:[#allocation2 + $0x170] sm:$0xf0]  ;;  %v2656_v42 = vld [vmem:[#allocation2 + $0xb4] sm:$0xf0]  ;;  %v3722_v1 = vor.u32 %v3307_v62, %v2632_v63  ;;  %v2714_v4 = vld [vmem:[#allocation2 + $0x120] sm:$0xf] }
  0x25   :  { %v3692_v33 = vor.u32 %v3338_v29, %v2750_v26  ;;  %907 = vmatpush.bf16.msra.mxu0 %v3690_v28  ;;  %v3703_v46 = vor.u32 %v3313_v41, %v2656_v42  ;;  %v2582_v2 = vld [vmem:[#allocation2 + $0x18] sm:$0xf]  ;;  %v3304_v7 = vld [vmem:[#allocation2 + $0x64] sm:$0xf]  ;;  %v2620_v8 = vld [vmem:[#allocation2 + $0x6c] sm:$0xf0] }
  0x26   :  { %4285 = vst [vmem:[#allocation12_spill] sm:$0xff] %v3722_v1  ;;  %v3731_v10 = vor.u32 %v3304_v7, %v2620_v8  ;;  %v2608_v21 = vld [vmem:[#allocation2 + $0x54] sm:$0xf0]  ;;  %v3337_v22 = vld [vmem:[#allocation2 + $0x16c] sm:$0xf]  ;;  %vm1059_vm3 = vcmask 130048  }
  0x27   :  { %v2752_v25 = vld [vmem:[#allocation2 + $0x174] sm:$0xf0]  ;;  %v2690_v26 = vld [vmem:[#allocation2 + $0xf0] sm:$0xf]  ;;  %v3359_v31 = vld [vmem:[#allocation2 + $0x218] sm:$0xf0] }
  0x28   :  { %400 = vmatpush.bf16.msra.mxu1 %v2480_v35  ;;  %426 = vmatpush.bf16.msra.mxu2 %v2488_v51  ;;  %v3709_v51 = vor.u32 %v3302_v49, %v2606_v48  ;;  %4286 = vst [vmem:[#allocation13_spill] sm:$0xff] %v3731_v10  ;;  %v3745_v29 = vor.u32 %v3337_v22, %v2752_v25  ;;  %v3298_v32 = vld [vmem:[#allocation2 + $0x34] sm:$0xf]  ;;  %v2740_v38 = vld [vmem:[#allocation2 + $0x15c] sm:$0xf0]  ;;  %vm1229_vm4 = vcmask 1043456  }
  0x29   :  { %908 = vmatpush.bf16.msra.mxu0 %v3696_v36  ;;  %v2678_v41 = vld [vmem:[#allocation2 + $0xd8] sm:$0xf]  ;;  %v3320_v42 = vld [vmem:[#allocation2 + $0xe0] sm:$0xf0]  ;;  %v3295_v48 = vld [vmem:[#allocation2 + $0x1c] sm:$0xf] }
  0x2a   :  { %v2584_v49 = vld [vmem:[#allocation2 + $0x24] sm:$0xf0]  ;;  %v2810_v62 = vld [vmem:[#allocation2 + $0x1e0] sm:$0xf]  ;;  %v3328_v8 = vld [vmem:[#allocation2 + $0x124] sm:$0xf] }
  0x2b   :  { %v2798_v22 = vld [vmem:[#allocation2 + $0x1c8] sm:$0xf]  ;;  %v3350_v25 = vld [vmem:[#allocation2 + $0x1d0] sm:$0xf0]  ;;  %s3624_s22 = smov [#allocation7]   ;;  %s2452_s26 = sshll.u32 %s4236_s8, 4  ;;  %s2453_s26 = int_to_ptr.hbm [resolvable:$true] %s2452_s26 }
  0x2c   :  { %401 = vmatpush.bf16.msra.mxu1 %v2468_v43  ;;  %427 = vmatpush.bf16.msra.mxu2 %v2476_v57  ;;  %v2594_v57 = vld [vmem:[#allocation2 + $0x30] sm:$0xf]  ;;  %s2450_s23 = sshll.u32 %s3624_s22, 4  ;;  %s2451_s23 = int_to_ptr.vmem [resolvable:$true] %s2450_s23 }
  0x2d   :  { %909 = vmatpush.bf16.msra.mxu0 %v3700_v44 }
  0x2f   :  { %402 = vmatmul.bf16.vlgmr.msra.gmra.mxu1 %v258_v50  ;;  %428 = vmatmul.bf16.vlgmr.msra.gmra.mxu2 %v258_v50 }
  0x30   :  { %407 = vmatpush.bf16.msrb.mxu1 %v2556_v47 }
  0x31   :  { %910 = vmatpush.bf16.msra.mxu0 %v3709_v51 }
  0x34   :  { %408 = vmatpush.bf16.msrb.mxu1 %v2544_v54  ;;  %v2644_v54 = vld [vmem:[#allocation2 + $0x9c] sm:$0xf0] }
  0x35   :  { %v3713_v56 = vor.u32 %v3310_v53, %v2644_v54  ;;  %v2728_v53 = vld [vmem:[#allocation2 + $0x144] sm:$0xf0]  ;;  %v3764_v54 = vor.u32 %v3320_v42, %v2678_v41  ;;  %v3336_v41 = vld [vmem:[#allocation2 + $0x160] sm:$0xf0] }
  0x37   :  { %4284 = vst [vmem:[#allocation11_spill] sm:$0xff] %v3713_v56 }
  0x38   :  { %409 = vmatpush.bf16.msrb.mxu1 %v2532_v58  ;;  %v3299_v58 = vld [vmem:[#allocation2 + $0x38] sm:$0xf0] }
  0x39   :  { %v3716_v60 = vor.u32 %v3299_v58, %v2594_v57  ;;  %v3766_v57 = vor.u32 %v3295_v48, %v2584_v49  ;;  %v3322_v48 = vld [vmem:[#allocation2 + $0xf4] sm:$0xf] }
  0x3b   :  { %911 = vmatpush.bf16.msra.mxu0 %v3716_v60  ;;  %4289 = vst [vmem:[#allocation16_spill] sm:$0xff] %v3766_v57 }
  0x3c   :  { %410 = vmatpush.bf16.msrb.mxu1 %v2520_v61  ;;  %v3332_v61 = vld [vmem:[#allocation2 + $0x140] sm:$0xf0] }
  0x40   :  { %411 = vmatpush.bf16.msrb.mxu1 %v2508_v0  ;;  %v3720_v0 = vor.u32 %v3332_v61, %v2726_v59  ;;  %v2666_v59 = vld [vmem:[#allocation2 + $0xc0] sm:$0xf]  ;;  %v3317_v61 = vld [vmem:[#allocation2 + $0xc8] sm:$0xf0] }
  0x41   :  { %v3775_v63 = vor.u32 %v3317_v61, %v2666_v59  ;;  %v2824_v59 = vld [vmem:[#allocation2 + $0x204] sm:$0xf0] }
  0x44   :  { %412 = vmatpush.bf16.msrb.mxu1 %v2496_v3  ;;  %v3296_v3 = vld [vmem:[#allocation2 + $0x20] sm:$0xf0] }
  0x45   :  { %v3727_v5 = vor.u32 %v3296_v3, %v2582_v2  ;;  %v3353_v2 = vld [vmem:[#allocation2 + $0x1e8] sm:$0xf0]  ;;  %v3292_v3 = vld [vmem:[#allocation2 + $0x4] sm:$0xf] }
  0x47   :  { %912 = vmatpush.bf16.msra.mxu0 %v3727_v5 }
  0x48   :  { %413 = vmatpush.bf16.msrb.mxu1 %v2484_v6  ;;  %v3329_v6 = vld [vmem:[#allocation2 + $0x128] sm:$0xf0] }
  0x4c   :  { %414 = vmatpush.bf16.msrb.mxu1 %v2472_v9  ;;  %v3729_v9 = vor.u32 %v3329_v6, %v2714_v4  ;;  %v2572_v4 = vld [vmem:[#allocation2 + $0xc] sm:$0xf0]  ;;  %v3777_v6 = vor.u32 %v3353_v2, %v2810_v62  ;;  %v2734_v2 = vld [vmem:[#allocation2 + $0x140] sm:$0xf] }
  0x4d   :  { %v3779_v7 = vor.u32 %v3292_v3, %v2572_v4  ;;  %v3333_v3 = vld [vmem:[#allocation2 + $0x148] sm:$0xf0] }
  0x4e   :  { %v3811_v4 = vor.u32 %v3333_v3, %v2734_v2  ;;  %v2800_v2 = vld [vmem:[#allocation2 + $0x1d4] sm:$0xf0]  ;;  %v2662_v3 = vld [vmem:[#allocation2 + $0xb0] sm:$0xf] }
  0x4f   :  { %415 = vmatmul.bf16.vlgmr.msrb.gmra.mxu1 %v258_v50  ;;  %v2738_v50 = vld [vmem:[#allocation2 + $0x150] sm:$0xf]  ;;  %4290 = vst [vmem:[#allocation17_spill] sm:$0xff] %v3779_v7 }
  0x50   :  { %920 = vmatpush.bf16.msra.mxu1 %v3692_v33  ;;  %v3711_v55 = vor.u32 %v3335_v52, %v2738_v50  ;;  %v3331_v52 = vld [vmem:[#allocation2 + $0x13c] sm:$0xf]  ;;  %4295 = vst [vmem:[#allocation22_spill] sm:$0xff] %v3811_v4 }
  0x51   :  { %v3769_v58 = vor.u32 %v3331_v52, %v2728_v53  ;;  %v2692_v52 = vld [vmem:[#allocation2 + $0xfc] sm:$0xf0]  ;;  %v3355_v53 = vld [vmem:[#allocation2 + $0x1fc] sm:$0xf] }
  0x52   :  { %v3807_v61 = vor.u32 %v3322_v48, %v2692_v52  ;;  %v3809_v62 = vor.u32 %v3355_v53, %v2824_v59  ;;  %v3316_v48 = vld [vmem:[#allocation2 + $0xc4] sm:$0xf]  ;;  %v2668_v52 = vld [vmem:[#allocation2 + $0xcc] sm:$0xf0]  ;;  %v3349_v59 = vld [vmem:[#allocation2 + $0x1cc] sm:$0xf] }
  0x53   :  { %v3833_v53 = vor.u32 %v3316_v48, %v2668_v52  ;;  %v3312_v48 = vld [vmem:[#allocation2 + $0xa0] sm:$0xf0]  ;;  %v2698_v52 = vld [vmem:[#allocation2 + $0xf8] sm:$0xf] }
  0x54   :  { %921 = vmatpush.bf16.msra.mxu1 %v3711_v55 }
  0x58   :  { %922 = vmatpush.bf16.msra.mxu1 %v3720_v0 }
  0x5c   :  { %923 = vmatpush.bf16.msra.mxu1 %v3729_v9 }
  0xac   :  { %v403_v12 = vpop.f32.mrf.mxu1 }
  0xad   :  { %v404_v13 = vadd.f32 %v403_v12, %v260_v11  ;;  %v2570_v11 = vld [vmem:[#allocation2] sm:$0xf]  ;;  %v3293_v12 = vld [vmem:[#allocation2 + $0x8] sm:$0xf0] }
  0xaf   :  { %v433_v14 = vpack.c.bf16 %v404_v13, %v404_v13  ;;  %v2702_v13 = vld [vmem:[#allocation2 + $0x108] sm:$0xf] }
  0xb1   :  { %v447_v15 = vsel %vm445_vm0, %v433_v14, 0  ;;  %v3734_v14 = vor.u32 %v3293_v12, %v2570_v11  ;;  %v2716_v11 = vld [vmem:[#allocation2 + $0x12c] sm:$0xf0]  ;;  %v3361_v12 = vld [vmem:[#allocation2 + $0x22c] sm:$0xf] }
  0xb2   :  { %462 = vmatpush.bf16.msra.mxu3 %v447_v15  ;;  %v429_v18 = vpop.f32.mrf.mxu2  ;;  %v3326_v15 = vld [vmem:[#allocation2 + $0x110] sm:$0xf0] }
  0xb3   :  { %v430_v27 = vadd.f32 %v429_v18, %v262_v19  ;;  %v3738_v18 = vor.u32 %v3326_v15, %v2702_v13  ;;  %913 = vmatpush.bf16.msra.mxu0 %v3734_v14  ;;  %v3782_v13 = vor.u32 %v3328_v8, %v2716_v11  ;;  %v2848_v15 = vld [vmem:[#allocation2 + $0x234] sm:$0xf0]  ;;  %v3344_v11 = vld [vmem:[#allocation2 + $0x1a0] sm:$0xf0] }
  0xb4   :  { %v405_v17 = vpop.f32.mrf.mxu1  ;;  %v2774_v8 = vld [vmem:[#allocation2 + $0x198] sm:$0xf] }
  0xb5   :  { %2565 = vmatmul.msk.bf16.vlgmr.msra.gmra.mxu3 %vm441_vm1, %v3291_v16  ;;  %v435_v35 = vpack.c.bf16 %v430_v27, %v430_v27  ;;  %v3362_v17 = vld [vmem:[#allocation2 + $0x230] sm:$0xf0]  ;;  %v3323_v27 = vld [vmem:[#allocation2 + $0xf8] sm:$0xf0]  ;;  %924 = vmatpush.bf16.msra.mxu1 %v3738_v18 }
  0xb6   :  { %v3752_v39 = vor.u32 %v3323_v27, %v2690_v26  ;;  %v3325_v26 = vld [vmem:[#allocation2 + $0x10c] sm:$0xf]  ;;  %v3791_v27 = vor.u32 %v3350_v25, %v2798_v22  ;;  %v2812_v22 = vld [vmem:[#allocation2 + $0x1ec] sm:$0xf0] }
  0xb7   :  { %v453_v43 = vsel %vm445_vm0, %v435_v35, 0  ;;  %v2596_v35 = vld [vmem:[#allocation2 + $0x3c] sm:$0xf0]  ;;  %962 = vmatpush.bf16.msrb.mxu0 %v3745_v29 }
  0xb8   :  { %4292 = vst [vmem:[#allocation19_spill] sm:$0xff] %v3791_v27 }
  0xb9   :  { %925 = vmatpush.bf16.msra.mxu1 %v3752_v39 }
  0xba   :  { %v431_v20 = vpop.f32.mrf.mxu2 }
  0xbb   :  { %v3301_v20 = vld [vmem:[#allocation2 + $0x4c] sm:$0xf] }
  0xbc   :  { %v3742_v23 = vor.u32 %v3301_v20, %v2608_v21  ;;  %v3786_v20 = vor.u32 %v3361_v12, %v2848_v15  ;;  %v3319_v12 = vld [vmem:[#allocation2 + $0xdc] sm:$0xf]  ;;  %v3815_v15 = vor.u32 %v3344_v11, %v2774_v8  ;;  %v3835_v8 = vor.u32 %v3349_v59, %v2800_v2  ;;  %v3324_v59 = vld [vmem:[#allocation2 + $0x100] sm:$0xf0] }
  0xbd   :  { %926 = vmatpush.bf16.msra.mxu1 %v3764_v54  ;;  %v3315_v11 = vld [vmem:[#allocation2 + $0xb8] sm:$0xf0] }
  0xbe   :  { %4287 = vst [vmem:[#allocation14_spill] sm:$0xff] %v3742_v23 }
  0xbf   :  { %4296 = vst [vmem:[#allocation23_spill] sm:$0xff] %v3815_v15 }
  0xc1   :  { %927 = vmatpush.bf16.msra.mxu1 %v3775_v63 }
  0xc5   :  { %976 = vmatpush.bf16.msrb.mxu1 %v3786_v20 }
  0xcc   :  { %v416_v34 = vpop.f32.mrf.mxu1 }
  0xcd   :  { %v417_v37 = vadd.f32 %v416_v34, %v261_v30  ;;  %v2834_v30 = vld [vmem:[#allocation2 + $0x210] sm:$0xf] }
  0xce   :  { %v3748_v34 = vor.u32 %v3359_v31, %v2834_v30  ;;  %v2704_v30 = vld [vmem:[#allocation2 + $0x114] sm:$0xf0]  ;;  %v3358_v31 = vld [vmem:[#allocation2 + $0x214] sm:$0xf] }
  0xcf   :  { %v434_v40 = vpack.c.bf16 %v417_v37, %v417_v37  ;;  %v3334_v37 = vld [vmem:[#allocation2 + $0x154] sm:$0xf] }
  0xd1   :  { %v450_v45 = vsel %vm445_vm0, %v434_v40, 0  ;;  %v3754_v40 = vor.u32 %v3298_v32, %v2596_v35  ;;  %v2836_v32 = vld [vmem:[#allocation2 + $0x21c] sm:$0xf0]  ;;  %v3795_v35 = vor.u32 %v3325_v26, %v2704_v30  ;;  %v2722_v30 = vld [vmem:[#allocation2 + $0x128] sm:$0xf] }
  0xd2   :  { %476 = vmatpush.bf16.msrb.mxu3 %v450_v45  ;;  %v3757_v45 = vor.u32 %v3334_v37, %v2740_v38  ;;  %v3797_v37 = vor.u32 %v3358_v31, %v2836_v32  ;;  %v2746_v38 = vld [vmem:[#allocation2 + $0x158] sm:$0xf]  ;;  %v3330_v31 = vld [vmem:[#allocation2 + $0x130] sm:$0xf0] }
  0xd3   :  { %4288 = vst [vmem:[#allocation15_spill] sm:$0xff] %v3754_v40  ;;  %v3799_v42 = vor.u32 %v3336_v41, %v2746_v38  ;;  %v3823_v32 = vor.u32 %v3330_v31, %v2722_v30  ;;  %v2762_v41 = vld [vmem:[#allocation2 + $0x180] sm:$0xf]  ;;  %v3346_v30 = vld [vmem:[#allocation2 + $0x1b4] sm:$0xf] }
  0xd4   :  { %v418_v47 = vpop.f32.mrf.mxu1  ;;  %963 = vmatpush.bf16.msrb.mxu0 %v3757_v45  ;;  %977 = vmatpush.bf16.msrb.mxu1 %v3797_v37  ;;  %v2788_v31 = vld [vmem:[#allocation2 + $0x1bc] sm:$0xf0] }
  0xd5   :  { %2566 = vmatmul.msk.bf16.vlgmr.msrb.gmra.mxu3 %vm441_vm1, %v3291_v16  ;;  %v3356_v47 = vld [vmem:[#allocation2 + $0x200] sm:$0xf0]  ;;  %4293 = vst [vmem:[#allocation20_spill] sm:$0xff] %v3799_v42 }
  0xd6   :  { %490 = vmatpush.bf16.msra.mxu3 %v453_v43  ;;  %v2822_v43 = vld [vmem:[#allocation2 + $0x1f8] sm:$0xf]  ;;  %4297 = vst [vmem:[#allocation24_spill] sm:$0xff] %v3823_v32 }
  0xd7   :  { %v3760_v50 = vor.u32 %v3356_v47, %v2822_v43  ;;  %v2786_v43 = vld [vmem:[#allocation2 + $0x1b0] sm:$0xf]  ;;  %v3347_v47 = vld [vmem:[#allocation2 + $0x1b8] sm:$0xf0] }
  0xd8   :  { %964 = vmatpush.bf16.msrb.mxu0 %v3769_v58  ;;  %v3803_v49 = vor.u32 %v3347_v47, %v2786_v43  ;;  %978 = vmatpush.bf16.msrb.mxu1 %v3809_v62  ;;  %v3341_v43 = vld [vmem:[#allocation2 + $0x188] sm:$0xf0] }
  0xd9   :  { %v3829_v47 = vor.u32 %v3341_v43, %v2762_v41  ;;  %v2650_v41 = vld [vmem:[#allocation2 + $0x98] sm:$0xf]  ;;  %v3846_v43 = vor.u32 %v3346_v30, %v2788_v31  ;;  %v3309_v30 = vld [vmem:[#allocation2 + $0x88] sm:$0xf0]  ;;  %v2686_v31 = vld [vmem:[#allocation2 + $0xe0] sm:$0xf] }
  0xda   :  { %948 = vmatpush.bf16.msrb.mxu3 %v3703_v46  ;;  %4294 = vst [vmem:[#allocation21_spill] sm:$0xff] %v3803_v49  ;;  %v3848_v2 = vor.u32 %v3312_v48, %v2650_v41  ;;  %v3340_v48 = vld [vmem:[#allocation2 + $0x184] sm:$0xf] }
  0xdb   :  { %4298 = vst [vmem:[#allocation25_spill] sm:$0xff] %v3829_v47 }
  0xdc   :  { %965 = vmatpush.bf16.msrb.mxu0 %v3782_v13  ;;  %4301 = vst [vmem:[#allocation28_spill] sm:$0xff] %v3848_v2 }
  0xde   :  { %949 = vmatpush.bf16.msrb.mxu3 %v3713_v56 }
  0xe0   :  { %966 = vmatpush.bf16.msrb.mxu0 %v3795_v35 }
  0xe2   :  { %950 = vmatpush.bf16.msrb.mxu3 %v3722_v1  ;;  %v3360_v1 = vld [vmem:[#allocation2 + $0x220] sm:$0xf0] }
  0xe4   :  { %967 = vmatpush.bf16.msrb.mxu0 %v3807_v61 }
  0xe5   :  { %2567 = vmatmul.msk.bf16.vlgmr.msra.gmra.mxu3 %vm441_vm1, %v3291_v16  ;;  %v2846_v16 = vld [vmem:[#allocation2 + $0x228] sm:$0xf] }
  0xe6   :  { %951 = vmatpush.bf16.msrb.mxu3 %v3731_v10  ;;  %v3740_v19 = vor.u32 %v3362_v17, %v2846_v16  ;;  %v2758_v16 = vld [vmem:[#allocation2 + $0x170] sm:$0xf]  ;;  %v3339_v17 = vld [vmem:[#allocation2 + $0x178] sm:$0xf0] }
  0xe7   :  { %v3788_v21 = vor.u32 %v3339_v17, %v2758_v16  ;;  %v2680_v16 = vld [vmem:[#allocation2 + $0xe4] sm:$0xf0]  ;;  %v3352_v17 = vld [vmem:[#allocation2 + $0x1e4] sm:$0xf] }
  0xe8   :  { %934 = vmatpush.bf16.msrb.mxu2 %v3740_v19  ;;  %v3819_v25 = vor.u32 %v3319_v12, %v2680_v16  ;;  %v3821_v26 = vor.u32 %v3352_v17, %v2812_v22  ;;  %v2710_v12 = vld [vmem:[#allocation2 + $0x110] sm:$0xf]  ;;  %v3327_v16 = vld [vmem:[#allocation2 + $0x118] sm:$0xf0]  ;;  %v3838_v17 = vor.u32 %v3315_v11, %v2662_v3  ;;  %v3850_v3 = vor.u32 %v3324_v59, %v2698_v52  ;;  %v2626_v59 = vld [vmem:[#allocation2 + $0x68] sm:$0xf] }
  0xe9   :  { %4291 = vst [vmem:[#allocation18_spill] sm:$0xff] %v3788_v21  ;;  %v3840_v22 = vor.u32 %v3327_v16, %v2710_v12  ;;  %v3343_v12 = vld [vmem:[#allocation2 + $0x19c] sm:$0xf]  ;;  %v2776_v16 = vld [vmem:[#allocation2 + $0x1a4] sm:$0xf0] }
  0xea   :  { %952 = vmatpush.bf16.msrb.mxu3 %v3742_v23  ;;  %968 = vmatpush.bf16.msrb.mxu0 %v3819_v25  ;;  %4299 = vst [vmem:[#allocation26_spill] sm:$0xff] %v3838_v17  ;;  %v2764_v52 = vld [vmem:[#allocation2 + $0x18c] sm:$0xf0]  ;;  %v2578_v23 = vld [vmem:[#allocation2 + $0x8] sm:$0xf] }
  0xeb   :  { %979 = vmatpush.bf16.msrb.mxu1 %v3821_v26  ;;  %4300 = vst [vmem:[#allocation27_spill] sm:$0xff] %v3840_v22 }
  0xec   :  { %935 = vmatpush.bf16.msrb.mxu2 %v3748_v34  ;;  %4302 = vst [vmem:[#allocation29_spill] sm:$0xff] %v3850_v3 }
  0xee   :  { %953 = vmatpush.bf16.msrb.mxu3 %v3754_v40  ;;  %969 = vmatpush.bf16.msrb.mxu0 %v3833_v53 }
  0xef   :  { %980 = vmatpush.bf16.msrb.mxu1 %v3835_v8 }
  0xf0   :  { %936 = vmatpush.bf16.msrb.mxu2 %v3760_v50 }
  0xf2   :  { %954 = vmatpush.bf16.msrb.mxu3 %v3766_v57 }
  0xf3   :  { %981 = vmatpush.bf16.msrb.mxu1 %v3846_v43 }
  0xf4   :  { %937 = vmatpush.bf16.msrb.mxu2 %v3777_v6 }
  0xf6   :  { %955 = vmatpush.bf16.msrb.mxu3 %v3779_v7 }
  0xf8   :  { %938 = vmatpush.bf16.msrb.mxu2 %v3791_v27 }
  0xfa   :  { %1004 = vmatpush.bf16.msra.mxu3 %v3788_v21  ;;  %v3864_v21 = vor.u32 %v3340_v48, %v2764_v52  ;;  %v2602_v48 = vld [vmem:[#allocation2 + $0x38] sm:$0xf]  ;;  %v3300_v52 = vld [vmem:[#allocation2 + $0x40] sm:$0xf0] }
  0xfc   :  { %939 = vmatpush.bf16.msrb.mxu2 %v3803_v49  ;;  %v2842_v49 = vld [vmem:[#allocation2 + $0x218] sm:$0xf] }
  0xfe   :  { %1005 = vmatpush.bf16.msra.mxu3 %v3799_v42 }
 0x100   :  { %940 = vmatpush.bf16.msrb.mxu2 %v3815_v15  ;;  %v3294_v15 = vld [vmem:[#allocation2 + $0x10] sm:$0xf0] }
 0x102   :  { %1006 = vmatpush.bf16.msra.mxu3 %v3811_v4  ;;  %v3321_v4 = vld [vmem:[#allocation2 + $0xe8] sm:$0xf0] }
 0x103   :  { %v3859_v41 = vor.u32 %v3321_v4, %v2686_v31  ;;  %v3303_v31 = vld [vmem:[#allocation2 + $0x58] sm:$0xf0] }
 0x104   :  { %941 = vmatpush.bf16.msrb.mxu2 %v3829_v47  ;;  %v3363_v47 = vld [vmem:[#allocation2 + $0x238] sm:$0xf0] }
 0x105   :  { %4304 = vst [vmem:[#allocation31_spill] sm:$0xff] %v3859_v41 }
 0x106   :  { %1007 = vmatpush.bf16.msra.mxu3 %v3823_v32  ;;  %v2638_v32 = vld [vmem:[#allocation2 + $0x80] sm:$0xf] }
 0x107   :  { %v3857_v42 = vor.u32 %v3309_v30, %v2638_v32  ;;  %v2614_v30 = vld [vmem:[#allocation2 + $0x50] sm:$0xf] }
 0x108   :  { %990 = vmatpush.bf16.msra.mxu2 %v3838_v17 }
 0x109   :  { %4303 = vst [vmem:[#allocation30_spill] sm:$0xff] %v3857_v42 }
 0x10a   :  { %1008 = vmatpush.bf16.msra.mxu3 %v3840_v22  ;;  %v3855_v22 = vor.u32 %v3343_v12, %v2776_v16  ;;  %v3306_v12 = vld [vmem:[#allocation2 + $0x70] sm:$0xf0]  ;;  %v2674_v16 = vld [vmem:[#allocation2 + $0xc8] sm:$0xf] }
 0x10b   :  { %v3866_v7 = vor.u32 %v3306_v12, %v2626_v59  ;;  %v3887_v12 = vld [vmem:[%s4231_s3 + $0xc] sm:$0xff] }
 0x10c   :  { %991 = vmatpush.bf16.msra.mxu2 %v3848_v2  ;;  %982 = vmatpush.bf16.msrb.mxu1 %v3855_v22  ;;  %4310 = vst [vmem:[#allocation37_spill] sm:$0xff] %v3887_v12  ;;  %v4261_v57 = vunpack.c.h.bf16 %v3887_v12  ;;  %v2854_v2 = vld [vmem:[#allocation2 + $0x230] sm:$0xf] }
 0x10d   :  { %4305 = vst [vmem:[#allocation32_spill] sm:$0xff] %v3866_v7 }
 0x10e   :  { %1009 = vmatpush.bf16.msra.mxu3 %v3850_v3  ;;  %v3318_v3 = vld [vmem:[#allocation2 + $0xd0] sm:$0xf0] }
 0x10f   :  { %v3868_v32 = vor.u32 %v3318_v3, %v2674_v16  ;;  %v3881_v3 = vld [vmem:[%s4231_s3] sm:$0xff] }
 0x110   :  { %992 = vmatpush.bf16.msra.mxu2 %v3857_v42  ;;  %983 = vmatpush.bf16.msrb.mxu1 %v3864_v21  ;;  %v3873_v42 = vor.u32 %v3303_v31, %v2614_v30  ;;  %4309 = vst [vmem:[#allocation36_spill] sm:$0xff] %v3881_v3  ;;  %v2590_v16 = vld [vmem:[#allocation2 + $0x20] sm:$0xf]  ;;  %v3297_v30 = vld [vmem:[#allocation2 + $0x28] sm:$0xf0]  ;;  %v3890_v31 = vunpack.c.l.bf16 %v3881_v3 }
 0x111   :  { %4306 = vst [vmem:[#allocation33_spill] sm:$0xff] %v3868_v32 }
 0x112   :  { %1010 = vmatpush.bf16.msra.mxu3 %v3859_v41  ;;  %4307 = vst [vmem:[#allocation34_spill] sm:$0xff] %v3873_v42  ;;  %v3876_v41 = vor.u32 %v3300_v52, %v2602_v48  ;;  %v3901_v48 = vor.u32 %v3294_v15, %v2578_v23  ;;  %v3913_v23 = vor.u32 %v3360_v1, %v2842_v49  ;;  %v3357_v15 = vld [vmem:[#allocation2 + $0x208] sm:$0xf0]  ;;  %v3354_v1 = vld [vmem:[#allocation2 + $0x1f0] sm:$0xf0] }
 0x114   :  { %993 = vmatpush.bf16.msra.mxu2 %v3866_v7  ;;  %4308 = vst [vmem:[#allocation35_spill] sm:$0xff] %v3876_v41 }
 0x115   :  { %4312 = vst [vmem:[#allocation39_spill] sm:$0xff] %v3901_v48 }
 0x116   :  { %1011 = vmatpush.bf16.msra.mxu3 %v3868_v32  ;;  %v3894_v32 = vunpack.c.l.bf16 %v3887_v12  ;;  %4315 = vst [vmem:[#allocation41_spill] sm:$0xff] %v3913_v23  ;;  %v3348_v12 = vld [vmem:[#allocation2 + $0x1c0] sm:$0xf0] }
 0x118   :  { %994 = vmatpush.bf16.msra.mxu2 %v3873_v42  ;;  %v3897_v42 = vor.u32 %v3297_v30, %v2590_v16  ;;  %v4313_v16 = vunpack.c.h.bf16 %v3881_v3 }
 0x11a   :  { %4311 = vst [vmem:[#allocation38_spill] sm:$0xff] %v3897_v42 }
 0x11c   :  { %995 = vmatpush.bf16.msra.mxu2 %v3876_v41 }
 0x120   :  { %996 = vmatpush.bf16.msra.mxu2 %v3897_v42 }
 0x124   :  { %997 = vmatpush.bf16.msra.mxu2 %v3901_v48 }
 0x138   :  { %v3825_v38 = vpop.f32.mrf.mxu3 }
 0x140   :  { %v466_v11 = vpop.f32.mrf.mxu3 }
 0x158   :  { %v478_v4 = vpop.f32.mrf.mxu3 }
 0x159   :  { %v497_v59 = vpack.c.bf16 %v478_v4, %v3825_v38 }
 0x15b   :  { %v501_v38 = vunpack.c.l.bf16 %v497_v59  ;;  %v502_v4 = vunpack.c.h.bf16 %v497_v59 }
 0x15d   :  { %v513_v10 = vmul.f32 %v3890_v31, %v501_v38  ;;  %v514_v30 = vmul.f32 %v4313_v16, %v502_v4 }
 0x160   :  { %v480_v52 = vpop.f32.mrf.mxu3 }
 0x161   :  { %v499_v7 = vpack.c.bf16 %v480_v52, %v466_v11  ;;  %v3909_v52 = vor.u32 %v3363_v47, %v2854_v2  ;;  %v3918_v47 = vld [vmem:[%s4231_s3 + $0x8] sm:$0xf] }
 0x162   :  { %4316 = vst [vmem:[#allocation42_spill] sm:$0xff] %v3918_v47  ;;  %v2818_v2 = vld [vmem:[#allocation2 + $0x1e8] sm:$0xf] }
 0x163   :  { %v504_v40 = vunpack.c.l.bf16 %v499_v7  ;;  %v505_v17 = vunpack.c.h.bf16 %v499_v7  ;;  %4314 = vst [vmem:[#allocation40_spill] sm:$0xff] %v3909_v52 }
 0x165   :  { %v516_v59 = vmul.f32 %v3894_v32, %v504_v40  ;;  %v517_v11 = vmul.f32 %v4261_v57, %v505_v17  ;;  %v2830_v40 = vld [vmem:[#allocation2 + $0x200] sm:$0xf]  ;;  %v2806_v57 = vld [vmem:[#allocation2 + $0x1d0] sm:$0xf] }
 0x166   :  { %v3926_v17 = vor.u32 %v3357_v15, %v2830_v40 }
 0x167   :  { %v520_v7 = vpack.c.bf16 %v517_v11, %v514_v30  ;;  %v519_v41 = vpack.c.bf16 %v516_v59, %v513_v10  ;;  %v3924_v10 = vld [vmem:[%s4231_s3 + $0x14] sm:$0xf]  ;;  %v3931_v59 = vor.u32 %v3354_v1, %v2818_v2  ;;  %v2782_v1 = vld [vmem:[#allocation2 + $0x1a0] sm:$0xf] }
 0x168   :  { %v492_v27 = vpop.f32.mrf.mxu3  ;;  %4317 = vst [vmem:[#allocation43_spill] sm:$0xff] %v3924_v10  ;;  %v4265_v30 = vunpack.c.l.bf16 %v3924_v10 }
 0x169   :  { %914 = vmatmul.bf16.vlgmr.msra.gmra.mxu0 %v519_v41  ;;  %928 = vmatmul.bf16.vlgmr.msra.gmra.mxu1 %v520_v7  ;;  %v498_v38 = vpack.c.bf16 %v492_v27, %v492_v27  ;;  %4318 = vst [vmem:[#allocation44_spill] sm:$0xff] %v3926_v17  ;;  %v4266_v27 = vunpack.c.l.bf16 %v3918_v47 }
 0x16a   :  { %956 = vmatmul.bf16.vlgmr.msrb.gmra.mxu3 %v519_v41  ;;  %1018 = vmatpush.bf16.msra.mxu0 %v3909_v52  ;;  %4319 = vst [vmem:[#allocation45_spill] sm:$0xff] %v3931_v59 }
 0x16b   :  { %v503_v4 = vunpack.c.l.bf16 %v498_v38 }
 0x16d   :  { %v515_v40 = vmul.f32 %v4266_v27, %v503_v4  ;;  %v3345_v4 = vld [vmem:[#allocation2 + $0x1a8] sm:$0xf0] }
 0x16e   :  { %1019 = vmatpush.bf16.msra.mxu0 %v3913_v23  ;;  %v3351_v23 = vld [vmem:[#allocation2 + $0x1d8] sm:$0xf0] }
 0x16f   :  { %v3938_v52 = vor.u32 %v3351_v23, %v2806_v57 }
 0x170   :  { %v494_v49 = vpop.f32.mrf.mxu3 }
 0x171   :  { %v500_v16 = vpack.c.bf16 %v494_v49, %v494_v49  ;;  %4320 = vst [vmem:[#allocation46_spill] sm:$0xff] %v3938_v52  ;;  %v2794_v49 = vld [vmem:[#allocation2 + $0x1b8] sm:$0xf] }
 0x172   :  { %1020 = vmatpush.bf16.msra.mxu0 %v3926_v17  ;;  %v3941_v2 = vor.u32 %v3348_v12, %v2794_v49 }
 0x173   :  { %v506_v11 = vunpack.c.l.bf16 %v500_v16  ;;  %v3944_v16 = vor.u32 %v3345_v4, %v2782_v1 }
 0x174   :  { %4321 = vst [vmem:[#allocation47_spill] sm:$0xff] %v3941_v2 }
 0x175   :  { %v518_v15 = vmul.f32 %v4265_v30, %v506_v11  ;;  %4322 = vst [vmem:[#allocation48_spill] sm:$0xff] %v3944_v16  ;;  %v2770_v11 = vld [vmem:[#allocation2 + $0x188] sm:$0xf] }
 0x176   :  { %1021 = vmatpush.bf16.msra.mxu0 %v3931_v59 }
 0x177   :  { %v521_v38 = vpack.c.bf16 %v518_v15, %v515_v40  ;;  %v3342_v40 = vld [vmem:[#allocation2 + $0x190] sm:$0xf0] }
 0x178   :  { %v3947_v57 = vor.u32 %v3342_v40, %v2770_v11 }
 0x179   :  { %942 = vmatmul.bf16.vlgmr.msrb.gmra.mxu2 %v521_v38  ;;  %970 = vmatmul.bf16.vlgmr.msrb.gmra.mxu0 %v520_v7 }
 0x17a   :  { %984 = vmatmul.bf16.vlgmr.msrb.gmra.mxu1 %v521_v38  ;;  %1012 = vmatmul.bf16.vlgmr.msra.gmra.mxu3 %v520_v7  ;;  %4323 = vst [vmem:[#allocation49_spill] sm:$0xff] %v3947_v57 }
 0x17b   :  { %1022 = vmatpush.bf16.msra.mxu0 %v3938_v52 }
 0x17f   :  { %1023 = vmatpush.bf16.msra.mxu0 %v3941_v2 }
 0x183   :  { %1024 = vmatpush.bf16.msra.mxu0 %v3944_v16 }
 0x187   :  { %1025 = vmatpush.bf16.msra.mxu0 %v3947_v57 }
 0x189   :  { %998 = vmatmul.bf16.vlgmr.msra.gmra.mxu2 %v519_v41 }
 0x18a   :  { %1026 = vmatmul.bf16.vlgmr.msra.gmra.mxu0 %v521_v38 }
 0x1e6   :  { %v915_v7 = vpop.f32.mrf.mxu0  ;;  %v929_v23 = vpop.f32.mrf.mxu1 }
 0x1e7   :  { %v930_v10 = vadd.f32 %v929_v23, %v915_v7 }
 0x1ed   :  { %v957_v49 = vpop.f32.mrf.mxu3 }
 0x1ee   :  { %v917_v12 = vpop.f32.mrf.mxu0  ;;  %v931_v15 = vpop.f32.mrf.mxu1 }
 0x1ef   :  { %v932_v41 = vadd.f32 %v931_v15, %v917_v12 }
 0x1f5   :  { %v959_v4 = vpop.f32.mrf.mxu3 }
 0x1f6   :  { %v971_v30 = vpop.f32.mrf.mxu0 }
 0x1f7   :  { %v985_v27 = vpop.f32.mrf.mxu1  ;;  %v972_v1 = vadd.f32 %v971_v30, %v957_v49 }
 0x1f9   :  { %v986_v16 = vadd.f32 %v985_v27, %v972_v1 }
 0x1fc   :  { %v943_v2 = vpop.f32.mrf.mxu2 }
 0x1fd   :  { %v944_v3 = vadd.f32 %v943_v2, %v930_v10  ;;  %v1013_v48 = vpop.f32.mrf.mxu3  ;;  %v166_v10 = vld [vmem:[%s4233_s5] sm:$0xff] }
 0x1fe   :  { %v973_v52 = vpop.f32.mrf.mxu0 }
 0x1ff   :  { %v974_v59 = vadd.f32 %v973_v52, %v959_v4  ;;  %v987_v17 = vpop.f32.mrf.mxu1 }
 0x201   :  { %v988_v11 = vadd.f32 %v987_v17, %v974_v59 }
 0x203   :  { %v1033_v40 = vpack.c.bf16 %v988_v11, %v986_v16 }
 0x204   :  { %v945_v57 = vpop.f32.mrf.mxu2 }
 0x205   :  { %v1039_v38 = vsel %vm1034_vm2, %v1033_v40, 0  ;;  %v946_v47 = vadd.f32 %v945_v57, %v932_v41  ;;  %v1015_v49 = vpop.f32.mrf.mxu3 }
 0x206   :  { %1048 = vmatpush.bf16.xpose.msra.mxu1 %v1039_v38 }
 0x207   :  { %v1032_v42 = vpack.c.bf16 %v946_v47, %v944_v3  ;;  %v1027_v56 = vpop.f32.mrf.mxu0 }
 0x20c   :  { %v999_v30 = vpop.f32.mrf.mxu2 }
 0x20d   :  { %2856 = vmatmul.msk.bf16.vlgmr.msra.gmra.mxu1 %vm1034_vm2, %v1032_v42  ;;  %v1014_v52 = vadd.f32 %v1013_v48, %v999_v30  ;;  %v167_v48 = vld [vmem:[%s4233_s5 + $0x8] sm:$0xff] }
 0x20f   :  { %v1029_v59 = vpop.f32.mrf.mxu0  ;;  %v1028_v16 = vadd.f32 %v1027_v56, %v1014_v52 }
 0x214   :  { %v1001_v27 = vpop.f32.mrf.mxu2 }
 0x215   :  { %v1016_v17 = vadd.f32 %v1015_v49, %v1001_v27 }
 0x217   :  { %v1030_v1 = vadd.f32 %v1029_v59, %v1016_v17  ;;  %v3964_v17 = vsel %vm1034_vm2, %v3687_v24, 0  ;;  %v3969_v59 = vsel %vm1034_vm2, %v3690_v28, 0 }
 0x219   :  { %v1083_v12 = vpack.c.bf16 %v1030_v1, %v1028_v16  ;;  %v3974_v1 = vsel %vm1034_vm2, %v3696_v36, 0 }
 0x21b   :  { %1094 = vmatpush.bf16.msrb.mxu3 %v1083_v12 }
 0x21f   :  { %1129 = vmatpush.bf16.xpose.msra.mxu3 %v3964_v17 }
 0x227   :  { %1130 = vmatpush.bf16.xpose.msra.mxu3 %v3969_v59 }
 0x22f   :  { %1131 = vmatpush.bf16.xpose.msra.mxu3 %v3974_v1 }
 0x28a   :  { %v1050_v15 = vpop.f32.mrf.mxu1 }
 0x28b   :  { %v1055_v2 = vmul.f32 0.35355338, %v1050_v15  ;;  %v3979_v15 = vsel %vm1034_vm2, %v3700_v44, 0 }
 0x28c   :  { %4324 = vst [vmem:[#allocation50_spill] sm:$0xff] %v3979_v15  ;;  %1132 = vmatpush.bf16.xpose.msra.mxu3 %v3979_v15  ;;  %v3421_v15 = vld [vmem:[#allocation5 + $0x134] sm:$0xf0] }
 0x28d   :  { %v1057_v3 = vadd.f32 %v1055_v2, %v166_v10 }
 0x28f   :  { %v1060_v47 = vsel %vm1059_vm3, %v1057_v3, -inf }
 0x290   :  { %1061 = vmax.xlane.f32.xlu0 %v1060_v47 }
 0x292   :  { %v1052_v42 = vpop.f32.mrf.mxu1 }
 0x293   :  { %v1056_v56 = vmul.f32 0.35355338, %v1052_v42 }
 0x295   :  { %v1058_v57 = vadd.f32 %v1056_v56, %v167_v48  ;;  %v3984_v48 = vsel %vm1034_vm2, %v3709_v51, 0  ;;  %v3990_v56 = vsel %vm1034_vm2, %v3716_v60, 0 }
 0x296   :  { %4325 = vst [vmem:[#allocation51_spill] sm:$0xff] %v3984_v48  ;;  %1133 = vmatpush.bf16.xpose.msra.mxu3 %v3984_v48  ;;  %v3397_v48 = vld [vmem:[#allocation5 + $0x2c] sm:$0xf0] }
 0x297   :  { %v1063_v7 = vsel %vm1059_vm3, %v1058_v57, -inf  ;;  %4326 = vst [vmem:[#allocation52_spill] sm:$0xff] %v3990_v56 }
 0x298   :  { %1064 = vmax.xlane.f32.xlu0 %v1063_v7  ;;  %v4000_v7 = vsel %vm1034_vm2, %v3734_v14, 0 }
 0x299   :  { %4328 = vst [vmem:[#allocation54_spill] sm:$0xff] %v4000_v7 }
 0x29e   :  { %1134 = vmatpush.bf16.xpose.msra.mxu3 %v3990_v56 }
 0x303   :  { %v1062_v23 = vpop.xlane.xlu0 %1061 }
 0x304   :  { %v1066_v4 = vsub.f32 %v1057_v3, %v1062_v23 }
 0x306   :  { %v1068_v11 = vmul.f32 1.442695, %v1066_v4 }
 0x308   :  { %3500 = vpow2.f32 %v1068_v11 }
 0x30b   :  { %v1065_v40 = vpop.xlane.xlu0 %1064 }
 0x30c   :  { %v1067_v41 = vsub.f32 %v1058_v57, %v1065_v40  ;;  %v3995_v57 = vsel %vm1034_vm2, %v3727_v5, 0  ;;  %v2890_v40 = vld [vmem:[#allocation5 + $0x1cc] sm:$0xf] }
 0x30d   :  { %4327 = vst [vmem:[#allocation53_spill] sm:$0xff] %v3995_v57  ;;  %1135 = vmatpush.bf16.xpose.msra.mxu3 %v3995_v57 }
 0x30e   :  { %v3501_v38 = vpop.eup %3500  ;;  %v1070_v30 = vmul.f32 1.442695, %v1067_v41  ;;  %v3395_v41 = vld [vmem:[#allocation5 + $0x1e8] sm:$0xf0] }
 0x30f   :  { %v1072_v52 = vsel %vm1059_vm3, %v3501_v38, 0.0 }
 0x310   :  { %3502 = vpow2.f32 %v1070_v30  ;;  %1073 = vadd.xlane.f32.xlu1 %v1072_v52  ;;  %v2891_v30 = vor.u32 %v3395_v41, %v2890_v40  ;;  %v3394_v52 = vld [vmem:[#allocation5 + $0x1a8] sm:$0xf0] }
 0x312   :  { %1215 = vmatpush.bf16.msrb.mxu2 %v2891_v30  ;;  %v3389_v30 = vld [vmem:[#allocation5 + $0x68] sm:$0xf0] }
 0x315   :  { %1136 = vmatpush.bf16.xpose.msra.mxu3 %v4000_v7  ;;  %v3390_v7 = vld [vmem:[#allocation5 + $0xa8] sm:$0xf0] }
 0x316   :  { %v3503_v49 = vpop.eup %3502 }
 0x317   :  { %v1075_v27 = vsel %vm1059_vm3, %v3503_v49, 0.0 }
 0x318   :  { %1076 = vadd.xlane.f32.xlu1 %v1075_v27  ;;  %v2882_v27 = vld [vmem:[#allocation5 + $0x14c] sm:$0xf] }
 0x383   :  { %v1074_v16 = vpop.xlane.xlu1 %1073 }
 0x384   :  { %3504 = vrcp.f32 %v1074_v16  ;;  %v3393_v16 = vld [vmem:[#allocation5 + $0x168] sm:$0xf0] }
 0x38a   :  { %v3505_v10 = vpop.eup %3504 }
 0x38b   :  { %v1077_v12 = vpop.xlane.xlu1 %1076  ;;  %v1080_v3 = vmul.f32 %v3505_v10, %v3501_v38  ;;  %v2886_v38 = vld [vmem:[#allocation5 + $0x18c] sm:$0xf] }
 0x38c   :  { %3506 = vrcp.f32 %v1077_v12  ;;  %v2883_v12 = vor.u32 %v3393_v16, %v2882_v27  ;;  %v2878_v10 = vld [vmem:[#allocation5 + $0x10c] sm:$0xf] }
 0x392   :  { %v3507_v2 = vpop.eup %3506 }
 0x393   :  { %v1081_v47 = vmul.f32 %v3507_v2, %v3503_v49  ;;  %v2887_v49 = vor.u32 %v3394_v52, %v2886_v38  ;;  %v3392_v2 = vld [vmem:[#allocation5 + $0x128] sm:$0xf0] }
 0x394   :  { %v2866_v38 = vld [vmem:[#allocation5 + $0x4c] sm:$0xf] }
 0x395   :  { %v1082_v42 = vpack.c.bf16 %v1081_v47, %v1080_v3  ;;  %1216 = vmatpush.bf16.msrb.mxu2 %v2887_v49  ;;  %v2879_v3 = vor.u32 %v3392_v2, %v2878_v10  ;;  %v2867_v16 = vor.u32 %v3389_v30, %v2866_v38  ;;  %v3534_v38 = vld [vmem:[%s4228_s0] sm:$0xf] }
 0x397   :  { %2857 = vmatmul.msk.bf16.vlgmr.msrb.gmra.mxu3 %vm1059_vm3, %v1082_v42  ;;  %v2874_v42 = vld [vmem:[#allocation5 + $0xcc] sm:$0xf] }
 0x399   :  { %1217 = vmatpush.bf16.msrb.mxu2 %v2883_v12 }
 0x39d   :  { %1218 = vmatpush.bf16.msrb.mxu2 %v2879_v3  ;;  %v65_v3 = vld [vmem:[%s4230_s2] sm:$0x3] }
 0x41a   :  { %v1096_v23 = vpop.f32.mrf.mxu3 }
 0x422   :  { %v1098_v4 = vpop.f32.mrf.mxu3 }
 0x423   :  { %v1101_v11 = vpack.c.bf16 %v1098_v4, %v1096_v23  ;;  %v3391_v23 = vld [vmem:[#allocation5 + $0xe8] sm:$0xf0] }
 0x424   :  { %v2875_v4 = vor.u32 %v3391_v23, %v2874_v42 }
 0x425   :  { %2858 = vmatmul.msk.bf16.vlgmr.msra.gmra.mxu3 %vm1034_vm2, %v1101_v11  ;;  %v2870_v11 = vld [vmem:[#allocation5 + $0x8c] sm:$0xf] }
 0x426   :  { %1219 = vmatpush.bf16.msrb.mxu2 %v2875_v4  ;;  %v2871_v40 = vor.u32 %v3390_v7, %v2870_v11  ;;  %v2862_v7 = vld [vmem:[#allocation5 + $0xc] sm:$0xf]  ;;  %v252_v11 = vld [vmem:[%s4235_s7 + $0x2] ss:$0 sm:$0xff] }
 0x42a   :  { %1220 = vmatpush.bf16.msrb.mxu2 %v2871_v40 }
 0x42e   :  { %1221 = vmatpush.bf16.msrb.mxu2 %v2867_v16  ;;  %v2950_v16 = vld [vmem:[#allocation5 + $0x1d0] sm:$0xf] }
 0x4a8   :  { %v1138_v47 = vpop.f32.mrf.mxu3 }
 0x4a9   :  { %v1143_v57 = vpack.c.bf16 %v1138_v47, %v1138_v47  ;;  %v3388_v47 = vld [vmem:[#allocation5 + $0x28] sm:$0xf0] }
 0x4ab   :  { %v1145_v52 = vunpack.c.l.bf16 %v1143_v57  ;;  %v2863_v57 = vor.u32 %v3388_v47, %v2862_v7 }
 0x4ad   :  { %v1147_v12 = vmul.f32 %v1145_v52, %v3890_v31  ;;  %1222 = vmatpush.bf16.msrb.mxu2 %v2863_v57 }
 0x4b0   :  { %v1140_v41 = vpop.f32.mrf.mxu3 }
 0x4b1   :  { %v1144_v49 = vpack.c.bf16 %v1140_v41, %v1140_v41 }
 0x4b3   :  { %v1146_v27 = vunpack.c.l.bf16 %v1144_v49 }
 0x4b5   :  { %v1148_v10 = vmul.f32 %v1146_v27, %v3894_v32  ;;  %v3623_v27 = vmov 128.0  }
 0x4b6   :  { %3508 = vrcp.f32 %v3623_v27  ;;  %v2942_v27 = vld [vmem:[#allocation5 + $0x190] sm:$0xf] }
 0x4b7   :  { %v1149_v2 = vpack.c.bf16 %v1148_v10, %v1147_v12  ;;  %v3411_v12 = vld [vmem:[#allocation5 + $0x1ec] sm:$0xf0]  ;;  %v3410_v10 = vld [vmem:[#allocation5 + $0x1d4] sm:$0xf] }
 0x4b9   :  { %1160 = vmatpush.bf16.msrb.mxu1 %v1149_v2  ;;  %v2951_v2 = vor.u32 %v3411_v12, %v2950_v16  ;;  %v3409_v16 = vld [vmem:[#allocation5 + $0x1ac] sm:$0xf0]  ;;  %v3408_v12 = vld [vmem:[#allocation5 + $0x194] sm:$0xf] }
 0x4bb   :  { %1347 = vmatpush.bf16.msrb.mxu0 %v2951_v2  ;;  %v2944_v2 = vld [vmem:[#allocation5 + $0x1b0] sm:$0xf0] }
 0x4bc   :  { %2859 = vmatmul.msk.bf16.vlgmr.msrb.gmra.mxu1 %vm1059_vm3, %v65_v3  ;;  %v2952_v3 = vld [vmem:[#allocation5 + $0x1f0] sm:$0xf0]  ;;  %v3509_v47 = vpop.eup %3508 }
 0x4bd   :  { %v2955_v7 = vor.u32 %v3410_v10, %v2952_v3  ;;  %v1234_v57 = vmul.f32 128.0, %v3509_v47  ;;  %vm1238_vm5 = vweird.f32 %v3509_v47  ;;  %v2943_v10 = vor.u32 %v3409_v16, %v2942_v27  ;;  %v2918_v27 = vld [vmem:[#allocation5 + $0xd0] sm:$0xf] }
 0x4be   :  { %v2947_v3 = vor.u32 %v3408_v12, %v2944_v2  ;;  %v3403_v16 = vld [vmem:[#allocation5 + $0xec] sm:$0xf0]  ;;  %v3402_v12 = vld [vmem:[#allocation5 + $0xd4] sm:$0xf] }
 0x4bf   :  { %1360 = vmatpush.bf16.msra.mxu1 %v2955_v7  ;;  %1348 = vmatpush.bf16.msrb.mxu0 %v2943_v10  ;;  %v2934_v7 = vld [vmem:[#allocation5 + $0x150] sm:$0xf]  ;;  %v2919_v10 = vor.u32 %v3403_v16, %v2918_v27  ;;  %v2920_v2 = vld [vmem:[#allocation5 + $0xf0] sm:$0xf0] }
 0x4c0   :  { %v3396_v16 = vld [vmem:[#allocation5 + $0x14] sm:$0xf] }
 0x4c3   :  { %1361 = vmatpush.bf16.msra.mxu1 %v2947_v3  ;;  %v2923_v3 = vor.u32 %v3402_v12, %v2920_v2  ;;  %v2896_v12 = vld [vmem:[#allocation5 + $0x30] sm:$0xf0] }
 0x4c4   :  { %v2899_v2 = vor.u32 %v3396_v16, %v2896_v12  ;;  %v2998_v12 = vld [vmem:[#allocation5 + $0x158] sm:$0xf] }
 0x539   :  { %v1162_v42 = vpop.f32.mrf.mxu1 }
 0x53a   :  { %v1166_v23 = vpack.c.bf16 %v1162_v42, %v1162_v42  ;;  %v1235_v42 = vsub.f32 1.0, %v1234_v57  ;;  %v3406_v57 = vld [vmem:[#allocation5 + $0x154] sm:$0xf] }
 0x53c   :  { %1223 = vmatmul.bf16.vlgmr.msrb.gmra.mxu2 %v1166_v23  ;;  %v1236_v23 = vmul.f32 %v3509_v47, %v1235_v42 }
 0x541   :  { %v1164_v4 = vpop.f32.mrf.mxu1 }
 0x542   :  { %v1237_v4 = vadd.f32 %v3509_v47, %v1236_v23 }
 0x5bf   :  { %v1224_v40 = vpop.f32.mrf.mxu2 }
 0x5c0   :  { %v1225_v41 = vadd.f32 %v1224_v40, %v252_v11  ;;  %v4017_v11 = vsel %vm1238_vm5, %v3509_v47, %v1237_v4  ;;  %v3407_v47 = vld [vmem:[#allocation5 + $0x16c] sm:$0xf0] }
 0x5c1   :  { %v2935_v42 = vor.u32 %v3407_v47, %v2934_v7  ;;  %v2926_v4 = vld [vmem:[#allocation5 + $0x110] sm:$0xf] }
 0x5c2   :  { %v1228_v30 = vadd.f32 %v3534_v38, %v1225_v41  ;;  %v2910_v7 = vld [vmem:[#allocation5 + $0x90] sm:$0xf] }
 0x5c3   :  { %1349 = vmatpush.bf16.msrb.mxu0 %v2935_v42  ;;  %v3401_v47 = vld [vmem:[#allocation5 + $0xac] sm:$0xf0] }
 0x5c4   :  { %v1230_v52 = vsel %vm1229_vm4, %v1228_v30, 0.0  ;;  %v2911_v42 = vor.u32 %v3401_v47, %v2910_v7  ;;  %v3427_v7 = vld [vmem:[#allocation5 + $0x1f4] sm:$0xf0]  ;;  %v3426_v47 = vld [vmem:[#allocation5 + $0x1dc] sm:$0xf] }
 0x5c5   :  { %1231 = vadd.xlane.f32.xlu2 %v1230_v52 }
 0x5c7   :  { %v1226_v49 = vpop.f32.mrf.mxu2 }
 0x638   :  { %v1232_v40 = vpop.xlane.xlu2 %1231 }
 0x639   :  { %v1240_v41 = vmul.f32 %v4017_v11, %v1232_v40  ;;  %v3405_v40 = vld [vmem:[#allocation5 + $0x12c] sm:$0xf0] }
 0x63b   :  { %v4020_v38 = vsub.f32 %v1228_v30, %v1240_v41  ;;  %v2936_v30 = vld [vmem:[#allocation5 + $0x170] sm:$0xf0] }
 0x63c   :  { %v2939_v23 = vor.u32 %v3406_v57, %v2936_v30  ;;  %v3404_v41 = vld [vmem:[#allocation5 + $0x114] sm:$0xf] }
 0x63d   :  { %v1242_v52 = vmul.f32 %v4020_v38, %v4020_v38  ;;  %v3400_v57 = vld [vmem:[#allocation5 + $0x94] sm:$0xf] }
 0x63e   :  { %1362 = vmatpush.bf16.msra.mxu1 %v2939_v23  ;;  %v2912_v30 = vld [vmem:[#allocation5 + $0xb0] sm:$0xf0] }
 0x63f   :  { %v1243_v49 = vsel %vm1229_vm4, %v1242_v52, 0.0  ;;  %v2927_v52 = vor.u32 %v3405_v40, %v2926_v4  ;;  %v2915_v23 = vor.u32 %v3400_v57, %v2912_v30  ;;  %v2902_v4 = vld [vmem:[#allocation5 + $0x50] sm:$0xf]  ;;  %v3016_v30 = vld [vmem:[#allocation5 + $0x1f8] sm:$0xf0] }
 0x640   :  { %1244 = vadd.xlane.f32.xlu2 %v1243_v49  ;;  %v2928_v49 = vld [vmem:[#allocation5 + $0x130] sm:$0xf0]  ;;  %v3399_v40 = vld [vmem:[#allocation5 + $0x6c] sm:$0xf0] }
 0x641   :  { %v2931_v56 = vor.u32 %v3404_v41, %v2928_v49  ;;  %1350 = vmatpush.bf16.msrb.mxu0 %v2927_v52  ;;  %v3398_v41 = vld [vmem:[#allocation5 + $0x54] sm:$0xf]  ;;  %v2894_v49 = vld [vmem:[#allocation5 + $0x10] sm:$0xf] }
 0x642   :  { %v2904_v52 = vld [vmem:[#allocation5 + $0x70] sm:$0xf0] }
 0x643   :  { %1363 = vmatpush.bf16.msra.mxu1 %v2931_v56  ;;  %v2903_v56 = vor.u32 %v3399_v40, %v2902_v4  ;;  %v2907_v27 = vor.u32 %v3398_v41, %v2904_v52  ;;  %v3019_v4 = vor.u32 %v3426_v47, %v3016_v30  ;;  %v3006_v41 = vld [vmem:[#allocation5 + $0x198] sm:$0xf] }
 0x644   :  { %v3425_v52 = vld [vmem:[#allocation5 + $0x1b4] sm:$0xf0] }
 0x645   :  { %1351 = vmatpush.bf16.msrb.mxu0 %v2919_v10  ;;  %v2895_v10 = vor.u32 %v3397_v48, %v2894_v49  ;;  %v3008_v48 = vld [vmem:[#allocation5 + $0x1b8] sm:$0xf0]  ;;  %v3007_v49 = vor.u32 %v3425_v52, %v3006_v41 }
 0x646   :  { %v3420_v52 = vld [vmem:[#allocation5 + $0x11c] sm:$0xf] }
 0x647   :  { %1364 = vmatpush.bf16.msra.mxu1 %v2923_v3  ;;  %v3014_v3 = vld [vmem:[#allocation5 + $0x1d8] sm:$0xf] }
 0x649   :  { %1352 = vmatpush.bf16.msrb.mxu0 %v2911_v42  ;;  %v3015_v42 = vor.u32 %v3427_v7, %v3014_v3  ;;  %v3422_v3 = vld [vmem:[#allocation5 + $0x15c] sm:$0xf] }
 0x64a   :  { %v3000_v7 = vld [vmem:[#allocation5 + $0x178] sm:$0xf0] }
 0x64b   :  { %1365 = vmatpush.bf16.msra.mxu1 %v2915_v23  ;;  %1473 = vmatpush.bf16.xpose.msra.mxu2 %v3015_v42  ;;  %v3003_v42 = vor.u32 %v3422_v3, %v3000_v7 }
 0x64d   :  { %1353 = vmatpush.bf16.msrb.mxu0 %v2903_v56  ;;  %v3424_v56 = vld [vmem:[#allocation5 + $0x19c] sm:$0xf] }
 0x64f   :  { %1366 = vmatpush.bf16.msra.mxu1 %v2907_v27  ;;  %v3011_v27 = vor.u32 %v3424_v56, %v3008_v48  ;;  %v2992_v56 = vld [vmem:[#allocation5 + $0x138] sm:$0xf0] }
 0x651   :  { %1354 = vmatpush.bf16.msrb.mxu0 %v2895_v10  ;;  %v3423_v10 = vld [vmem:[#allocation5 + $0x174] sm:$0xf0] }
 0x652   :  { %v2999_v47 = vor.u32 %v3423_v10, %v2998_v12  ;;  %v2995_v10 = vor.u32 %v3420_v52, %v2992_v56  ;;  %v2976_v52 = vld [vmem:[#allocation5 + $0xb8] sm:$0xf0] }
 0x653   :  { %1367 = vmatpush.bf16.msra.mxu1 %v2899_v2  ;;  %1474 = vmatpush.bf16.xpose.msra.mxu2 %v3007_v49  ;;  %v253_v49 = vld [vmem:[%s4235_s7 + $0x3] ss:$0 sm:$0xff] }
 0x655   :  { %1486 = vmatpush.bf16.xpose.msra.mxu0 %v3019_v4  ;;  %v2990_v4 = vld [vmem:[#allocation5 + $0x118] sm:$0xf] }
 0x65b   :  { %1475 = vmatpush.bf16.xpose.msra.mxu2 %v2999_v47  ;;  %v2984_v47 = vld [vmem:[#allocation5 + $0xf8] sm:$0xf0] }
 0x65d   :  { %1487 = vmatpush.bf16.xpose.msra.mxu0 %v3011_v27  ;;  %v2991_v27 = vor.u32 %v3421_v15, %v2990_v4  ;;  %v3416_v4 = vld [vmem:[#allocation5 + $0x9c] sm:$0xf] }
 0x65e   :  { %v2979_v56 = vor.u32 %v3416_v4, %v2976_v52 }
 0x663   :  { %1476 = vmatpush.bf16.xpose.msra.mxu2 %v2991_v27  ;;  %v3414_v27 = vld [vmem:[#allocation5 + $0x5c] sm:$0xf] }
 0x665   :  { %1488 = vmatpush.bf16.xpose.msra.mxu0 %v3003_v42 }
 0x66d   :  { %1489 = vmatpush.bf16.xpose.msra.mxu0 %v2995_v10  ;;  %v2968_v10 = vld [vmem:[#allocation5 + $0x78] sm:$0xf0] }
 0x6b3   :  { %v1245_v57 = vpop.xlane.xlu2 %1244 }
 0x6b4   :  { %v1246_v23 = vmul.f32 %v1245_v57, %v4017_v11 }
 0x6b6   :  { %v1247_v40 = vadd.f32 1e-05, %v1246_v23 }
 0x6b8   :  { %3510 = vrsqrt.f32 %v1247_v40  ;;  %vm1254_vm7 = vweird.f32 %v1247_v40 }
 0x6be   :  { %v3511_v16 = vpop.eup %3510 }
 0x6bf   :  { %v1249_v2 = vmul.f32 %v3511_v16, %v1247_v40  ;;  %vm1255_vm6 = vweird.f32 %v3511_v16  ;;  %v2982_v40 = vld [vmem:[#allocation5 + $0xd8] sm:$0xf] }
 0x6c0   :  { %vm1256_vm8 = vmor %vm1254_vm7, %vm1255_vm6 }
 0x6c1   :  { %v1250_v57 = vmul.f32 %v3511_v16, %v1249_v2  ;;  %v254_v2 = vld [vmem:[%s4235_s7 + $0x4] ss:$0 sm:$0xff] }
 0x6c3   :  { %v1251_v30 = vmul.f32 0.5, %v1250_v57  ;;  %v3419_v57 = vld [vmem:[#allocation5 + $0xf4] sm:$0xf0] }
 0x6c4   :  { %v2983_v15 = vor.u32 %v3419_v57, %v2982_v40  ;;  %v3413_v40 = vld [vmem:[#allocation5 + $0x34] sm:$0xf0]  ;;  %v3412_v57 = vld [vmem:[#allocation5 + $0x1c] sm:$0xf] }
 0x6c5   :  { %v1252_v23 = vsub.f32 1.5, %v1251_v30  ;;  %v2974_v30 = vld [vmem:[#allocation5 + $0x98] sm:$0xf] }
 0x6c6   :  { %1477 = vmatpush.bf16.xpose.msra.mxu2 %v2983_v15  ;;  %v2464_v15 = vld [vmem:[%s4235_s7 + $0x1] ss:$8 sm:$0x3] }
 0x6c7   :  { %v1253_v41 = vmul.f32 %v3511_v16, %v1252_v23  ;;  %v3417_v23 = vld [vmem:[#allocation5 + $0xb4] sm:$0xf0] }
 0x6c9   :  { %v1257_v48 = vsel %vm1256_vm8, %v3511_v16, %v1253_v41  ;;  %v3418_v16 = vld [vmem:[#allocation5 + $0xdc] sm:$0xf]  ;;  %v2975_v41 = vor.u32 %v3417_v23, %v2974_v30  ;;  %v1264_v30 = vperm.slane %v2464_v15, 1 }
 0x6ca   :  { %v1258_v12 = vmul.f32 %v1257_v48, %v4020_v38  ;;  %v2987_v38 = vor.u32 %v3418_v16, %v2984_v47  ;;  %v2966_v48 = vld [vmem:[#allocation5 + $0x58] sm:$0xf]  ;;  %v2960_v16 = vld [vmem:[#allocation5 + $0x38] sm:$0xf0] }
 0x6cc   :  { %v1259_v3 = vmul.f32 %v1258_v12, %v253_v49  ;;  %1490 = vmatpush.bf16.xpose.msra.mxu0 %v2987_v38  ;;  %v3415_v49 = vld [vmem:[#allocation5 + $0x74] sm:$0xf0]  ;;  %v1263_v38 = vperm.slane %v2464_v15, 0 }
 0x6cd   :  { %v2967_v12 = vor.u32 %v3415_v49, %v2966_v48 }
 0x6ce   :  { %v4033_v7 = vadd.f32 %v1259_v3, %v254_v2  ;;  %1478 = vmatpush.bf16.xpose.msra.mxu2 %v2975_v41  ;;  %v2971_v2 = vor.u32 %v3414_v27, %v2968_v10  ;;  %v2958_v3 = vld [vmem:[#allocation5 + $0x18] sm:$0xf] }
 0x6cf   :  { %v2959_v47 = vor.u32 %v3413_v40, %v2958_v3 }
 0x6d0   :  { %v1261_v42 = vpack.c.bf16 %v4033_v7, %v4033_v7 }
 0x6d2   :  { %1355 = vmatmul.bf16.vlgmr.msrb.gmra.mxu0 %v1261_v42  ;;  %1368 = vmatmul.bf16.vlgmr.msra.gmra.mxu1 %v1261_v42  ;;  %v2963_v42 = vor.u32 %v3412_v57, %v2960_v16 }
 0x6d4   :  { %1491 = vmatpush.bf16.xpose.msra.mxu0 %v2979_v56 }
 0x6d6   :  { %1479 = vmatpush.bf16.xpose.msra.mxu2 %v2967_v12 }
 0x6dc   :  { %1492 = vmatpush.bf16.xpose.msra.mxu0 %v2971_v2 }
 0x6de   :  { %1480 = vmatpush.bf16.xpose.msra.mxu2 %v2959_v47 }
 0x6e4   :  { %1493 = vmatpush.bf16.xpose.msra.mxu0 %v2963_v42 }
 0x6ec   :  { %1863 = vmatpush.bf16.msrb.mxu0 %v3687_v24 }
 0x6f0   :  { %1864 = vmatpush.bf16.msrb.mxu0 %v3690_v28 }
 0x6f4   :  { %1865 = vmatpush.bf16.msrb.mxu0 %v3696_v36 }
 0x6f8   :  { %1866 = vmatpush.bf16.msrb.mxu0 %v3700_v44 }
 0x6fc   :  { %1867 = vmatpush.bf16.msrb.mxu0 %v3709_v51 }
 0x700   :  { %1868 = vmatpush.bf16.msrb.mxu0 %v3716_v60 }
 0x704   :  { %1869 = vmatpush.bf16.msrb.mxu0 %v3727_v5  ;;  %v255_v5 = vld [vmem:[%s4235_s7 + $0x5] ss:$0 sm:$0xff] }
 0x708   :  { %1870 = vmatpush.bf16.msrb.mxu0 %v3734_v14 }
 0x74f   :  { %v1356_v23 = vpop.f32.mrf.mxu0  ;;  %v1369_v4 = vpop.f32.mrf.mxu1 }
 0x750   :  { %v1357_v41 = vadd.f32 %v1356_v23, %v1263_v38  ;;  %v1370_v52 = vadd.f32 %v1369_v4, %v1264_v30 }
 0x752   :  { %v1375_v56 = vmul.f32 0.044715, %v1357_v41  ;;  %v1376_v48 = vmul.f32 0.044715, %v1370_v52  ;;  %v1373_v16 = vmul.f32 0.5, %v1357_v41  ;;  %v1374_v47 = vmul.f32 0.5, %v1370_v52 }
 0x754   :  { %v1377_v49 = vmul.f32 %v1375_v56, %v1357_v41  ;;  %v1378_v24 = vmul.f32 %v1376_v48, %v1370_v52  ;;  %v3449_v56 = vld [vmem:[#allocation5 + $0x3c4] sm:$0xf] }
 0x756   :  { %v1379_v27 = vmul.f32 %v1377_v49, %v1357_v41  ;;  %v1380_v12 = vmul.f32 %v1378_v24, %v1370_v52  ;;  %v3116_v49 = vld [vmem:[#allocation5 + $0x3e0] sm:$0xf0]  ;;  %v3090_v24 = vld [vmem:[#allocation5 + $0x340] sm:$0xf] }
 0x757   :  { %v1358_v10 = vpop.f32.mrf.mxu0  ;;  %v1371_v28 = vpop.f32.mrf.mxu1 }
 0x758   :  { %v1381_v2 = vadd.f32 %v1379_v27, %v1357_v41  ;;  %v1382_v3 = vadd.f32 %v1380_v12, %v1370_v52  ;;  %v3450_v41 = vld [vmem:[#allocation5 + $0x3dc] sm:$0xf0]  ;;  %v3119_v12 = vor.u32 %v3449_v56, %v3116_v49  ;;  %v3068_v56 = vld [vmem:[#allocation5 + $0x2e0] sm:$0xf0] }
 0x759   :  { %v3444_v27 = vld [vmem:[#allocation5 + $0x35c] sm:$0xf0] }
 0x75a   :  { %v1383_v36 = vmul.f32 0.7978846, %v1381_v2  ;;  %v1384_v40 = vmul.f32 0.7978846, %v1382_v3  ;;  %1764 = vmatpush.bf16.msrb.mxu3 %v3119_v12  ;;  %v3091_v10 = vor.u32 %v3444_v27, %v3090_v24  ;;  %v3441_v28 = vld [vmem:[#allocation5 + $0x31c] sm:$0xf0] }
 0x75b   :  { %v3451_v24 = vld [vmem:[#allocation5 + $0x3e4] sm:$0xf0]  ;;  %v3434_v12 = vld [vmem:[#allocation5 + $0x284] sm:$0xf] }
 0x75c   :  { %3512 = vtanh.f32 %v1383_v36 }
 0x75d   :  { %3514 = vtanh.f32 %v1384_v40 }
 0x762   :  { %v3513_v44 = vpop.eup %3512 }
 0x763   :  { %v3515_v57 = vpop.eup %3514  ;;  %v1387_v51 = vadd.f32 1.0, %v3513_v44 }
 0x764   :  { %v1388_v42 = vadd.f32 1.0, %v3515_v57 }
 0x765   :  { %v1389_v15 = vmul.f32 %v1387_v51, %v1373_v16  ;;  %v3066_v16 = vld [vmem:[#allocation5 + $0x2c0] sm:$0xf] }
 0x766   :  { %v1390_v38 = vmul.f32 %v1388_v42, %v1374_v47  ;;  %v3438_v51 = vld [vmem:[#allocation5 + $0x2dc] sm:$0xf0]  ;;  %v3446_v42 = vld [vmem:[#allocation5 + $0x384] sm:$0xf] }
 0x767   :  { %v1391_v30 = vpack.c.bf16 %v1389_v15, %v1389_v15  ;;  %v3067_v47 = vor.u32 %v3438_v51, %v3066_v16  ;;  %v3104_v15 = vld [vmem:[#allocation5 + $0x3a0] sm:$0xf0]  ;;  %v3445_v51 = vld [vmem:[#allocation5 + $0x364] sm:$0xf0] }
 0x768   :  { %v1392_v23 = vpack.c.bf16 %v1390_v38, %v1390_v38  ;;  %v3107_v38 = vor.u32 %v3446_v42, %v3104_v15  ;;  %v3032_v42 = vld [vmem:[#allocation5 + $0x220] sm:$0xf0] }
 0x769   :  { %1481 = vmatmul.bf16.vlgmr.msra.gmra.mxu2 %v1391_v30  ;;  %v3054_v30 = vld [vmem:[#allocation5 + $0x280] sm:$0xf] }
 0x76a   :  { %1494 = vmatmul.bf16.vlgmr.msra.gmra.mxu0 %v1392_v23  ;;  %1765 = vmatpush.bf16.msrb.mxu3 %v3107_v38  ;;  %v3435_v23 = vld [vmem:[#allocation5 + $0x29c] sm:$0xf0]  ;;  %v3086_v38 = vld [vmem:[#allocation5 + $0x308] sm:$0xf] }
 0x76b   :  { %1919 = vmatpush.bf16.msra.mxu0 %v3745_v29 }
 0x76f   :  { %1920 = vmatpush.bf16.msra.mxu0 %v3757_v45 }
 0x773   :  { %1921 = vmatpush.bf16.msra.mxu0 %v3769_v58 }
 0x777   :  { %1922 = vmatpush.bf16.msra.mxu0 %v3782_v13 }
 0x77b   :  { %1923 = vmatpush.bf16.msra.mxu0 %v3795_v35 }
 0x77f   :  { %1924 = vmatpush.bf16.msra.mxu0 %v3807_v61  ;;  %v3114_v61 = vld [vmem:[#allocation5 + $0x3c0] sm:$0xf] }
 0x780   :  { %v3115_v52 = vor.u32 %v3450_v41, %v3114_v61  ;;  %v3030_v41 = vld [vmem:[#allocation5 + $0x200] sm:$0xf] }
 0x782   :  { %1751 = vmatpush.bf16.msrb.mxu1 %v3115_v52 }
 0x783   :  { %1925 = vmatpush.bf16.msra.mxu0 %v3819_v25  ;;  %v3102_v25 = vld [vmem:[#allocation5 + $0x380] sm:$0xf] }
 0x787   :  { %1926 = vmatpush.bf16.msra.mxu0 %v3833_v53  ;;  %v3447_v53 = vld [vmem:[#allocation5 + $0x39c] sm:$0xf0] }
 0x788   :  { %v3103_v48 = vor.u32 %v3447_v53, %v3102_v25  ;;  %v3429_v25 = vld [vmem:[#allocation5 + $0x21c] sm:$0xf0]  ;;  %v3437_v53 = vld [vmem:[#allocation5 + $0x2c4] sm:$0xf] }
 0x789   :  { %v3031_v52 = vor.u32 %v3429_v25, %v3030_v41  ;;  %v3071_v49 = vor.u32 %v3437_v53, %v3068_v56  ;;  %v3050_v41 = vld [vmem:[#allocation5 + $0x248] sm:$0xf] }
 0x78a   :  { %1752 = vmatpush.bf16.msrb.mxu1 %v3103_v48  ;;  %v3122_v48 = vld [vmem:[#allocation5 + $0x3c8] sm:$0xf] }
 0x78b   :  { %v3123_v27 = vor.u32 %v3451_v24, %v3122_v48  ;;  %v3433_v25 = vld [vmem:[#allocation5 + $0x264] sm:$0xf0] }
 0x78c   :  { %v3038_v53 = vld [vmem:[#allocation5 + $0x208] sm:$0xf] }
 0x78d   :  { %v3430_v56 = vld [vmem:[#allocation5 + $0x224] sm:$0xf0] }
 0x78e   :  { %1753 = vmatpush.bf16.msrb.mxu1 %v3091_v10  ;;  %v3056_v10 = vld [vmem:[#allocation5 + $0x2a0] sm:$0xf0]  ;;  %v3039_v48 = vor.u32 %v3430_v56, %v3038_v53 }
 0x78f   :  { %v4351_v53 = vld [vmem:[#allocation27_spill] sm:$0xff] }
 0x790   :  { %v4352_v56 = vld [vmem:[#allocation39_spill] sm:$0xff] }
 0x7e7   :  { %v1495_v60 = vpop.f32.mrf.mxu0 }
 0x7ec   :  { %v1482_v14 = vpop.f32.mrf.mxu2 }
 0x7ed   :  { %v1483_v29 = vadd.f32 %v1482_v14, %v255_v5  ;;  %v3443_v5 = vld [vmem:[#allocation5 + $0x344] sm:$0xf] }
 0x7ee   :  { %v3092_v14 = vld [vmem:[#allocation5 + $0x360] sm:$0xf0] }
 0x7ef   :  { %v1496_v45 = vadd.f32 %v1495_v60, %v1483_v29  ;;  %v1497_v4 = vpop.f32.mrf.mxu0  ;;  %v3055_v60 = vor.u32 %v3435_v23, %v3054_v30  ;;  %v3095_v29 = vor.u32 %v3443_v5, %v3092_v14  ;;  %v3442_v30 = vld [vmem:[#allocation5 + $0x324] sm:$0xf0] }
 0x7f0   :  { %v3432_v4 = vld [vmem:[#allocation5 + $0x25c] sm:$0xf0]  ;;  %v3074_v5 = vld [vmem:[#allocation5 + $0x2c8] sm:$0xf] }
 0x7f1   :  { %v1499_v58 = vadd.f32 %v1496_v45, %v4033_v7  ;;  %v3078_v7 = vld [vmem:[#allocation5 + $0x300] sm:$0xf]  ;;  %1766 = vmatpush.bf16.msrb.mxu3 %v3095_v29  ;;  %v3439_v14 = vld [vmem:[#allocation5 + $0x2e4] sm:$0xf0] }
 0x7f2   :  { %v3079_v2 = vor.u32 %v3441_v28, %v3078_v7  ;;  %v3042_v45 = vld [vmem:[#allocation5 + $0x240] sm:$0xf]  ;;  %v3110_v7 = vld [vmem:[#allocation5 + $0x388] sm:$0xf]  ;;  %v3059_v28 = vor.u32 %v3434_v12, %v3056_v10  ;;  %v3075_v29 = vor.u32 %v3439_v14, %v3074_v5  ;;  %v4340_v14 = vld [vmem:[#allocation16_spill] sm:$0xff] }
 0x7f3   :  { %v1500_v13 = vsel %vm1229_vm4, %v1499_v58, 0.0  ;;  %v4338_v5 = vld [vmem:[#allocation15_spill] sm:$0xff] }
 0x7f4   :  { %v1484_v35 = vpop.f32.mrf.mxu2  ;;  %1501 = vadd.xlane.f32.xlu0 %v1500_v13  ;;  %1754 = vmatpush.bf16.msrb.mxu1 %v3079_v2  ;;  %v3440_v13 = vld [vmem:[#allocation5 + $0x304] sm:$0xf]  ;;  %v3448_v2 = vld [vmem:[#allocation5 + $0x3a4] sm:$0xf0] }
 0x7f5   :  { %v3080_v35 = vld [vmem:[#allocation5 + $0x320] sm:$0xf0] }
 0x7f6   :  { %v3083_v61 = vor.u32 %v3440_v13, %v3080_v35 }
 0x7f8   :  { %1755 = vmatpush.bf16.msrb.mxu1 %v3067_v47  ;;  %1767 = vmatpush.bf16.msrb.mxu3 %v3083_v61  ;;  %v3428_v47 = vld [vmem:[#allocation5 + $0x204] sm:$0xf] }
 0x7f9   :  { %v3035_v23 = vor.u32 %v3428_v47, %v3032_v42 }
 0x7fc   :  { %1756 = vmatpush.bf16.msrb.mxu1 %v3055_v60  ;;  %1768 = vmatpush.bf16.msrb.mxu3 %v3071_v49  ;;  %v3087_v60 = vor.u32 %v3442_v30, %v3086_v38  ;;  %v4331_v38 = vld [vmem:[#allocation12_spill] sm:$0xff]  ;;  %v4333_v30 = vld [vmem:[#allocation13_spill] sm:$0xff] }
 0x800   :  { %1769 = vmatpush.bf16.msrb.mxu3 %v3059_v28 }
 0x867   :  { %v1502_v3 = vpop.xlane.xlu0 %1501 }
 0x868   :  { %v1503_v36 = vmul.f32 %v1502_v3, %v4017_v11  ;;  %v3111_v3 = vor.u32 %v3448_v2, %v3110_v7  ;;  %v256_v2 = vld [vmem:[%s4235_s7 + $0x6] ss:$0 sm:$0xff] }
 0x86a   :  { %v4062_v40 = vsub.f32 %v1499_v58, %v1503_v36  ;;  %v3043_v58 = vor.u32 %v3432_v4, %v3042_v45  ;;  %v3431_v36 = vld [vmem:[#allocation5 + $0x244] sm:$0xf]  ;;  %v3062_v45 = vld [vmem:[#allocation5 + $0x288] sm:$0xf] }
 0x86b   :  { %v3436_v4 = vld [vmem:[#allocation5 + $0x2a4] sm:$0xf0] }
 0x86c   :  { %v1505_v44 = vmul.f32 %v4062_v40, %v4062_v40  ;;  %1757 = vmatpush.bf16.msrb.mxu1 %v3043_v58  ;;  %v3063_v35 = vor.u32 %v3436_v4, %v3062_v45  ;;  %v4342_v45 = vld [vmem:[#allocation17_spill] sm:$0xff]  ;;  %v4343_v4 = vld [vmem:[#allocation18_spill] sm:$0xff] }
 0x86e   :  { %v1506_v57 = vsel %vm1229_vm4, %v1505_v44, 0.0  ;;  %v3044_v44 = vld [vmem:[#allocation5 + $0x260] sm:$0xf0] }
 0x86f   :  { %1507 = vadd.xlane.f32.xlu1 %v1506_v57  ;;  %v3098_v57 = vld [vmem:[#allocation5 + $0x348] sm:$0xf]  ;;  %v3047_v16 = vor.u32 %v3431_v36, %v3044_v44  ;;  %v257_v36 = vld [vmem:[%s4235_s7 + $0x7] ss:$0 sm:$0xff] }
 0x870   :  { %1758 = vmatpush.bf16.msrb.mxu1 %v3031_v52  ;;  %v3099_v15 = vor.u32 %v3445_v51, %v3098_v57  ;;  %v3051_v52 = vor.u32 %v3433_v25, %v3050_v41  ;;  %v4348_v41 = vld [vmem:[#allocation35_spill] sm:$0xff]  ;;  %v4349_v25 = vld [vmem:[#allocation24_spill] sm:$0xff] }
 0x871   :  { %1770 = vmatpush.bf16.msrb.mxu3 %v3047_v16 }
 0x874   :  { %1777 = vmatpush.bf16.msra.mxu1 %v3123_v27 }
 0x875   :  { %1771 = vmatpush.bf16.msrb.mxu3 %v3035_v23  ;;  %v4334_v23 = vld [vmem:[#allocation23_spill] sm:$0xff] }
 0x878   :  { %1778 = vmatpush.bf16.msra.mxu1 %v3111_v3 }
 0x87c   :  { %1779 = vmatpush.bf16.msra.mxu1 %v3099_v15  ;;  %v4330_v15 = vld [vmem:[#allocation19_spill] sm:$0xff] }
 0x880   :  { %1780 = vmatpush.bf16.msra.mxu1 %v3087_v60  ;;  %v4337_v60 = vld [vmem:[#allocation26_spill] sm:$0xff] }
 0x884   :  { %1781 = vmatpush.bf16.msra.mxu1 %v3075_v29  ;;  %v4341_v29 = vld [vmem:[#allocation30_spill] sm:$0xff] }
 0x888   :  { %1782 = vmatpush.bf16.msra.mxu1 %v3063_v35  ;;  %v4346_v35 = vld [vmem:[#allocation34_spill] sm:$0xff] }
 0x88c   :  { %1783 = vmatpush.bf16.msra.mxu1 %v3051_v52  ;;  %v4350_v52 = vld [vmem:[#allocation38_spill] sm:$0xff] }
 0x890   :  { %1784 = vmatpush.bf16.msra.mxu1 %v3039_v48  ;;  %v4353_v48 = vld [vmem:[#allocation29_spill] sm:$0xff] }
 0x8e2   :  { %v1508_v58 = vpop.xlane.xlu1 %1507 }
 0x8e3   :  { %v1509_v13 = vmul.f32 %v1508_v58, %v4017_v11  ;;  %v4344_v58 = vld [vmem:[#allocation32_spill] sm:$0xff] }
 0x8e5   :  { %v1510_v61 = vadd.f32 1e-05, %v1509_v13  ;;  %v4345_v13 = vld [vmem:[#allocation20_spill] sm:$0xff] }
 0x8e7   :  { %3516 = vrsqrt.f32 %v1510_v61  ;;  %vm1517_vm10 = vweird.f32 %v1510_v61 }
 0x8ed   :  { %v3517_v49 = vpop.eup %3516 }
 0x8ee   :  { %v1512_v24 = vmul.f32 %v3517_v49, %v1510_v61  ;;  %vm1518_vm9 = vweird.f32 %v3517_v49  ;;  %v4347_v61 = vld [vmem:[#allocation22_spill] sm:$0xff] }
 0x8ef   :  { %vm1519_vm11 = vmor %vm1517_vm10, %vm1518_vm9 }
 0x8f0   :  { %v1513_v27 = vmul.f32 %v3517_v49, %v1512_v24  ;;  %v4355_v24 = vld [vmem:[#allocation33_spill] sm:$0xff] }
 0x8f2   :  { %v1514_v12 = vmul.f32 0.5, %v1513_v27 }
 0x8f4   :  { %v1515_v10 = vsub.f32 1.5, %v1514_v12 }
 0x8f6   :  { %v1516_v7 = vmul.f32 %v3517_v49, %v1515_v10 }
 0x8f8   :  { %v1520_v28 = vsel %vm1519_vm11, %v3517_v49, %v1516_v7  ;;  %v4354_v49 = vld [vmem:[#allocation31_spill] sm:$0xff] }
 0x8f9   :  { %v1521_v3 = vmul.f32 %v1520_v28, %v4062_v40 }
 0x8fb   :  { %v1522_v44 = vmul.f32 %v1521_v3, %v256_v2 }
 0x8fd   :  { %v4075_v57 = vadd.f32 %v1522_v44, %v257_v36 }
 0x8ff   :  { %v1615_v16 = vpack.c.bf16 %v4075_v57, %v4075_v57 }
 0x901   :  { %1759 = vmatmul.bf16.vlgmr.msrb.gmra.mxu1 %v1615_v16  ;;  %1772 = vmatmul.bf16.vlgmr.msrb.gmra.mxu3 %v1615_v16 }
 0x902   :  { %1877 = vmatpush.bf16.msrb.mxu1 %v3692_v33  ;;  %v3020_v33 = vld [vmem:[%s4235_s7 + $0x18] ss:$8 sm:$0x7] }
 0x906   :  { %1878 = vmatpush.bf16.msrb.mxu1 %v3711_v55  ;;  %v1617_v55 = vperm.slane %v3020_v33, 0 }
 0x90a   :  { %1879 = vmatpush.bf16.msrb.mxu1 %v3720_v0 }
 0x90e   :  { %1880 = vmatpush.bf16.msrb.mxu1 %v3729_v9 }
 0x911   :  { %1785 = vmatmul.bf16.vlgmr.msra.gmra.mxu1 %v1615_v16 }
 0x912   :  { %1881 = vmatpush.bf16.msrb.mxu1 %v3738_v18 }
 0x916   :  { %1882 = vmatpush.bf16.msrb.mxu1 %v3752_v39  ;;  %v1618_v39 = vperm.slane %v3020_v33, 1 }
 0x91a   :  { %1883 = vmatpush.bf16.msrb.mxu1 %v3764_v54 }
 0x91e   :  { %1884 = vmatpush.bf16.msrb.mxu1 %v3775_v63 }
 0x922   :  { %1933 = vmatpush.bf16.msra.mxu1 %v3786_v20 }
 0x926   :  { %1934 = vmatpush.bf16.msra.mxu1 %v3797_v37 }
 0x92a   :  { %1935 = vmatpush.bf16.msra.mxu1 %v3809_v62 }
 0x92e   :  { %1936 = vmatpush.bf16.msra.mxu1 %v3821_v26 }
 0x932   :  { %1937 = vmatpush.bf16.msra.mxu1 %v3835_v8  ;;  %v1619_v8 = vperm.slane %v3020_v33, 2 }
 0x936   :  { %1938 = vmatpush.bf16.msra.mxu1 %v3846_v43 }
 0x93a   :  { %1939 = vmatpush.bf16.msra.mxu1 %v3855_v22 }
 0x93e   :  { %1940 = vmatpush.bf16.msra.mxu1 %v3864_v21  ;;  %v3535_v21 = vld [vmem:[%s4229_s1] sm:$0xff] }
 0x97e   :  { %v1760_v0 = vpop.f32.mrf.mxu1 }
 0x97f   :  { %v1761_v9 = vadd.f32 %v1760_v0, %v1617_v55  ;;  %v4356_v0 = vld [vmem:[#allocation36_spill] sm:$0xff] }
 0x981   :  { %v1790_v18 = vpack.c.bf16 %v1761_v9, %v1761_v9  ;;  %v4357_v9 = vunpack.c.h.bf16 %v4356_v0 }
 0x983   :  { %v1794_v54 = vsel %vm445_vm0, %v1790_v18, 0 }
 0x984   :  { %v1773_v63 = vpop.f32.mrf.mxu3  ;;  %1809 = vmatpush.bf16.msra.mxu3 %v1794_v54  ;;  %v4358_v54 = vld [vmem:[#allocation37_spill] sm:$0xff] }
 0x985   :  { %v1774_v20 = vadd.f32 %v1773_v63, %v1618_v39  ;;  %v4359_v63 = vunpack.c.h.bf16 %v4358_v54 }
 0x986   :  { %v1762_v37 = vpop.f32.mrf.mxu1 }
 0x987   :  { %v1791_v62 = vpack.c.bf16 %v1774_v20, %v1774_v20  ;;  %3124 = vmatmul.msk.bf16.vlgmr.msra.gmra.mxu3 %vm441_vm1, %v3535_v21 }
 0x989   :  { %v1797_v26 = vsel %vm445_vm0, %v1791_v62, 0 }
 0x98a   :  { %1823 = vmatpush.bf16.msrb.mxu2 %v1797_v26 }
 0x98c   :  { %v1775_v22 = vpop.f32.mrf.mxu3 }
 0x98d   :  { %3125 = vmatmul.msk.bf16.vlgmr.msrb.gmra.mxu2 %vm441_vm1, %v3535_v21  ;;  %v4360_v22 = vld [vmem:[#allocation40_spill] sm:$0xff] }
 0x98e   :  { %1891 = vmatpush.bf16.msra.mxu2 %v3740_v19  ;;  %v1786_v43 = vpop.f32.mrf.mxu1  ;;  %v4329_v19 = vld [vmem:[#allocation11_spill] sm:$0xff] }
 0x98f   :  { %v1787_v40 = vadd.f32 %v1786_v43, %v1619_v8 }
 0x991   :  { %v1792_v51 = vpack.c.bf16 %v1787_v40, %v1787_v40  ;;  %v4361_v40 = vld [vmem:[#allocation42_spill] sm:$0xff] }
 0x992   :  { %1892 = vmatpush.bf16.msra.mxu2 %v3748_v34  ;;  %v4332_v34 = vld [vmem:[#allocation21_spill] sm:$0xff] }
 0x993   :  { %v1800_v47 = vsel %vm445_vm0, %v1792_v51, 0  ;;  %v4362_v51 = vunpack.c.l.bf16 %v4361_v40 }
 0x994   :  { %1837 = vmatpush.bf16.msrb.mxu3 %v1800_v47 }
 0x996   :  { %1893 = vmatpush.bf16.msra.mxu2 %v3760_v50  ;;  %v1788_v42 = vpop.f32.mrf.mxu1  ;;  %v4335_v50 = vld [vmem:[#allocation14_spill] sm:$0xff] }
 0x997   :  { %3126 = vmatmul.msk.bf16.vlgmr.msrb.gmra.mxu3 %vm441_vm1, %v3535_v21 }
 0x998   :  { %1905 = vmatpush.bf16.msra.mxu3 %v3703_v46  ;;  %v4336_v46 = vld [vmem:[#allocation25_spill] sm:$0xff] }
 0x99a   :  { %1894 = vmatpush.bf16.msra.mxu2 %v3777_v6  ;;  %v4339_v6 = vld [vmem:[#allocation28_spill] sm:$0xff] }
 0x99c   :  { %1906 = vmatpush.bf16.msra.mxu3 %v4329_v19  ;;  %v4363_v19 = vld [vmem:[#allocation41_spill] sm:$0xff] }
 0x99e   :  { %1895 = vmatpush.bf16.msra.mxu2 %v4330_v15  ;;  %v4364_v15 = vld [vmem:[#allocation43_spill] sm:$0xff] }
 0x9a0   :  { %1907 = vmatpush.bf16.msra.mxu3 %v4331_v38  ;;  %v4365_v38 = vunpack.c.l.bf16 %v4364_v15 }
 0x9a2   :  { %1896 = vmatpush.bf16.msra.mxu2 %v4332_v34 }
 0x9a4   :  { %1908 = vmatpush.bf16.msra.mxu3 %v4333_v30 }
 0x9a6   :  { %1897 = vmatpush.bf16.msra.mxu2 %v4334_v23  ;;  %v4366_v23 = vld [vmem:[#allocation44_spill] sm:$0xff] }
 0x9a8   :  { %1909 = vmatpush.bf16.msra.mxu3 %v4335_v50  ;;  %v4367_v50 = vld [vmem:[#allocation45_spill] sm:$0xff] }
 0x9aa   :  { %1898 = vmatpush.bf16.msra.mxu2 %v4336_v46  ;;  %v4369_v46 = vld [vmem:[#allocation47_spill] sm:$0xff] }
 0x9ac   :  { %1910 = vmatpush.bf16.msra.mxu3 %v4338_v5  ;;  %v4371_v5 = vld [vmem:[#allocation50_spill] sm:$0xff] }
 0x9ae   :  { %1947 = vmatpush.bf16.msrb.mxu2 %v4337_v60  ;;  %v4370_v60 = vld [vmem:[#allocation48_spill] sm:$0xff] }
 0x9b0   :  { %1911 = vmatpush.bf16.msra.mxu3 %v4340_v14  ;;  %v4374_v14 = vld [vmem:[#allocation52_spill] sm:$0xff] }
 0x9b2   :  { %1948 = vmatpush.bf16.msrb.mxu2 %v4339_v6  ;;  %v4372_v6 = vld [vmem:[#allocation49_spill] sm:$0xff] }
 0x9b4   :  { %1912 = vmatpush.bf16.msra.mxu3 %v4342_v45  ;;  %v4376_v45 = vld [vmem:[#allocation54_spill] sm:$0xff] }
 0x9b6   :  { %1949 = vmatpush.bf16.msrb.mxu2 %v4341_v29  ;;  %v4375_v29 = vld [vmem:[#allocation53_spill] sm:$0xff] }
 0x9b8   :  { %1961 = vmatpush.bf16.msrb.mxu3 %v4343_v4 }
 0x9ba   :  { %1950 = vmatpush.bf16.msrb.mxu2 %v4344_v58 }
 0x9bc   :  { %1962 = vmatpush.bf16.msrb.mxu3 %v4345_v13 }
 0x9be   :  { %1951 = vmatpush.bf16.msrb.mxu2 %v4346_v35 }
 0x9c0   :  { %1963 = vmatpush.bf16.msrb.mxu3 %v4347_v61 }
 0x9c2   :  { %1952 = vmatpush.bf16.msrb.mxu2 %v4348_v41 }
 0x9c4   :  { %1964 = vmatpush.bf16.msrb.mxu3 %v4349_v25 }
 0x9c6   :  { %1953 = vmatpush.bf16.msrb.mxu2 %v4350_v52 }
 0x9c8   :  { %1965 = vmatpush.bf16.msrb.mxu3 %v4351_v53 }
 0x9ca   :  { %1954 = vmatpush.bf16.msrb.mxu2 %v4352_v56 }
 0x9cc   :  { %1966 = vmatpush.bf16.msrb.mxu3 %v4353_v48 }
 0x9d0   :  { %1967 = vmatpush.bf16.msrb.mxu3 %v4354_v49 }
 0x9d4   :  { %1968 = vmatpush.bf16.msrb.mxu3 %v4355_v24 }
 0xa0a   :  { %v1811_v27 = vpop.f32.mrf.mxu3 }
 0xa10   :  { %v1825_v12 = vpop.f32.mrf.mxu2 }
 0xa11   :  { %v1844_v7 = vpack.c.bf16 %v1825_v12, %v1811_v27 }
 0xa12   :  { %v1813_v10 = vpop.f32.mrf.mxu3 }
 0xa13   :  { %v1848_v28 = vunpack.c.l.bf16 %v1844_v7  ;;  %v1849_v3 = vunpack.c.h.bf16 %v1844_v7 }
 0xa15   :  { %v1854_v55 = vmul.f32 %v1848_v28, %v3890_v31  ;;  %v1855_v18 = vmul.f32 %v1849_v3, %v4357_v9 }
 0xa18   :  { %v1827_v2 = vpop.f32.mrf.mxu2 }
 0xa19   :  { %v1846_v36 = vpack.c.bf16 %v1827_v2, %v1813_v10 }
 0xa1a   :  { %v1839_v44 = vpop.f32.mrf.mxu3 }
 0xa1b   :  { %v1851_v16 = vunpack.c.l.bf16 %v1846_v36  ;;  %v1852_v33 = vunpack.c.h.bf16 %v1846_v36  ;;  %v1845_v37 = vpack.c.bf16 %v1839_v44, %v1839_v44 }
 0xa1d   :  { %v1857_v39 = vmul.f32 %v1851_v16, %v3894_v32  ;;  %v1858_v20 = vmul.f32 %v1852_v33, %v4359_v63  ;;  %v1850_v26 = vunpack.c.l.bf16 %v1845_v37 }
 0xa1f   :  { %v1860_v62 = vpack.c.bf16 %v1857_v39, %v1854_v55  ;;  %v1861_v21 = vpack.c.bf16 %v1858_v20, %v1855_v18  ;;  %v1856_v47 = vmul.f32 %v1850_v26, %v4362_v51  ;;  %v3536_v26 = vld [vmem:[%s4233_s5] sm:$0xff]  ;;  %v3537_v51 = vld [vmem:[%s4233_s5 + $0x8] sm:$0xff] }
 0xa21   :  { %1871 = vmatmul.bf16.vlgmr.msrb.gmra.mxu0 %v1860_v62  ;;  %1885 = vmatmul.bf16.vlgmr.msrb.gmra.mxu1 %v1861_v21 }
 0xa22   :  { %1913 = vmatmul.bf16.vlgmr.msra.gmra.mxu3 %v1860_v62  ;;  %v1841_v8 = vpop.f32.mrf.mxu3  ;;  %1975 = vmatpush.bf16.msrb.mxu0 %v4360_v22 }
 0xa23   :  { %v1847_v43 = vpack.c.bf16 %v1841_v8, %v1841_v8  ;;  %2060 = vmatpush.bf16.xpose.msra.mxu3 %v3964_v17  ;;  %v4368_v17 = vld [vmem:[#allocation46_spill] sm:$0xff] }
 0xa25   :  { %v1853_v42 = vunpack.c.l.bf16 %v1847_v43 }
 0xa26   :  { %1976 = vmatpush.bf16.msrb.mxu0 %v4363_v19 }
 0xa27   :  { %v1859_v34 = vmul.f32 %v1853_v42, %v4365_v38 }
 0xa29   :  { %v1862_v30 = vpack.c.bf16 %v1859_v34, %v1856_v47 }
 0xa2a   :  { %1977 = vmatpush.bf16.msrb.mxu0 %v4366_v23 }
 0xa2b   :  { %1899 = vmatmul.bf16.vlgmr.msra.gmra.mxu2 %v1862_v30  ;;  %2061 = vmatpush.bf16.xpose.msra.mxu3 %v3969_v59  ;;  %v4373_v59 = vld [vmem:[#allocation51_spill] sm:$0xff] }
 0xa2e   :  { %1978 = vmatpush.bf16.msrb.mxu0 %v4367_v50 }
 0xa31   :  { %1927 = vmatmul.bf16.vlgmr.msra.gmra.mxu0 %v1861_v21  ;;  %1941 = vmatmul.bf16.vlgmr.msra.gmra.mxu1 %v1862_v30 }
 0xa32   :  { %1969 = vmatmul.bf16.vlgmr.msrb.gmra.mxu3 %v1861_v21  ;;  %1979 = vmatpush.bf16.msrb.mxu0 %v4368_v17 }
 0xa33   :  { %2062 = vmatpush.bf16.xpose.msra.mxu3 %v3974_v1 }
 0xa36   :  { %1980 = vmatpush.bf16.msrb.mxu0 %v4369_v46 }
 0xa3a   :  { %1981 = vmatpush.bf16.msrb.mxu0 %v4370_v60 }
 0xa3b   :  { %1955 = vmatmul.bf16.vlgmr.msrb.gmra.mxu2 %v1860_v62  ;;  %2063 = vmatpush.bf16.xpose.msra.mxu3 %v4371_v5 }
 0xa3e   :  { %1982 = vmatpush.bf16.msrb.mxu0 %v4372_v6 }
 0xa41   :  { %1983 = vmatmul.bf16.vlgmr.msrb.gmra.mxu0 %v1862_v30 }
 0xa43   :  { %2064 = vmatpush.bf16.xpose.msra.mxu3 %v4373_v59 }
 0xa4b   :  { %2065 = vmatpush.bf16.xpose.msra.mxu3 %v4374_v14 }
 0xa53   :  { %2066 = vmatpush.bf16.xpose.msra.mxu3 %v4375_v29 }
 0xa5b   :  { %2067 = vmatpush.bf16.xpose.msra.mxu3 %v4376_v45 }
 0xa9e   :  { %v1872_v4 = vpop.f32.mrf.mxu0  ;;  %v1886_v1 = vpop.f32.mrf.mxu1 }
 0xa9f   :  { %v1887_v44 = vadd.f32 %v1886_v1, %v1872_v4 }
 0xaa5   :  { %v1914_v35 = vpop.f32.mrf.mxu3 }
 0xaa6   :  { %v1874_v58 = vpop.f32.mrf.mxu0  ;;  %v1888_v13 = vpop.f32.mrf.mxu1 }
 0xaa7   :  { %v1889_v28 = vadd.f32 %v1888_v13, %v1874_v58 }
 0xaad   :  { %v1916_v52 = vpop.f32.mrf.mxu3 }
 0xaae   :  { %v1900_v61 = vpop.f32.mrf.mxu2  ;;  %v1928_v41 = vpop.f32.mrf.mxu0 }
 0xaaf   :  { %v1942_v25 = vpop.f32.mrf.mxu1  ;;  %v1929_v53 = vadd.f32 %v1928_v41, %v1914_v35  ;;  %v1901_v33 = vadd.f32 %v1900_v61, %v1887_v44  ;;  %v3161_v35 = vld [vmem:[#allocation5 + $0x3cc] sm:$0xf] }
 0xab0   :  { %v3459_v61 = vld [vmem:[#allocation5 + $0x3e8] sm:$0xf0] }
 0xab1   :  { %v1943_v27 = vadd.f32 %v1942_v25, %v1929_v53  ;;  %v3157_v41 = vld [vmem:[#allocation5 + $0x38c] sm:$0xf]  ;;  %v3162_v25 = vor.u32 %v3459_v61, %v3161_v35  ;;  %v3207_v61 = vld [vmem:[#allocation5 + $0x370] sm:$0xf0] }
 0xab5   :  { %v1970_v7 = vpop.f32.mrf.mxu3 }
 0xab6   :  { %v1902_v56 = vpop.f32.mrf.mxu2  ;;  %v1930_v48 = vpop.f32.mrf.mxu0 }
 0xab7   :  { %v1931_v49 = vadd.f32 %v1930_v48, %v1916_v52  ;;  %v1944_v24 = vpop.f32.mrf.mxu1  ;;  %v1903_v16 = vadd.f32 %v1902_v56, %v1889_v28  ;;  %v3458_v52 = vld [vmem:[#allocation5 + $0x3a8] sm:$0xf0] }
 0xab8   :  { %v3158_v53 = vor.u32 %v3458_v52, %v3157_v41  ;;  %v3153_v56 = vld [vmem:[#allocation5 + $0x34c] sm:$0xf]  ;;  %v3469_v52 = vld [vmem:[#allocation5 + $0x32c] sm:$0xf0] }
 0xab9   :  { %v1945_v12 = vadd.f32 %v1944_v24, %v1931_v49  ;;  %v1989_v55 = vpack.c.bf16 %v1903_v16, %v1901_v33  ;;  %v3457_v48 = vld [vmem:[#allocation5 + $0x368] sm:$0xf0] }
 0xaba   :  { %v3154_v49 = vor.u32 %v3457_v48, %v3153_v56  ;;  %v3149_v24 = vld [vmem:[#allocation5 + $0x30c] sm:$0xf]  ;;  %v3199_v48 = vld [vmem:[#allocation5 + $0x330] sm:$0xf0] }
 0xabb   :  { %v1990_v10 = vpack.c.bf16 %v1945_v12, %v1943_v27  ;;  %v3456_v27 = vld [vmem:[#allocation5 + $0x328] sm:$0xf0] }
 0xabc   :  { %v3150_v12 = vor.u32 %v3456_v27, %v3149_v24  ;;  %v3455_v28 = vld [vmem:[#allocation5 + $0x2e8] sm:$0xf0]  ;;  %v3189_v24 = vld [vmem:[#allocation5 + $0x2d0] sm:$0xf] }
 0xabd   :  { %v1995_v2 = vsel %vm1034_vm2, %v1990_v10, 0  ;;  %v1972_v9 = vpop.f32.mrf.mxu3  ;;  %v3467_v27 = vld [vmem:[#allocation5 + $0x2ec] sm:$0xf0] }
 0xabe   :  { %v1956_v3 = vpop.f32.mrf.mxu2  ;;  %v1984_v36 = vpop.f32.mrf.mxu0  ;;  %2004 = vmatpush.bf16.xpose.msrb.mxu1 %v1995_v2 }
 0xabf   :  { %v1971_v0 = vadd.f32 %v1970_v7, %v1956_v3  ;;  %v3145_v7 = vld [vmem:[#allocation5 + $0x2cc] sm:$0xf] }
 0xac0   :  { %v3146_v2 = vor.u32 %v3455_v28, %v3145_v7  ;;  %v3141_v3 = vld [vmem:[#allocation5 + $0x28c] sm:$0xf]  ;;  %v3191_v7 = vld [vmem:[#allocation5 + $0x2f0] sm:$0xf0] }
 0xac1   :  { %v1985_v63 = vadd.f32 %v1984_v36, %v1971_v0  ;;  %v3454_v36 = vld [vmem:[#allocation5 + $0x2a8] sm:$0xf0] }
 0xac2   :  { %v3142_v16 = vor.u32 %v3454_v36, %v3141_v3  ;;  %v3453_v0 = vld [vmem:[#allocation5 + $0x268] sm:$0xf0]  ;;  %v3465_v3 = vld [vmem:[#allocation5 + $0x2ac] sm:$0xf0]  ;;  %v3464_v36 = vld [vmem:[#allocation5 + $0x294] sm:$0xf] }
 0xac5   :  { %3127 = vmatmul.msk.bf16.vlgmr.msrb.gmra.mxu1 %vm1034_vm2, %v1989_v55  ;;  %v3137_v55 = vld [vmem:[#allocation5 + $0x24c] sm:$0xf] }
 0xac6   :  { %v1958_v18 = vpop.f32.mrf.mxu2  ;;  %v1986_v54 = vpop.f32.mrf.mxu0 }
 0xac7   :  { %v1973_v39 = vadd.f32 %v1972_v9, %v1958_v18 }
 0xac9   :  { %v1987_v20 = vadd.f32 %v1986_v54, %v1973_v39  ;;  %v3138_v54 = vor.u32 %v3453_v0, %v3137_v55  ;;  %v3173_v55 = vld [vmem:[#allocation5 + $0x250] sm:$0xf] }
 0xaca   :  { %v3463_v0 = vld [vmem:[#allocation5 + $0x26c] sm:$0xf0] }
 0xacb   :  { %v2038_v37 = vpack.c.bf16 %v1987_v20, %v1985_v63 }
 0xacd   :  { %2049 = vmatpush.bf16.msra.mxu2 %v2038_v37 }
 0xad1   :  { %2143 = vmatpush.bf16.msrb.mxu2 %v3162_v25  ;;  %v3197_v25 = vld [vmem:[#allocation5 + $0x310] sm:$0xf] }
 0xad2   :  { %v3198_v56 = vor.u32 %v3469_v52, %v3197_v25  ;;  %v3023_v25 = vld [vmem:[%s4235_s7 + $0x1b] ss:$0 sm:$0xff] }
 0xad5   :  { %2144 = vmatpush.bf16.msrb.mxu2 %v3158_v53  ;;  %v3468_v53 = vld [vmem:[#allocation5 + $0x314] sm:$0xf] }
 0xad9   :  { %2145 = vmatpush.bf16.msrb.mxu2 %v3154_v49  ;;  %v3202_v49 = vor.u32 %v3468_v53, %v3199_v48  ;;  %v3024_v48 = vld [vmem:[%s4235_s7 + $0x1c] ss:$0 sm:$0xff] }
 0xadd   :  { %2146 = vmatpush.bf16.msrb.mxu2 %v3150_v12  ;;  %v3466_v12 = vld [vmem:[#allocation5 + $0x2d4] sm:$0xf] }
 0xade   :  { %v3194_v28 = vor.u32 %v3466_v12, %v3191_v7  ;;  %v3483_v12 = vld [vmem:[#allocation5 + $0x2f4] sm:$0xf0]  ;;  %v3255_v7 = vld [vmem:[#allocation5 + $0x2f8] sm:$0xf0] }
 0xae1   :  { %2147 = vmatpush.bf16.msrb.mxu2 %v3146_v2  ;;  %v3181_v2 = vld [vmem:[#allocation5 + $0x290] sm:$0xf] }
 0xae5   :  { %2148 = vmatpush.bf16.msrb.mxu2 %v3142_v16  ;;  %v3183_v16 = vld [vmem:[#allocation5 + $0x2b0] sm:$0xf0] }
 0xae9   :  { %2149 = vmatpush.bf16.msrb.mxu2 %v3138_v54  ;;  %v3165_v54 = vld [vmem:[#allocation5 + $0x210] sm:$0xf] }
 0xb42   :  { %v2006_v62 = vpop.f32.mrf.mxu1 }
 0xb43   :  { %v2011_v21 = vmul.f32 0.35355338, %v2006_v62  ;;  %v3538_v62 = vld [vmem:[%s4230_s2] sm:$0x3] }
 0xb45   :  { %v2013_v8 = vadd.f32 %v3536_v26, %v2011_v21  ;;  %v3133_v21 = vld [vmem:[#allocation5 + $0x20c] sm:$0xf] }
 0xb46   :  { %v3452_v26 = vld [vmem:[#allocation5 + $0x228] sm:$0xf0] }
 0xb47   :  { %v2015_v22 = vsel %vm1059_vm3, %v2013_v8, -inf }
 0xb48   :  { %2016 = vmax.xlane.f32.xlu2 %v2015_v22 }
 0xb4a   :  { %v2008_v43 = vpop.f32.mrf.mxu1 }
 0xb4b   :  { %v2012_v40 = vmul.f32 0.35355338, %v2008_v43 }
 0xb4d   :  { %v2014_v47 = vadd.f32 %v3537_v51, %v2012_v40 }
 0xb4f   :  { %v2018_v42 = vsel %vm1059_vm3, %v2014_v47, -inf }
 0xb50   :  { %2019 = vmax.xlane.f32.xlu0 %v2018_v42 }
 0xbbb   :  { %v2017_v19 = vpop.xlane.xlu2 %2016 }
 0xbbc   :  { %v2021_v15 = vsub.f32 %v2013_v8, %v2017_v19  ;;  %v3134_v8 = vor.u32 %v3452_v26, %v3133_v21 }
 0xbbe   :  { %v2023_v38 = vmul.f32 1.442695, %v2021_v15  ;;  %2150 = vmatpush.bf16.msrb.mxu2 %v3134_v8  ;;  %v3221_v15 = vld [vmem:[#allocation5 + $0x3d0] sm:$0xf]  ;;  %v3285_v8 = vld [vmem:[#allocation5 + $0x3d8] sm:$0xf] }
 0xbc0   :  { %3518 = vpow2.f32 %v2023_v38  ;;  %v3475_v38 = vld [vmem:[#allocation5 + $0x3ec] sm:$0xf0] }
 0xbc3   :  { %v2020_v34 = vpop.xlane.xlu0 %2019 }
 0xbc4   :  { %v2022_v30 = vsub.f32 %v2014_v47, %v2020_v34  ;;  %v3474_v34 = vld [vmem:[#allocation5 + $0x3d4] sm:$0xf] }
 0xbc6   :  { %v3519_v23 = vpop.eup %3518  ;;  %v2025_v50 = vmul.f32 1.442695, %v2022_v30  ;;  %v3222_v30 = vor.u32 %v3475_v38, %v3221_v15  ;;  %v3489_v15 = vld [vmem:[#allocation5 + $0x3b4] sm:$0xf0]  ;;  %v3488_v38 = vld [vmem:[#allocation5 + $0x39c] sm:$0xf] }
 0xbc7   :  { %v2027_v17 = vsel %vm1059_vm3, %v3519_v23, 0.0 }
 0xbc8   :  { %3520 = vpow2.f32 %v2025_v50  ;;  %2028 = vadd.xlane.f32.xlu1 %v2027_v17  ;;  %2267 = vmatpush.bf16.msra.mxu0 %v3222_v30 }
 0xbce   :  { %v3521_v46 = vpop.eup %3520 }
 0xbcf   :  { %v2030_v60 = vsel %vm1059_vm3, %v3521_v46, 0.0 }
 0xbd0   :  { %2031 = vadd.xlane.f32.xlu2 %v2030_v60 }
 0xc3b   :  { %v2029_v5 = vpop.xlane.xlu1 %2028 }
 0xc3c   :  { %3522 = vrcp.f32 %v2029_v5 }
 0xc42   :  { %v3523_v59 = vpop.eup %3522 }
 0xc43   :  { %v2032_v6 = vpop.xlane.xlu2 %2031  ;;  %v2035_v29 = vmul.f32 %v3523_v59, %v3519_v23  ;;  %v3223_v23 = vld [vmem:[#allocation5 + $0x3f0] sm:$0xf0]  ;;  %v3473_v59 = vld [vmem:[#allocation5 + $0x3ac] sm:$0xf0] }
 0xc44   :  { %3524 = vrcp.f32 %v2032_v6  ;;  %v3226_v50 = vor.u32 %v3474_v34, %v3223_v23  ;;  %v3213_v6 = vld [vmem:[#allocation5 + $0x390] sm:$0xf]  ;;  %v3279_v34 = vld [vmem:[#allocation5 + $0x3b8] sm:$0xf0] }
 0xc45   :  { %v3282_v23 = vor.u32 %v3488_v38, %v3279_v34 }
 0xc4a   :  { %v3525_v14 = vpop.eup %3524 }
 0xc4b   :  { %v2036_v45 = vmul.f32 %v3525_v14, %v3521_v46  ;;  %v3472_v14 = vld [vmem:[#allocation5 + $0x394] sm:$0xf] }
 0xc4d   :  { %v2037_v4 = vpack.c.bf16 %v2036_v45, %v2035_v29  ;;  %v3214_v29 = vor.u32 %v3473_v59, %v3213_v6  ;;  %v3215_v45 = vld [vmem:[#allocation5 + $0x3b0] sm:$0xf0]  ;;  %v3271_v6 = vld [vmem:[#allocation5 + $0x378] sm:$0xf0] }
 0xc4f   :  { %3128 = vmatmul.msk.bf16.vlgmr.msra.gmra.mxu2 %vm1059_vm3, %v2037_v4  ;;  %v3218_v4 = vor.u32 %v3472_v14, %v3215_v45  ;;  %2268 = vmatpush.bf16.msra.mxu0 %v3214_v29 }
 0xcd2   :  { %v2051_v1 = vpop.f32.mrf.mxu2 }
 0xcda   :  { %v2053_v58 = vpop.f32.mrf.mxu2 }
 0xcdb   :  { %v2056_v13 = vpack.c.bf16 %v2053_v58, %v2051_v1  ;;  %v3205_v1 = vld [vmem:[#allocation5 + $0x350] sm:$0xf] }
 0xcdc   :  { %v3471_v58 = vld [vmem:[#allocation5 + $0x36c] sm:$0xf0] }
 0xcdd   :  { %3129 = vmatmul.msk.bf16.vlgmr.msra.gmra.mxu3 %vm1034_vm2, %v2056_v13  ;;  %v3470_v13 = vld [vmem:[#allocation5 + $0x354] sm:$0xf]  ;;  %v3206_v35 = vor.u32 %v3471_v58, %v3205_v1  ;;  %v3261_v1 = vld [vmem:[#allocation5 + $0x318] sm:$0xf] }
 0xcde   :  { %v3210_v41 = vor.u32 %v3470_v13, %v3207_v61  ;;  %v3485_v58 = vld [vmem:[#allocation5 + $0x334] sm:$0xf0]  ;;  %v3263_v61 = vld [vmem:[#allocation5 + $0x338] sm:$0xf0] }
 0xcdf   :  { %2269 = vmatpush.bf16.msra.mxu0 %v3206_v35  ;;  %v3484_v35 = vld [vmem:[#allocation5 + $0x31c] sm:$0xf]  ;;  %v3262_v52 = vor.u32 %v3485_v58, %v3261_v1 }
 0xce3   :  { %2270 = vmatpush.bf16.msra.mxu0 %v3198_v56  ;;  %v3266_v56 = vor.u32 %v3484_v35, %v3263_v61 }
 0xd60   :  { %v2069_v10 = vpop.f32.mrf.mxu3 }
 0xd61   :  { %v2074_v44 = vpack.c.bf16 %v2069_v10, %v2069_v10  ;;  %v3190_v10 = vor.u32 %v3467_v27, %v3189_v24  ;;  %v3253_v27 = vld [vmem:[#allocation5 + $0x2d8] sm:$0xf] }
 0xd63   :  { %v2076_v9 = vunpack.c.l.bf16 %v2074_v44  ;;  %2271 = vmatpush.bf16.msra.mxu0 %v3190_v10  ;;  %v3182_v44 = vor.u32 %v3465_v3, %v3181_v2  ;;  %v3482_v10 = vld [vmem:[#allocation5 + $0x2dc] sm:$0xf]  ;;  %v3254_v2 = vor.u32 %v3483_v12, %v3253_v27  ;;  %v3245_v3 = vld [vmem:[#allocation5 + $0x298] sm:$0xf] }
 0xd65   :  { %v2078_v63 = vmul.f32 %v2076_v9, %v3890_v31  ;;  %v3462_v9 = vld [vmem:[#allocation5 + $0x254] sm:$0xf] }
 0xd67   :  { %2272 = vmatpush.bf16.msra.mxu0 %v3182_v44  ;;  %v3480_v44 = vld [vmem:[#allocation5 + $0x29c] sm:$0xf] }
 0xd68   :  { %v2071_v33 = vpop.f32.mrf.mxu3 }
 0xd69   :  { %v2075_v18 = vpack.c.bf16 %v2071_v33, %v2071_v33  ;;  %v3186_v33 = vor.u32 %v3464_v36, %v3183_v16  ;;  %v3481_v36 = vld [vmem:[#allocation5 + $0x2b4] sm:$0xf0] }
 0xd6a   :  { %v3246_v16 = vor.u32 %v3481_v36, %v3245_v3 }
 0xd6b   :  { %v2077_v39 = vunpack.c.l.bf16 %v2075_v18  ;;  %v3174_v18 = vor.u32 %v3463_v0, %v3173_v55  ;;  %v3237_v0 = vld [vmem:[#allocation5 + $0x258] sm:$0xf] }
 0xd6d   :  { %v2079_v20 = vmul.f32 %v2077_v39, %v3894_v32  ;;  %v3022_v32 = vld [vmem:[%s4235_s7 + $0x1a] ss:$0 sm:$0xff]  ;;  %v3175_v39 = vld [vmem:[#allocation5 + $0x270] sm:$0xf0]  ;;  %2273 = vmatpush.bf16.msra.mxu0 %v3174_v18  ;;  %v3478_v18 = vld [vmem:[#allocation5 + $0x25c] sm:$0xf] }
 0xd6f   :  { %v2080_v37 = vpack.c.bf16 %v2079_v20, %v2078_v63  ;;  %v3461_v63 = vld [vmem:[#allocation5 + $0x22c] sm:$0xf0]  ;;  %v3178_v20 = vor.u32 %v3462_v9, %v3175_v39  ;;  %v3479_v9 = vld [vmem:[#allocation5 + $0x274] sm:$0xf0] }
 0xd70   :  { %v3166_v21 = vor.u32 %v3461_v63, %v3165_v54  ;;  %v3238_v39 = vor.u32 %v3479_v9, %v3237_v0  ;;  %v3239_v54 = vld [vmem:[#allocation5 + $0x278] sm:$0xf0] }
 0xd71   :  { %2088 = vmatpush.bf16.msra.mxu1 %v2080_v37  ;;  %v3460_v37 = vld [vmem:[#allocation5 + $0x214] sm:$0xf]  ;;  %v3242_v63 = vor.u32 %v3478_v18, %v3239_v54  ;;  %v3026_v18 = vld [vmem:[%s4235_s7 + $0x1e] ss:$0 sm:$0xff] }
 0xd72   :  { %2274 = vmatpush.bf16.msra.mxu0 %v3166_v21  ;;  %v3231_v21 = vld [vmem:[#allocation5 + $0x238] sm:$0xf0] }
 0xd74   :  { %3130 = vmatmul.msk.bf16.vlgmr.msra.gmra.mxu1 %vm1059_vm3, %v3538_v62  ;;  %v3167_v62 = vld [vmem:[#allocation5 + $0x230] sm:$0xf0] }
 0xd75   :  { %2280 = vmatpush.bf16.msrb.mxu1 %v3226_v50  ;;  %v3170_v26 = vor.u32 %v3460_v37, %v3167_v62  ;;  %v3477_v37 = vld [vmem:[#allocation5 + $0x234] sm:$0xf0]  ;;  %v3476_v62 = vld [vmem:[#allocation5 + $0x21c] sm:$0xf] }
 0xd79   :  { %2281 = vmatpush.bf16.msrb.mxu1 %v3218_v4 }
 0xd7d   :  { %2282 = vmatpush.bf16.msrb.mxu1 %v3210_v41 }
 0xd81   :  { %2283 = vmatpush.bf16.msrb.mxu1 %v3202_v49 }
 0xd85   :  { %2284 = vmatpush.bf16.msrb.mxu1 %v3194_v28 }
 0xd89   :  { %2285 = vmatpush.bf16.msrb.mxu1 %v3186_v33  ;;  %v3247_v33 = vld [vmem:[#allocation5 + $0x2b8] sm:$0xf0] }
 0xd8a   :  { %v3250_v55 = vor.u32 %v3480_v44, %v3247_v33 }
 0xd8d   :  { %2286 = vmatpush.bf16.msrb.mxu1 %v3178_v20  ;;  %v3229_v20 = vld [vmem:[#allocation5 + $0x218] sm:$0xf] }
 0xd91   :  { %2287 = vmatpush.bf16.msrb.mxu1 %v3170_v26  ;;  %v3230_v26 = vor.u32 %v3477_v37, %v3229_v20 }
 0xdf1   :  { %v2090_v22 = vpop.f32.mrf.mxu1 }
 0xdf2   :  { %v2094_v43 = vpack.c.bf16 %v2090_v22, %v2090_v22  ;;  %v3491_v22 = vld [vmem:[#allocation5 + $0x3f4] sm:$0xf0] }
 0xdf4   :  { %2151 = vmatmul.bf16.vlgmr.msrb.gmra.mxu2 %v2094_v43  ;;  %v3490_v43 = vld [vmem:[#allocation5 + $0x3dc] sm:$0xf] }
 0xdf9   :  { %v2092_v40 = vpop.f32.mrf.mxu1 }
 0xe77   :  { %v2152_v31 = vpop.f32.mrf.mxu2 }
 0xe78   :  { %v2153_v51 = vadd.f32 %v3022_v32, %v2152_v31  ;;  %v3286_v32 = vor.u32 %v3491_v22, %v3285_v8  ;;  %v3287_v31 = vld [vmem:[#allocation5 + $0x3f8] sm:$0xf0]  ;;  %v3234_v8 = vor.u32 %v3476_v62, %v3231_v21  ;;  %v3021_v22 = vld [vmem:[%s4235_s7 + $0x19] ss:$8 sm:$0x3] }
 0xe7a   :  { %v2156_v47 = vadd.f32 %v2153_v51, %v4075_v57  ;;  %2393 = vmatpush.bf16.xpose.msra.mxu2 %v3286_v32 }
 0xe7c   :  { %v2157_v42 = vsel %vm1229_vm4, %v2156_v47, 0.0 }
 0xe7d   :  { %2158 = vadd.xlane.f32.xlu0 %v2157_v42 }
 0xe7f   :  { %v2154_v19 = vpop.f32.mrf.mxu2 }
 0xe80   :  { %v3277_v19 = vld [vmem:[#allocation5 + $0x398] sm:$0xf] }
 0xe81   :  { %v3278_v30 = vor.u32 %v3489_v15, %v3277_v19 }
 0xe83   :  { %2394 = vmatpush.bf16.xpose.msra.mxu2 %v3278_v30 }
 0xef0   :  { %v2159_v17 = vpop.xlane.xlu0 %2158 }
 0xef1   :  { %v2160_v46 = vmul.f32 %v2159_v17, %v4017_v11  ;;  %v3269_v17 = vld [vmem:[#allocation5 + $0x358] sm:$0xf] }
 0xef3   :  { %v4191_v60 = vsub.f32 %v2156_v47, %v2160_v46  ;;  %v3290_v47 = vor.u32 %v3490_v43, %v3287_v31  ;;  %v3487_v46 = vld [vmem:[#allocation5 + $0x374] sm:$0xf0]  ;;  %v2183_v43 = vperm.slane %v3021_v22, 0 }
 0xef4   :  { %v3270_v14 = vor.u32 %v3487_v46, %v3269_v17 }
 0xef5   :  { %v2162_v57 = vmul.f32 %v4191_v60, %v4191_v60  ;;  %2406 = vmatpush.bf16.xpose.msrb.mxu0 %v3290_v47 }
 0xef6   :  { %2395 = vmatpush.bf16.xpose.msra.mxu2 %v3270_v14 }
 0xef7   :  { %v2163_v5 = vsel %vm1229_vm4, %v2162_v57, 0.0 }
 0xef8   :  { %2164 = vadd.xlane.f32.xlu1 %v2163_v5  ;;  %v3486_v5 = vld [vmem:[#allocation5 + $0x35c] sm:$0xf] }
 0xef9   :  { %v3274_v29 = vor.u32 %v3486_v5, %v3271_v6 }
 0xefd   :  { %2407 = vmatpush.bf16.xpose.msrb.mxu0 %v3282_v23 }
 0xefe   :  { %2396 = vmatpush.bf16.xpose.msra.mxu2 %v3262_v52 }
 0xf05   :  { %2408 = vmatpush.bf16.xpose.msrb.mxu0 %v3274_v29 }
 0xf06   :  { %2397 = vmatpush.bf16.xpose.msra.mxu2 %v3254_v2 }
 0xf0d   :  { %2409 = vmatpush.bf16.xpose.msrb.mxu0 %v3266_v56 }
 0xf0e   :  { %2398 = vmatpush.bf16.xpose.msra.mxu2 %v3246_v16 }
 0xf16   :  { %2399 = vmatpush.bf16.xpose.msra.mxu2 %v3238_v39 }
 0xf1e   :  { %2400 = vmatpush.bf16.xpose.msra.mxu2 %v3230_v26 }
 0xf6b   :  { %v2165_v40 = vpop.xlane.xlu1 %2164 }
 0xf6c   :  { %v2166_v51 = vmul.f32 %v2165_v40, %v4017_v11  ;;  %v2184_v40 = vperm.slane %v3021_v22, 1 }
 0xf6e   :  { %v2167_v42 = vadd.f32 1e-05, %v2166_v51 }
 0xf70   :  { %3526 = vrsqrt.f32 %v2167_v42  ;;  %vm2174_vm13 = vweird.f32 %v2167_v42 }
 0xf76   :  { %v3527_v50 = vpop.eup %3526 }
 0xf77   :  { %v2169_v57 = vmul.f32 %v3527_v50, %v2167_v42  ;;  %vm2175_vm12 = vweird.f32 %v3527_v50 }
 0xf78   :  { %vm2176_vm14 = vmor %vm2174_vm13, %vm2175_vm12 }
 0xf79   :  { %v2170_v59 = vmul.f32 %v3527_v50, %v2169_v57 }
 0xf7b   :  { %v2171_v45 = vmul.f32 0.5, %v2170_v59 }
 0xf7d   :  { %v2172_v4 = vsub.f32 1.5, %v2171_v45 }
 0xf7f   :  { %v2173_v13 = vmul.f32 %v3527_v50, %v2172_v4 }
 0xf81   :  { %v2177_v41 = vsel %vm2176_vm14, %v3527_v50, %v2173_v13 }
 0xf82   :  { %v2178_v53 = vmul.f32 %v2177_v41, %v4191_v60  ;;  %v3258_v60 = vor.u32 %v3482_v10, %v3255_v7  ;;  %v3025_v41 = vld [vmem:[%s4235_s7 + $0x1d] ss:$0 sm:$0xff] }
 0xf84   :  { %v2179_v49 = vmul.f32 %v3023_v25, %v2178_v53  ;;  %2410 = vmatpush.bf16.xpose.msrb.mxu0 %v3258_v60 }
 0xf86   :  { %v4204_v24 = vadd.f32 %v3024_v48, %v2179_v49 }
 0xf88   :  { %v2181_v28 = vpack.c.bf16 %v4204_v24, %v4204_v24 }
 0xf8a   :  { %2275 = vmatmul.bf16.vlgmr.msra.gmra.mxu0 %v2181_v28  ;;  %2288 = vmatmul.bf16.vlgmr.msrb.gmra.mxu1 %v2181_v28 }
 0xf8c   :  { %2411 = vmatpush.bf16.xpose.msrb.mxu0 %v3250_v55 }
 0xf94   :  { %2412 = vmatpush.bf16.xpose.msrb.mxu0 %v3242_v63 }
 0xf9c   :  { %2413 = vmatpush.bf16.xpose.msrb.mxu0 %v3234_v8 }
0x1007   :  { %v2276_v32 = vpop.f32.mrf.mxu0  ;;  %v2289_v31 = vpop.f32.mrf.mxu1 }
0x1008   :  { %v2277_v51 = vadd.f32 %v2276_v32, %v2183_v43  ;;  %v2290_v47 = vadd.f32 %v2289_v31, %v2184_v40 }
0x100a   :  { %v2295_v42 = vmul.f32 0.044715, %v2277_v51  ;;  %v2296_v19 = vmul.f32 0.044715, %v2290_v47  ;;  %v2293_v14 = vmul.f32 0.5, %v2277_v51  ;;  %v2294_v45 = vmul.f32 0.5, %v2290_v47 }
0x100c   :  { %v2297_v15 = vmul.f32 %v2295_v42, %v2277_v51  ;;  %v2298_v38 = vmul.f32 %v2296_v19, %v2290_v47 }
0x100e   :  { %v2299_v34 = vmul.f32 %v2297_v15, %v2277_v51  ;;  %v2300_v30 = vmul.f32 %v2298_v38, %v2290_v47 }
0x100f   :  { %v2278_v23 = vpop.f32.mrf.mxu0  ;;  %v2291_v50 = vpop.f32.mrf.mxu1 }
0x1010   :  { %v2301_v17 = vadd.f32 %v2299_v34, %v2277_v51  ;;  %v2302_v46 = vadd.f32 %v2300_v30, %v2290_v47 }
0x1012   :  { %v2303_v57 = vmul.f32 0.7978846, %v2301_v17  ;;  %v2304_v5 = vmul.f32 0.7978846, %v2302_v46 }
0x1014   :  { %3528 = vtanh.f32 %v2303_v57 }
0x1015   :  { %3530 = vtanh.f32 %v2304_v5 }
0x101a   :  { %v3529_v6 = vpop.eup %3528 }
0x101b   :  { %v3531_v59 = vpop.eup %3530  ;;  %v2307_v29 = vadd.f32 1.0, %v3529_v6 }
0x101c   :  { %v2308_v4 = vadd.f32 1.0, %v3531_v59 }
0x101d   :  { %v2309_v1 = vmul.f32 %v2307_v29, %v2293_v14 }
0x101e   :  { %v2310_v58 = vmul.f32 %v2308_v4, %v2294_v45 }
0x101f   :  { %v2311_v13 = vpack.c.bf16 %v2309_v1, %v2309_v1 }
0x1020   :  { %v2312_v35 = vpack.c.bf16 %v2310_v58, %v2310_v58 }
0x1021   :  { %2401 = vmatmul.bf16.vlgmr.msra.gmra.mxu2 %v2311_v13 }
0x1022   :  { %2414 = vmatmul.bf16.vlgmr.msrb.gmra.mxu0 %v2312_v35 }
0x109f   :  { %v2415_v61 = vpop.f32.mrf.mxu0 }
0x10a4   :  { %v2402_v25 = vpop.f32.mrf.mxu2 }
0x10a5   :  { %v2403_v52 = vadd.f32 %v3025_v41, %v2402_v25 }
0x10a7   :  { %v2416_v53 = vadd.f32 %v2415_v61, %v2403_v52  ;;  %v2417_v56 = vpop.f32.mrf.mxu0 }
0x10a9   :  { %v2419_v48 = vadd.f32 %v2416_v53, %v4204_v24 }
0x10ab   :  { %v2420_v49 = vsel %vm1229_vm4, %v2419_v48, 0.0 }
0x10ac   :  { %v2404_v27 = vpop.f32.mrf.mxu2  ;;  %2421 = vadd.xlane.f32.xlu2 %v2420_v49 }
0x111f   :  { %v2422_v12 = vpop.xlane.xlu2 %2421 }
0x1120   :  { %v2423_v10 = vmul.f32 %v2422_v12, %v4017_v11 }
0x1122   :  { %v2424_v7 = vsub.f32 %v2419_v48, %v2423_v10 }
0x1124   :  { %v2425_v28 = vmul.f32 %v2424_v7, %v2424_v7 }
0x1126   :  { %v2426_v2 = vsel %vm1229_vm4, %v2425_v28, 0.0 }
0x1127   :  { %2427 = vadd.xlane.f32.xlu0 %v2426_v2 }
0x119a   :  { %v2428_v60 = vpop.xlane.xlu0 %2427 }
0x119b   :  { %v2429_v3 = vmul.f32 %v2428_v60, %v4017_v11  ;;  %v3027_v11 = vld [vmem:[%s4235_s7 + $0x1f] ss:$0 sm:$0xff] }
0x119d   :  { %v2430_v36 = vadd.f32 1e-05, %v2429_v3 }
0x119f   :  { %3532 = vrsqrt.f32 %v2430_v36  ;;  %vm2437_vm0 = vweird.f32 %v2430_v36 }
0x11a5   :  { %v3533_v44 = vpop.eup %3532 }
0x11a6   :  { %v2432_v16 = vmul.f32 %v3533_v44, %v2430_v36  ;;  %vm2438_vm15 = vweird.f32 %v3533_v44 }
0x11a7   :  { %vm2439_vm1 = vmor %vm2437_vm0, %vm2438_vm15 }
0x11a8   :  { %v2433_v24 = vmul.f32 %v3533_v44, %v2432_v16 }
0x11aa   :  { %v2434_v33 = vmul.f32 0.5, %v2433_v24 }
0x11ac   :  { %v2435_v55 = vsub.f32 1.5, %v2434_v33 }
0x11ae   :  { %v2436_v0 = vmul.f32 %v3533_v44, %v2435_v55 }
0x11b0   :  { %v2440_v9 = vsel %vm2439_vm1, %v3533_v44, %v2436_v0 }
0x11b1   :  { %v2441_v39 = vmul.f32 %v2440_v9, %v2424_v7 }
0x11b3   :  { %v2442_v54 = vmul.f32 %v3026_v18, %v2441_v39 }
0x11b5   :  { %v2443_v63 = vadd.f32 %v3027_v11, %v2442_v54 }
0x11b7   :  { %2444 = vst [vmem:[#allocation7] sm:$0xf] %v2443_v63 }
0x11b8   :  { %2455 = dma.vmem_to_hbm [thread:$0]  %s2451_s23, 64, %s2453_s26, [#allocation4]  }
0x11b9   :  { %3615 = dma.done.wait [#allocation4], 64  }
0x11ba   :  { %3616 = vsyncadd [#allocation4], 4294967232 }
0x11bb   :  { %2460 = vsyncpa [#allocation3], 1 }
0x11bc   :  { %2461 = vsyncpa [#allocation6], 1 }
0x11bd   :  { %2462 = vsyncpa [#allocation4], 1 }

</bundles_post_ra>
